<compile_context>
chip_gen: v7x
topology: tpu7x:2x2x1
jax: 0.10.0
libtpu: 0.0.40
codegen_flags: <defaults>
</compile_context>

<pallas_src>
import functools

import jax
import jax.numpy as jnp
from jax.experimental import pallas as pl
from jax.experimental.pallas import tpu as pltpu

LANE = 128


def _lstm_reg_kernel(x_ref,            # (S*Bp, IN)
                     wih0_ref,         # (IN, 4Hp)   gate cols (i, f, o, g)
                     whh0_ref,         # (Hp, 4Hp)
                     b0_ref,           # (1, 4Hp)
                     wih1_ref,         # (Hp, 4Hp)
                     whh1_ref,         # (Hp, 4Hp)
                     b1_ref,           # (1, 4Hp)
                     wreg_ref,         # (Hp, OUTp)
                     breg_ref,         # (1, OUTp)
                     o_ref,            # (S*Bp, OUTp)
                     xg_ref,           # VMEM scratch (S*Bp, 4Hp)
                     hseq_ref,         # VMEM scratch (S*Bp, Hp)
                     *, hidden, seq_len, batch, unroll):
    H = hidden                          # padded hidden size (multiple of 128)
    Bp = batch                          # padded batch (multiple of 8)

    # Layer-0 input projection for ALL timesteps at once (off the critical
    # path), with the layer-0 bias folded in.
    xg_ref[...] = (jnp.dot(x_ref[...], wih0_ref[...],
                           preferred_element_type=jnp.float32)
                   + b0_ref[...])

    # Hoisted b1 broadcast (stays in vregs across the loop).
    b1v = jnp.broadcast_to(b1_ref[...], (Bp, 4 * H))

    def sig(v):
        # sigmoid via a single tanh EUP push: 0.5 * tanh(0.5*x) + 0.5
        return 0.5 * jnp.tanh(0.5 * v) + 0.5

    def step(t, carry):
        h0, c0, h1, c1 = carry
        row = pl.multiple_of(t * Bp, Bp)   # sublane-aligned (Bp multiple of 8)

        # ---- LSTM layer 0: only the recurrent matmul per step ----
        g0 = xg_ref[pl.ds(row, Bp), :] + jnp.dot(
            h0, whh0_ref[...], preferred_element_type=jnp.float32)
        s0 = sig(g0[:, :3 * H])            # i, f, o gates (contiguous block)
        i0, f0, o0 = s0[:, :H], s0[:, H:2 * H], s0[:, 2 * H:]
        gg0 = jnp.tanh(g0[:, 3 * H:])
        c0 = f0 * c0 + i0 * gg0
        h0 = o0 * jnp.tanh(c0)

        # ---- LSTM layer 1: two accumulated dots (no concat / relayout) ----
        g1 = (jnp.dot(h0, wih1_ref[...], preferred_element_type=jnp.float32)
              + jnp.dot(h1, whh1_ref[...], preferred_element_type=jnp.float32)
              + b1v)
        s1 = sig(g1[:, :3 * H])
        i1, f1, o1 = s1[:, :H], s1[:, H:2 * H], s1[:, 2 * H:]
        gg1 = jnp.tanh(g1[:, 3 * H:])
        c1 = f1 * c1 + i1 * gg1
        h1 = o1 * jnp.tanh(c1)

        # Stash layer-1 hidden state for the batched head matmul after loop.
        hseq_ref[pl.ds(row, Bp), :] = h1
        return (h0, c0, h1, c1)

    z = jnp.zeros((Bp, H), jnp.float32)
    jax.lax.fori_loop(0, seq_len, step, (z, z, z, z), unroll=unroll)

    # Regression head: one lane-dense (S*Bp, Hp) @ (Hp, OUTp) matmul + store.
    o_ref[...] = (jnp.dot(hseq_ref[...], wreg_ref[...],
                          preferred_element_type=jnp.float32)
                  + breg_ref[...]).astype(o_ref.dtype)


def lstm_reg_forward(x, packed_params, *, hidden_pad, output_size, output_pad):
    """x: (S, B, input_size) f32 -> (S, B, output_size) f32."""
    S, B, IN = x.shape
    Hp, OUTp = hidden_pad, output_pad
    Bp = ((B + 7) // 8) * 8              # pad batch to full sublanes
    if Bp != B:
        x = jnp.pad(x, ((0, 0), (0, Bp - B), (0, 0)))
    x2d = x.reshape(S * Bp, IN)          # row index = t * Bp + b

    wih0, whh0, b0, wih1, whh1, b1, wreg, breg = packed_params

    # Cap unroll by live vreg footprint (review: avoid spilling h/c/gates).
    if Bp <= 16:
        unroll = True if S <= 16 else 8
    elif Hp <= 128:
        unroll = 4
    else:
        unroll = 2

    kernel = functools.partial(_lstm_reg_kernel, hidden=Hp, seq_len=S,
                               batch=Bp, unroll=unroll)

    # Size scoped VMEM to the actual resident set (inputs + scratch + out + w).
    resident = 4 * (S * Bp * (IN + 4 * Hp + Hp + OUTp)
                    + (IN + 3 * Hp) * 4 * Hp + Hp * OUTp + 8 * Hp + OUTp)
    vmem_limit = int(min(max(2 * resident + (4 << 20), 32 << 20), 100 << 20))

    vmem = pl.BlockSpec(memory_space=pltpu.MemorySpace.VMEM)
    out = pl.pallas_call(
        kernel,
        out_shape=jax.ShapeDtypeStruct((S * Bp, OUTp), jnp.float32),
        in_specs=[vmem] * 9,
        out_specs=vmem,
        scratch_shapes=[
            pltpu.VMEM((S * Bp, 4 * Hp), jnp.float32),   # precomputed x-gates
            pltpu.VMEM((S * Bp, Hp), jnp.float32),       # h1 sequence
        ],
        compiler_params=pltpu.CompilerParams(vmem_limit_bytes=vmem_limit),
    )(x2d, wih0, whh0, b0, wih1, whh1, b1, wreg, breg)

    # TODO(synk): for long S, chunk the sequence (double-buffer x/xg/hseq/out
    # chunks, overlap the head matmul with the recurrence) to bound VMEM
    # (mandatory on v7x's 64 MiB), optionally cast the hoisted projection /
    # head matmuls to bf16 on v6e/v7x, and shard the padded batch across both
    # v7x TensorCores once Bp >= 16.
    return out.reshape(S, Bp, OUTp)[:, :B, :output_size]


# ----------------------------- parameters -----------------------------------

def make_raw_params(key, input_size, hidden_size, output_size):
    """PyTorch-shaped LSTM/Linear weights (gate row order i, f, g, o)."""
    H = hidden_size
    s = float(H) ** -0.5
    ks = jax.random.split(key, 10)
    u = lambda k, shape: jax.random.uniform(k, shape, jnp.float32, -s, s)
    return dict(
        wih0=u(ks[0], (4 * H, input_size)), whh0=u(ks[1], (4 * H, H)),
        bih0=u(ks[2], (4 * H,)), bhh0=u(ks[3], (4 * H,)),
        wih1=u(ks[4], (4 * H, H)), whh1=u(ks[5], (4 * H, H)),
        bih1=u(ks[6], (4 * H,)), bhh1=u(ks[7], (4 * H,)),
        wreg=u(ks[8], (output_size, H)), breg=u(ks[9], (output_size,)),
    )


def pack_params(raw, hidden_size, *, lane=LANE):
    """Transpose / reorder / zero-pad weights for the kernel.

    Gate columns are packed (i, f, o, g), each gate block padded to
    Hp = ceil(H/128)*128 lanes; OUT is padded to OUTp = ceil(OUT/128)*128.
    Zero padding keeps the extra hidden units exactly at h = c = 0.
    """
    H = hidden_size
    Hp = ((H + lane - 1) // lane) * lane

    def reorder_pad_rows(w):
        # PyTorch gate row blocks (i, f, g, o) -> (i, f, o, g), each Hp rows.
        i, f, g, o = jnp.split(w, 4, axis=0)
        pad = [(0, Hp - H)] + [(0, 0)] * (w.ndim - 1)
        return jnp.concatenate([jnp.pad(b, pad) for b in (i, f, o, g)], axis=0)

    def pad_cols(w):   # pad last axis H -> Hp with zeros
        return jnp.pad(w, [(0, 0)] * (w.ndim - 1) + [(0, Hp - H)])

    wih0 = reorder_pad_rows(raw["wih0"]).T                            # (IN, 4Hp)
    whh0 = pad_cols(reorder_pad_rows(raw["whh0"])).T                  # (Hp, 4Hp)
    b0 = reorder_pad_rows((raw["bih0"] + raw["bhh0"])[:, None]).reshape(1, 4 * Hp)
    wih1 = pad_cols(reorder_pad_rows(raw["wih1"])).T                  # (Hp, 4Hp)
    whh1 = pad_cols(reorder_pad_rows(raw["whh1"])).T                  # (Hp, 4Hp)
    b1 = reorder_pad_rows((raw["bih1"] + raw["bhh1"])[:, None]).reshape(1, 4 * Hp)

    OUT = raw["wreg"].shape[0]
    OUTp = ((OUT + lane - 1) // lane) * lane
    wreg = jnp.pad(raw["wreg"].T, ((0, Hp - H), (0, OUTp - OUT)))     # (Hp, OUTp)
    breg = jnp.pad(raw["breg"], ((0, OUTp - OUT),)).reshape(1, OUTp)  # (1, OUTp)
    return (wih0, whh0, b0, wih1, whh1, b1, wreg, breg), Hp, OUTp


# ----------------------------- reference -------------------------------------

def lstm_reg_reference(x, raw, *, hidden_size):
    """Pure-JAX reference with PyTorch LSTM semantics (gate order i, f, g, o)."""
    H = hidden_size

    def cell(h, c, inp, wih, whh, bih, bhh):
        g = inp @ wih.T + h @ whh.T + bih + bhh
        i = jax.nn.sigmoid(g[:, 0 * H:1 * H])
        f = jax.nn.sigmoid(g[:, 1 * H:2 * H])
        gg = jnp.tanh(g[:, 2 * H:3 * H])
        o = jax.nn.sigmoid(g[:, 3 * H:4 * H])
        c = f * c + i * gg
        h = o * jnp.tanh(c)
        return h, c

    def step(carry, x_t):
        h0, c0, h1, c1 = carry
        h0, c0 = cell(h0, c0, x_t, raw["wih0"], raw["whh0"], raw["bih0"], raw["bhh0"])
        h1, c1 = cell(h1, c1, h0, raw["wih1"], raw["whh1"], raw["bih1"], raw["bhh1"])
        y = h1 @ raw["wreg"].T + raw["breg"]
        return (h0, c0, h1, c1), y

    B = x.shape[1]
    z = jnp.zeros((B, H), jnp.float32)
    _, ys = jax.lax.scan(step, (z, z, z, z), x)
    return ys


if __name__ == "__main__":
    SEQ, BATCH, INPUT, HIDDEN, OUT = 8, 4, 8, 32, 1

    key = jax.random.PRNGKey(0)
    kx, kp = jax.random.split(key)
    x = jax.random.normal(kx, (SEQ, BATCH, INPUT), jnp.float32)

    raw = make_raw_params(kp, INPUT, HIDDEN, OUT)
    packed, Hp, OUTp = pack_params(raw, HIDDEN)

    y = lstm_reg_forward(x, packed, hidden_pad=Hp,
                         output_size=OUT, output_pad=OUTp)
    y = jax.block_until_ready(y)

    y_ref = lstm_reg_reference(x, raw, hidden_size=HIDDEN)
    assert y.shape == (SEQ, BATCH, OUT)
    assert jnp.allclose(y, y_ref, atol=1e-4, rtol=1e-4), "mismatch vs reference"

    print("KERNEL_OK")
</pallas_src>

<mosaic_0001>
module attributes {stable_mosaic.version = 11 : i64} {
  func.func @_lstm_reg_kernel(%arg0: memref<64x8xf32, #tpu.memory_space<vmem>>, %arg1: memref<8x512xf32, #tpu.memory_space<vmem>>, %arg2: memref<128x512xf32, #tpu.memory_space<vmem>>, %arg3: memref<1x512xf32, #tpu.memory_space<vmem>>, %arg4: memref<128x512xf32, #tpu.memory_space<vmem>>, %arg5: memref<128x512xf32, #tpu.memory_space<vmem>>, %arg6: memref<1x512xf32, #tpu.memory_space<vmem>>, %arg7: memref<128x128xf32, #tpu.memory_space<vmem>>, %arg8: memref<1x128xf32, #tpu.memory_space<vmem>>, %arg9: memref<64x128xf32, #tpu.memory_space<vmem>>, %arg10: memref<64x512xf32, #tpu.memory_space<vmem>>, %arg11: memref<64x128xf32, #tpu.memory_space<vmem>>) attributes {dimension_semantics = [], scalar_prefetch = 0 : i64, scratch_operands = 2 : i64, tpu.core_type = #tpu.core_type<tc>} {
    %c0 = arith.constant 0 : index
    %c0_0 = arith.constant 0 : index
    %0 = vector.load %arg0[%c0, %c0_0] : memref<64x8xf32, #tpu.memory_space<vmem>>, vector<64x8xf32>
    %c0_1 = arith.constant 0 : index
    %c0_2 = arith.constant 0 : index
    %1 = vector.load %arg1[%c0_1, %c0_2] : memref<8x512xf32, #tpu.memory_space<vmem>>, vector<8x512xf32>
    %cst = arith.constant dense<0.000000e+00> : vector<64x512xf32>
    %2 = tpu.matmul %0, %1, %cst {dimension_numbers = #tpu.dot_dimension_numbers<[1], [0], [0], [1], [0, 0, 1, 1], [], []>} : vector<64x8xf32>, vector<8x512xf32>, vector<64x512xf32> -> vector<64x512xf32>
    %c0_3 = arith.constant 0 : index
    %c0_4 = arith.constant 0 : index
    %3 = vector.load %arg3[%c0_3, %c0_4] : memref<1x512xf32, #tpu.memory_space<vmem>>, vector<1x512xf32>
    %4 = vector.broadcast %3 : vector<1x512xf32> to vector<64x512xf32>
    %5 = arith.addf %2, %4 : vector<64x512xf32>
    %c0_5 = arith.constant 0 : index
    %c0_6 = arith.constant 0 : index
    %6 = vector.load %arg10[%c0_5, %c0_6] : memref<64x512xf32, #tpu.memory_space<vmem>>, vector<64x512xf32>
    tpu.vector_store %arg10[%c0_5, %c0_6], %5 {strides = array<i32>} : memref<64x512xf32, #tpu.memory_space<vmem>>, vector<64x512xf32>,
    %c0_7 = arith.constant 0 : index
    %c0_8 = arith.constant 0 : index
    %7 = vector.load %arg6[%c0_7, %c0_8] : memref<1x512xf32, #tpu.memory_space<vmem>>, vector<1x512xf32>
    %8 = vector.shape_cast %7 : vector<1x512xf32> to vector<1x512xf32>
    %9 = vector.broadcast %8 : vector<1x512xf32> to vector<8x512xf32>
    %cst_9 = arith.constant 0.000000e+00 : f32
    %10 = vector.broadcast %cst_9 : f32 to vector<8x128xf32>
    %c0_i32 = arith.constant 0 : i32
    %c8_i32 = arith.constant 8 : i32
    %11 = arith.muli %c0_i32, %c8_i32 : i32
    %12 = tpu.assume_multiple %11, 8 : i32
    %13 = arith.index_cast %12 : i32 to index
    %c0_10 = arith.constant 0 : index
    %14 = vector.load %arg10[%13, %c0_10] : memref<64x512xf32, #tpu.memory_space<vmem>>, vector<8x512xf32>
    %c0_11 = arith.constant 0 : index
    %c0_12 = arith.constant 0 : index
    %15 = vector.load %arg2[%c0_11, %c0_12] : memref<128x512xf32, #tpu.memory_space<vmem>>, vector<128x512xf32>
    %cst_13 = arith.constant dense<0.000000e+00> : vector<8x512xf32>
    %16 = tpu.matmul %10, %15, %cst_13 {dimension_numbers = #tpu.dot_dimension_numbers<[1], [0], [0], [1], [0, 0, 1, 1], [], []>} : vector<8x128xf32>, vector<128x512xf32>, vector<8x512xf32> -> vector<8x512xf32>
    %17 = arith.addf %14, %16 : vector<8x512xf32>
    %18 = vector.extract_strided_slice %17 {offsets = [0, 0], sizes = [8, 384], strides = [1, 1]} : vector<8x512xf32> to vector<8x384xf32>
    %cst_14 = arith.constant 5.000000e-01 : f32
    %19 = vector.broadcast %cst_14 : f32 to vector<8x384xf32>
    %20 = arith.mulf %19, %18 : vector<8x384xf32>
    %21 = math.tanh %20 : vector<8x384xf32>
    %cst_15 = arith.constant 5.000000e-01 : f32
    %22 = vector.broadcast %cst_15 : f32 to vector<8x384xf32>
    %23 = arith.mulf %22, %21 : vector<8x384xf32>
    %cst_16 = arith.constant 5.000000e-01 : f32
    %24 = vector.broadcast %cst_16 : f32 to vector<8x384xf32>
    %25 = arith.addf %23, %24 : vector<8x384xf32>
    %26 = vector.extract_strided_slice %25 {offsets = [0, 0], sizes = [8, 128], strides = [1, 1]} : vector<8x384xf32> to vector<8x128xf32>
    %27 = vector.extract_strided_slice %25 {offsets = [0, 128], sizes = [8, 128], strides = [1, 1]} : vector<8x384xf32> to vector<8x128xf32>
    %28 = vector.extract_strided_slice %25 {offsets = [0, 256], sizes = [8, 128], strides = [1, 1]} : vector<8x384xf32> to vector<8x128xf32>
    %29 = vector.extract_strided_slice %17 {offsets = [0, 384], sizes = [8, 128], strides = [1, 1]} : vector<8x512xf32> to vector<8x128xf32>
    %30 = math.tanh %29 : vector<8x128xf32>
    %31 = arith.mulf %27, %10 : vector<8x128xf32>
    %32 = arith.mulf %26, %30 : vector<8x128xf32>
    %33 = arith.addf %31, %32 : vector<8x128xf32>
    %34 = math.tanh %33 : vector<8x128xf32>
    %35 = arith.mulf %28, %34 : vector<8x128xf32>
    %c0_17 = arith.constant 0 : index
    %c0_18 = arith.constant 0 : index
    %36 = vector.load %arg4[%c0_17, %c0_18] : memref<128x512xf32, #tpu.memory_space<vmem>>, vector<128x512xf32>
    %cst_19 = arith.constant dense<0.000000e+00> : vector<8x512xf32>
    %37 = tpu.matmul %35, %36, %cst_19 {dimension_numbers = #tpu.dot_dimension_numbers<[1], [0], [0], [1], [0, 0, 1, 1], [], []>} : vector<8x128xf32>, vector<128x512xf32>, vector<8x512xf32> -> vector<8x512xf32>
    %c0_20 = arith.constant 0 : index
    %c0_21 = arith.constant 0 : index
    %38 = vector.load %arg5[%c0_20, %c0_21] : memref<128x512xf32, #tpu.memory_space<vmem>>, vector<128x512xf32>
    %cst_22 = arith.constant dense<0.000000e+00> : vector<8x512xf32>
    %39 = tpu.matmul %10, %38, %cst_22 {dimension_numbers = #tpu.dot_dimension_numbers<[1], [0], [0], [1], [0, 0, 1, 1], [], []>} : vector<8x128xf32>, vector<128x512xf32>, vector<8x512xf32> -> vector<8x512xf32>
    %40 = arith.addf %37, %39 : vector<8x512xf32>
    %41 = arith.addf %40, %9 : vector<8x512xf32>
    %42 = vector.extract_strided_slice %41 {offsets = [0, 0], sizes = [8, 384], strides = [1, 1]} : vector<8x512xf32> to vector<8x384xf32>
    %cst_23 = arith.constant 5.000000e-01 : f32
    %43 = vector.broadcast %cst_23 : f32 to vector<8x384xf32>
    %44 = arith.mulf %43, %42 : vector<8x384xf32>
    %45 = math.tanh %44 : vector<8x384xf32>
    %cst_24 = arith.constant 5.000000e-01 : f32
    %46 = vector.broadcast %cst_24 : f32 to vector<8x384xf32>
    %47 = arith.mulf %46, %45 : vector<8x384xf32>
    %cst_25 = arith.constant 5.000000e-01 : f32
    %48 = vector.broadcast %cst_25 : f32 to vector<8x384xf32>
    %49 = arith.addf %47, %48 : vector<8x384xf32>
    %50 = vector.extract_strided_slice %49 {offsets = [0, 0], sizes = [8, 128], strides = [1, 1]} : vector<8x384xf32> to vector<8x128xf32>
    %51 = vector.extract_strided_slice %49 {offsets = [0, 128], sizes = [8, 128], strides = [1, 1]} : vector<8x384xf32> to vector<8x128xf32>
    %52 = vector.extract_strided_slice %49 {offsets = [0, 256], sizes = [8, 128], strides = [1, 1]} : vector<8x384xf32> to vector<8x128xf32>
    %53 = vector.extract_strided_slice %41 {offsets = [0, 384], sizes = [8, 128], strides = [1, 1]} : vector<8x512xf32> to vector<8x128xf32>
    %54 = math.tanh %53 : vector<8x128xf32>
    %55 = arith.mulf %51, %10 : vector<8x128xf32>
    %56 = arith.mulf %50, %54 : vector<8x128xf32>
    %57 = arith.addf %55, %56 : vector<8x128xf32>
    %58 = math.tanh %57 : vector<8x128xf32>
    %59 = arith.mulf %52, %58 : vector<8x128xf32>
    %60 = arith.index_cast %12 : i32 to index
    %c0_26 = arith.constant 0 : index
    %61 = vector.load %arg11[%60, %c0_26] : memref<64x128xf32, #tpu.memory_space<vmem>>, vector<8x128xf32>
    tpu.vector_store %arg11[%60, %c0_26], %59 {strides = array<i32>} : memref<64x128xf32, #tpu.memory_space<vmem>>, vector<8x128xf32>,
    %c1_i32 = arith.constant 1 : i32
    %c8_i32_27 = arith.constant 8 : i32
    %62 = arith.muli %c1_i32, %c8_i32_27 : i32
    %63 = tpu.assume_multiple %62, 8 : i32
    %64 = arith.index_cast %63 : i32 to index
    %c0_28 = arith.constant 0 : index
    %65 = vector.load %arg10[%64, %c0_28] : memref<64x512xf32, #tpu.memory_space<vmem>>, vector<8x512xf32>
    %c0_29 = arith.constant 0 : index
    %c0_30 = arith.constant 0 : index
    %66 = vector.load %arg2[%c0_29, %c0_30] : memref<128x512xf32, #tpu.memory_space<vmem>>, vector<128x512xf32>
    %cst_31 = arith.constant dense<0.000000e+00> : vector<8x512xf32>
    %67 = tpu.matmul %35, %66, %cst_31 {dimension_numbers = #tpu.dot_dimension_numbers<[1], [0], [0], [1], [0, 0, 1, 1], [], []>} : vector<8x128xf32>, vector<128x512xf32>, vector<8x512xf32> -> vector<8x512xf32>
    %68 = arith.addf %65, %67 : vector<8x512xf32>
    %69 = vector.extract_strided_slice %68 {offsets = [0, 0], sizes = [8, 384], strides = [1, 1]} : vector<8x512xf32> to vector<8x384xf32>
    %cst_32 = arith.constant 5.000000e-01 : f32
    %70 = vector.broadcast %cst_32 : f32 to vector<8x384xf32>
    %71 = arith.mulf %70, %69 : vector<8x384xf32>
    %72 = math.tanh %71 : vector<8x384xf32>
    %cst_33 = arith.constant 5.000000e-01 : f32
    %73 = vector.broadcast %cst_33 : f32 to vector<8x384xf32>
    %74 = arith.mulf %73, %72 : vector<8x384xf32>
    %cst_34 = arith.constant 5.000000e-01 : f32
    %75 = vector.broadcast %cst_34 : f32 to vector<8x384xf32>
    %76 = arith.addf %74, %75 : vector<8x384xf32>
    %77 = vector.extract_strided_slice %76 {offsets = [0, 0], sizes = [8, 128], strides = [1, 1]} : vector<8x384xf32> to vector<8x128xf32>
    %78 = vector.extract_strided_slice %76 {offsets = [0, 128], sizes = [8, 128], strides = [1, 1]} : vector<8x384xf32> to vector<8x128xf32>
    %79 = vector.extract_strided_slice %76 {offsets = [0, 256], sizes = [8, 128], strides = [1, 1]} : vector<8x384xf32> to vector<8x128xf32>
    %80 = vector.extract_strided_slice %68 {offsets = [0, 384], sizes = [8, 128], strides = [1, 1]} : vector<8x512xf32> to vector<8x128xf32>
    %81 = math.tanh %80 : vector<8x128xf32>
    %82 = arith.mulf %78, %33 : vector<8x128xf32>
    %83 = arith.mulf %77, %81 : vector<8x128xf32>
    %84 = arith.addf %82, %83 : vector<8x128xf32>
    %85 = math.tanh %84 : vector<8x128xf32>
    %86 = arith.mulf %79, %85 : vector<8x128xf32>
    %c0_35 = arith.constant 0 : index
    %c0_36 = arith.constant 0 : index
    %87 = vector.load %arg4[%c0_35, %c0_36] : memref<128x512xf32, #tpu.memory_space<vmem>>, vector<128x512xf32>
    %cst_37 = arith.constant dense<0.000000e+00> : vector<8x512xf32>
    %88 = tpu.matmul %86, %87, %cst_37 {dimension_numbers = #tpu.dot_dimension_numbers<[1], [0], [0], [1], [0, 0, 1, 1], [], []>} : vector<8x128xf32>, vector<128x512xf32>, vector<8x512xf32> -> vector<8x512xf32>
    %c0_38 = arith.constant 0 : index
    %c0_39 = arith.constant 0 : index
    %89 = vector.load %arg5[%c0_38, %c0_39] : memref<128x512xf32, #tpu.memory_space<vmem>>, vector<128x512xf32>
    %cst_40 = arith.constant dense<0.000000e+00> : vector<8x512xf32>
    %90 = tpu.matmul %59, %89, %cst_40 {dimension_numbers = #tpu.dot_dimension_numbers<[1], [0], [0], [1], [0, 0, 1, 1], [], []>} : vector<8x128xf32>, vector<128x512xf32>, vector<8x512xf32> -> vector<8x512xf32>
    %91 = arith.addf %88, %90 : vector<8x512xf32>
    %92 = arith.addf %91, %9 : vector<8x512xf32>
    %93 = vector.extract_strided_slice %92 {offsets = [0, 0], sizes = [8, 384], strides = [1, 1]} : vector<8x512xf32> to vector<8x384xf32>
    %cst_41 = arith.constant 5.000000e-01 : f32
    %94 = vector.broadcast %cst_41 : f32 to vector<8x384xf32>
    %95 = arith.mulf %94, %93 : vector<8x384xf32>
    %96 = math.tanh %95 : vector<8x384xf32>
    %cst_42 = arith.constant 5.000000e-01 : f32
    %97 = vector.broadcast %cst_42 : f32 to vector<8x384xf32>
    %98 = arith.mulf %97, %96 : vector<8x384xf32>
    %cst_43 = arith.constant 5.000000e-01 : f32
    %99 = vector.broadcast %cst_43 : f32 to vector<8x384xf32>
    %100 = arith.addf %98, %99 : vector<8x384xf32>
    %101 = vector.extract_strided_slice %100 {offsets = [0, 0], sizes = [8, 128], strides = [1, 1]} : vector<8x384xf32> to vector<8x128xf32>
    %102 = vector.extract_strided_slice %100 {offsets = [0, 128], sizes = [8, 128], strides = [1, 1]} : vector<8x384xf32> to vector<8x128xf32>
    %103 = vector.extract_strided_slice %100 {offsets = [0, 256], sizes = [8, 128], strides = [1, 1]} : vector<8x384xf32> to vector<8x128xf32>
    %104 = vector.extract_strided_slice %92 {offsets = [0, 384], sizes = [8, 128], strides = [1, 1]} : vector<8x512xf32> to vector<8x128xf32>
    %105 = math.tanh %104 : vector<8x128xf32>
    %106 = arith.mulf %102, %57 : vector<8x128xf32>
    %107 = arith.mulf %101, %105 : vector<8x128xf32>
    %108 = arith.addf %106, %107 : vector<8x128xf32>
    %109 = math.tanh %108 : vector<8x128xf32>
    %110 = arith.mulf %103, %109 : vector<8x128xf32>
    %111 = arith.index_cast %63 : i32 to index
    %c0_44 = arith.constant 0 : index
    %112 = vector.load %arg11[%111, %c0_44] : memref<64x128xf32, #tpu.memory_space<vmem>>, vector<8x128xf32>
    tpu.vector_store %arg11[%111, %c0_44], %110 {strides = array<i32>} : memref<64x128xf32, #tpu.memory_space<vmem>>, vector<8x128xf32>,
    %c2_i32 = arith.constant 2 : i32
    %c8_i32_45 = arith.constant 8 : i32
    %113 = arith.muli %c2_i32, %c8_i32_45 : i32
    %114 = tpu.assume_multiple %113, 8 : i32
    %115 = arith.index_cast %114 : i32 to index
    %c0_46 = arith.constant 0 : index
    %116 = vector.load %arg10[%115, %c0_46] : memref<64x512xf32, #tpu.memory_space<vmem>>, vector<8x512xf32>
    %c0_47 = arith.constant 0 : index
    %c0_48 = arith.constant 0 : index
    %117 = vector.load %arg2[%c0_47, %c0_48] : memref<128x512xf32, #tpu.memory_space<vmem>>, vector<128x512xf32>
    %cst_49 = arith.constant dense<0.000000e+00> : vector<8x512xf32>
    %118 = tpu.matmul %86, %117, %cst_49 {dimension_numbers = #tpu.dot_dimension_numbers<[1], [0], [0], [1], [0, 0, 1, 1], [], []>} : vector<8x128xf32>, vector<128x512xf32>, vector<8x512xf32> -> vector<8x512xf32>
    %119 = arith.addf %116, %118 : vector<8x512xf32>
    %120 = vector.extract_strided_slice %119 {offsets = [0, 0], sizes = [8, 384], strides = [1, 1]} : vector<8x512xf32> to vector<8x384xf32>
    %cst_50 = arith.constant 5.000000e-01 : f32
    %121 = vector.broadcast %cst_50 : f32 to vector<8x384xf32>
    %122 = arith.mulf %121, %120 : vector<8x384xf32>
    %123 = math.tanh %122 : vector<8x384xf32>
    %cst_51 = arith.constant 5.000000e-01 : f32
    %124 = vector.broadcast %cst_51 : f32 to vector<8x384xf32>
    %125 = arith.mulf %124, %123 : vector<8x384xf32>
    %cst_52 = arith.constant 5.000000e-01 : f32
    %126 = vector.broadcast %cst_52 : f32 to vector<8x384xf32>
    %127 = arith.addf %125, %126 : vector<8x384xf32>
    %128 = vector.extract_strided_slice %127 {offsets = [0, 0], sizes = [8, 128], strides = [1, 1]} : vector<8x384xf32> to vector<8x128xf32>
    %129 = vector.extract_strided_slice %127 {offsets = [0, 128], sizes = [8, 128], strides = [1, 1]} : vector<8x384xf32> to vector<8x128xf32>
    %130 = vector.extract_strided_slice %127 {offsets = [0, 256], sizes = [8, 128], strides = [1, 1]} : vector<8x384xf32> to vector<8x128xf32>
    %131 = vector.extract_strided_slice %119 {offsets = [0, 384], sizes = [8, 128], strides = [1, 1]} : vector<8x512xf32> to vector<8x128xf32>
    %132 = math.tanh %131 : vector<8x128xf32>
    %133 = arith.mulf %129, %84 : vector<8x128xf32>
    %134 = arith.mulf %128, %132 : vector<8x128xf32>
    %135 = arith.addf %133, %134 : vector<8x128xf32>
    %136 = math.tanh %135 : vector<8x128xf32>
    %137 = arith.mulf %130, %136 : vector<8x128xf32>
    %c0_53 = arith.constant 0 : index
    %c0_54 = arith.constant 0 : index
    %138 = vector.load %arg4[%c0_53, %c0_54] : memref<128x512xf32, #tpu.memory_space<vmem>>, vector<128x512xf32>
    %cst_55 = arith.constant dense<0.000000e+00> : vector<8x512xf32>
    %139 = tpu.matmul %137, %138, %cst_55 {dimension_numbers = #tpu.dot_dimension_numbers<[1], [0], [0], [1], [0, 0, 1, 1], [], []>} : vector<8x128xf32>, vector<128x512xf32>, vector<8x512xf32> -> vector<8x512xf32>
    %c0_56 = arith.constant 0 : index
    %c0_57 = arith.constant 0 : index
    %140 = vector.load %arg5[%c0_56, %c0_57] : memref<128x512xf32, #tpu.memory_space<vmem>>, vector<128x512xf32>
    %cst_58 = arith.constant dense<0.000000e+00> : vector<8x512xf32>
    %141 = tpu.matmul %110, %140, %cst_58 {dimension_numbers = #tpu.dot_dimension_numbers<[1], [0], [0], [1], [0, 0, 1, 1], [], []>} : vector<8x128xf32>, vector<128x512xf32>, vector<8x512xf32> -> vector<8x512xf32>
    %142 = arith.addf %139, %141 : vector<8x512xf32>
    %143 = arith.addf %142, %9 : vector<8x512xf32>
    %144 = vector.extract_strided_slice %143 {offsets = [0, 0], sizes = [8, 384], strides = [1, 1]} : vector<8x512xf32> to vector<8x384xf32>
    %cst_59 = arith.constant 5.000000e-01 : f32
    %145 = vector.broadcast %cst_59 : f32 to vector<8x384xf32>
    %146 = arith.mulf %145, %144 : vector<8x384xf32>
    %147 = math.tanh %146 : vector<8x384xf32>
    %cst_60 = arith.constant 5.000000e-01 : f32
    %148 = vector.broadcast %cst_60 : f32 to vector<8x384xf32>
    %149 = arith.mulf %148, %147 : vector<8x384xf32>
    %cst_61 = arith.constant 5.000000e-01 : f32
    %150 = vector.broadcast %cst_61 : f32 to vector<8x384xf32>
    %151 = arith.addf %149, %150 : vector<8x384xf32>
    %152 = vector.extract_strided_slice %151 {offsets = [0, 0], sizes = [8, 128], strides = [1, 1]} : vector<8x384xf32> to vector<8x128xf32>
    %153 = vector.extract_strided_slice %151 {offsets = [0, 128], sizes = [8, 128], strides = [1, 1]} : vector<8x384xf32> to vector<8x128xf32>
    %154 = vector.extract_strided_slice %151 {offsets = [0, 256], sizes = [8, 128], strides = [1, 1]} : vector<8x384xf32> to vector<8x128xf32>
    %155 = vector.extract_strided_slice %143 {offsets = [0, 384], sizes = [8, 128], strides = [1, 1]} : vector<8x512xf32> to vector<8x128xf32>
    %156 = math.tanh %155 : vector<8x128xf32>
    %157 = arith.mulf %153, %108 : vector<8x128xf32>
    %158 = arith.mulf %152, %156 : vector<8x128xf32>
    %159 = arith.addf %157, %158 : vector<8x128xf32>
    %160 = math.tanh %159 : vector<8x128xf32>
    %161 = arith.mulf %154, %160 : vector<8x128xf32>
    %162 = arith.index_cast %114 : i32 to index
    %c0_62 = arith.constant 0 : index
    %163 = vector.load %arg11[%162, %c0_62] : memref<64x128xf32, #tpu.memory_space<vmem>>, vector<8x128xf32>
    tpu.vector_store %arg11[%162, %c0_62], %161 {strides = array<i32>} : memref<64x128xf32, #tpu.memory_space<vmem>>, vector<8x128xf32>,
    %c3_i32 = arith.constant 3 : i32
    %c8_i32_63 = arith.constant 8 : i32
    %164 = arith.muli %c3_i32, %c8_i32_63 : i32
    %165 = tpu.assume_multiple %164, 8 : i32
    %166 = arith.index_cast %165 : i32 to index
    %c0_64 = arith.constant 0 : index
    %167 = vector.load %arg10[%166, %c0_64] : memref<64x512xf32, #tpu.memory_space<vmem>>, vector<8x512xf32>
    %c0_65 = arith.constant 0 : index
    %c0_66 = arith.constant 0 : index
    %168 = vector.load %arg2[%c0_65, %c0_66] : memref<128x512xf32, #tpu.memory_space<vmem>>, vector<128x512xf32>
    %cst_67 = arith.constant dense<0.000000e+00> : vector<8x512xf32>
    %169 = tpu.matmul %137, %168, %cst_67 {dimension_numbers = #tpu.dot_dimension_numbers<[1], [0], [0], [1], [0, 0, 1, 1], [], []>} : vector<8x128xf32>, vector<128x512xf32>, vector<8x512xf32> -> vector<8x512xf32>
    %170 = arith.addf %167, %169 : vector<8x512xf32>
    %171 = vector.extract_strided_slice %170 {offsets = [0, 0], sizes = [8, 384], strides = [1, 1]} : vector<8x512xf32> to vector<8x384xf32>
    %cst_68 = arith.constant 5.000000e-01 : f32
    %172 = vector.broadcast %cst_68 : f32 to vector<8x384xf32>
    %173 = arith.mulf %172, %171 : vector<8x384xf32>
    %174 = math.tanh %173 : vector<8x384xf32>
    %cst_69 = arith.constant 5.000000e-01 : f32
    %175 = vector.broadcast %cst_69 : f32 to vector<8x384xf32>
    %176 = arith.mulf %175, %174 : vector<8x384xf32>
    %cst_70 = arith.constant 5.000000e-01 : f32
    %177 = vector.broadcast %cst_70 : f32 to vector<8x384xf32>
    %178 = arith.addf %176, %177 : vector<8x384xf32>
    %179 = vector.extract_strided_slice %178 {offsets = [0, 0], sizes = [8, 128], strides = [1, 1]} : vector<8x384xf32> to vector<8x128xf32>
    %180 = vector.extract_strided_slice %178 {offsets = [0, 128], sizes = [8, 128], strides = [1, 1]} : vector<8x384xf32> to vector<8x128xf32>
    %181 = vector.extract_strided_slice %178 {offsets = [0, 256], sizes = [8, 128], strides = [1, 1]} : vector<8x384xf32> to vector<8x128xf32>
    %182 = vector.extract_strided_slice %170 {offsets = [0, 384], sizes = [8, 128], strides = [1, 1]} : vector<8x512xf32> to vector<8x128xf32>
    %183 = math.tanh %182 : vector<8x128xf32>
    %184 = arith.mulf %180, %135 : vector<8x128xf32>
    %185 = arith.mulf %179, %183 : vector<8x128xf32>
    %186 = arith.addf %184, %185 : vector<8x128xf32>
    %187 = math.tanh %186 : vector<8x128xf32>
    %188 = arith.mulf %181, %187 : vector<8x128xf32>
    %c0_71 = arith.constant 0 : index
    %c0_72 = arith.constant 0 : index
    %189 = vector.load %arg4[%c0_71, %c0_72] : memref<128x512xf32, #tpu.memory_space<vmem>>, vector<128x512xf32>
    %cst_73 = arith.constant dense<0.000000e+00> : vector<8x512xf32>
    %190 = tpu.matmul %188, %189, %cst_73 {dimension_numbers = #tpu.dot_dimension_numbers<[1], [0], [0], [1], [0, 0, 1, 1], [], []>} : vector<8x128xf32>, vector<128x512xf32>, vector<8x512xf32> -> vector<8x512xf32>
    %c0_74 = arith.constant 0 : index
    %c0_75 = arith.constant 0 : index
    %191 = vector.load %arg5[%c0_74, %c0_75] : memref<128x512xf32, #tpu.memory_space<vmem>>, vector<128x512xf32>
    %cst_76 = arith.constant dense<0.000000e+00> : vector<8x512xf32>
    %192 = tpu.matmul %161, %191, %cst_76 {dimension_numbers = #tpu.dot_dimension_numbers<[1], [0], [0], [1], [0, 0, 1, 1], [], []>} : vector<8x128xf32>, vector<128x512xf32>, vector<8x512xf32> -> vector<8x512xf32>
    %193 = arith.addf %190, %192 : vector<8x512xf32>
    %194 = arith.addf %193, %9 : vector<8x512xf32>
    %195 = vector.extract_strided_slice %194 {offsets = [0, 0], sizes = [8, 384], strides = [1, 1]} : vector<8x512xf32> to vector<8x384xf32>
    %cst_77 = arith.constant 5.000000e-01 : f32
    %196 = vector.broadcast %cst_77 : f32 to vector<8x384xf32>
    %197 = arith.mulf %196, %195 : vector<8x384xf32>
    %198 = math.tanh %197 : vector<8x384xf32>
    %cst_78 = arith.constant 5.000000e-01 : f32
    %199 = vector.broadcast %cst_78 : f32 to vector<8x384xf32>
    %200 = arith.mulf %199, %198 : vector<8x384xf32>
    %cst_79 = arith.constant 5.000000e-01 : f32
    %201 = vector.broadcast %cst_79 : f32 to vector<8x384xf32>
    %202 = arith.addf %200, %201 : vector<8x384xf32>
    %203 = vector.extract_strided_slice %202 {offsets = [0, 0], sizes = [8, 128], strides = [1, 1]} : vector<8x384xf32> to vector<8x128xf32>
    %204 = vector.extract_strided_slice %202 {offsets = [0, 128], sizes = [8, 128], strides = [1, 1]} : vector<8x384xf32> to vector<8x128xf32>
    %205 = vector.extract_strided_slice %202 {offsets = [0, 256], sizes = [8, 128], strides = [1, 1]} : vector<8x384xf32> to vector<8x128xf32>
    %206 = vector.extract_strided_slice %194 {offsets = [0, 384], sizes = [8, 128], strides = [1, 1]} : vector<8x512xf32> to vector<8x128xf32>
    %207 = math.tanh %206 : vector<8x128xf32>
    %208 = arith.mulf %204, %159 : vector<8x128xf32>
    %209 = arith.mulf %203, %207 : vector<8x128xf32>
    %210 = arith.addf %208, %209 : vector<8x128xf32>
    %211 = math.tanh %210 : vector<8x128xf32>
    %212 = arith.mulf %205, %211 : vector<8x128xf32>
    %213 = arith.index_cast %165 : i32 to index
    %c0_80 = arith.constant 0 : index
    %214 = vector.load %arg11[%213, %c0_80] : memref<64x128xf32, #tpu.memory_space<vmem>>, vector<8x128xf32>
    tpu.vector_store %arg11[%213, %c0_80], %212 {strides = array<i32>} : memref<64x128xf32, #tpu.memory_space<vmem>>, vector<8x128xf32>,
    %c4_i32 = arith.constant 4 : i32
    %c8_i32_81 = arith.constant 8 : i32
    %215 = arith.muli %c4_i32, %c8_i32_81 : i32
    %216 = tpu.assume_multiple %215, 8 : i32
    %217 = arith.index_cast %216 : i32 to index
    %c0_82 = arith.constant 0 : index
    %218 = vector.load %arg10[%217, %c0_82] : memref<64x512xf32, #tpu.memory_space<vmem>>, vector<8x512xf32>
    %c0_83 = arith.constant 0 : index
    %c0_84 = arith.constant 0 : index
    %219 = vector.load %arg2[%c0_83, %c0_84] : memref<128x512xf32, #tpu.memory_space<vmem>>, vector<128x512xf32>
    %cst_85 = arith.constant dense<0.000000e+00> : vector<8x512xf32>
    %220 = tpu.matmul %188, %219, %cst_85 {dimension_numbers = #tpu.dot_dimension_numbers<[1], [0], [0], [1], [0, 0, 1, 1], [], []>} : vector<8x128xf32>, vector<128x512xf32>, vector<8x512xf32> -> vector<8x512xf32>
    %221 = arith.addf %218, %220 : vector<8x512xf32>
    %222 = vector.extract_strided_slice %221 {offsets = [0, 0], sizes = [8, 384], strides = [1, 1]} : vector<8x512xf32> to vector<8x384xf32>
    %cst_86 = arith.constant 5.000000e-01 : f32
    %223 = vector.broadcast %cst_86 : f32 to vector<8x384xf32>
    %224 = arith.mulf %223, %222 : vector<8x384xf32>
    %225 = math.tanh %224 : vector<8x384xf32>
    %cst_87 = arith.constant 5.000000e-01 : f32
    %226 = vector.broadcast %cst_87 : f32 to vector<8x384xf32>
    %227 = arith.mulf %226, %225 : vector<8x384xf32>
    %cst_88 = arith.constant 5.000000e-01 : f32
    %228 = vector.broadcast %cst_88 : f32 to vector<8x384xf32>
    %229 = arith.addf %227, %228 : vector<8x384xf32>
    %230 = vector.extract_strided_slice %229 {offsets = [0, 0], sizes = [8, 128], strides = [1, 1]} : vector<8x384xf32> to vector<8x128xf32>
    %231 = vector.extract_strided_slice %229 {offsets = [0, 128], sizes = [8, 128], strides = [1, 1]} : vector<8x384xf32> to vector<8x128xf32>
    %232 = vector.extract_strided_slice %229 {offsets = [0, 256], sizes = [8, 128], strides = [1, 1]} : vector<8x384xf32> to vector<8x128xf32>
    %233 = vector.extract_strided_slice %221 {offsets = [0, 384], sizes = [8, 128], strides = [1, 1]} : vector<8x512xf32> to vector<8x128xf32>
    %234 = math.tanh %233 : vector<8x128xf32>
    %235 = arith.mulf %231, %186 : vector<8x128xf32>
    %236 = arith.mulf %230, %234 : vector<8x128xf32>
    %237 = arith.addf %235, %236 : vector<8x128xf32>
    %238 = math.tanh %237 : vector<8x128xf32>
    %239 = arith.mulf %232, %238 : vector<8x128xf32>
    %c0_89 = arith.constant 0 : index
    %c0_90 = arith.constant 0 : index
    %240 = vector.load %arg4[%c0_89, %c0_90] : memref<128x512xf32, #tpu.memory_space<vmem>>, vector<128x512xf32>
    %cst_91 = arith.constant dense<0.000000e+00> : vector<8x512xf32>
    %241 = tpu.matmul %239, %240, %cst_91 {dimension_numbers = #tpu.dot_dimension_numbers<[1], [0], [0], [1], [0, 0, 1, 1], [], []>} : vector<8x128xf32>, vector<128x512xf32>, vector<8x512xf32> -> vector<8x512xf32>
    %c0_92 = arith.constant 0 : index
    %c0_93 = arith.constant 0 : index
    %242 = vector.load %arg5[%c0_92, %c0_93] : memref<128x512xf32, #tpu.memory_space<vmem>>, vector<128x512xf32>
    %cst_94 = arith.constant dense<0.000000e+00> : vector<8x512xf32>
    %243 = tpu.matmul %212, %242, %cst_94 {dimension_numbers = #tpu.dot_dimension_numbers<[1], [0], [0], [1], [0, 0, 1, 1], [], []>} : vector<8x128xf32>, vector<128x512xf32>, vector<8x512xf32> -> vector<8x512xf32>
    %244 = arith.addf %241, %243 : vector<8x512xf32>
    %245 = arith.addf %244, %9 : vector<8x512xf32>
    %246 = vector.extract_strided_slice %245 {offsets = [0, 0], sizes = [8, 384], strides = [1, 1]} : vector<8x512xf32> to vector<8x384xf32>
    %cst_95 = arith.constant 5.000000e-01 : f32
    %247 = vector.broadcast %cst_95 : f32 to vector<8x384xf32>
    %248 = arith.mulf %247, %246 : vector<8x384xf32>
    %249 = math.tanh %248 : vector<8x384xf32>
    %cst_96 = arith.constant 5.000000e-01 : f32
    %250 = vector.broadcast %cst_96 : f32 to vector<8x384xf32>
    %251 = arith.mulf %250, %249 : vector<8x384xf32>
    %cst_97 = arith.constant 5.000000e-01 : f32
    %252 = vector.broadcast %cst_97 : f32 to vector<8x384xf32>
    %253 = arith.addf %251, %252 : vector<8x384xf32>
    %254 = vector.extract_strided_slice %253 {offsets = [0, 0], sizes = [8, 128], strides = [1, 1]} : vector<8x384xf32> to vector<8x128xf32>
    %255 = vector.extract_strided_slice %253 {offsets = [0, 128], sizes = [8, 128], strides = [1, 1]} : vector<8x384xf32> to vector<8x128xf32>
    %256 = vector.extract_strided_slice %253 {offsets = [0, 256], sizes = [8, 128], strides = [1, 1]} : vector<8x384xf32> to vector<8x128xf32>
    %257 = vector.extract_strided_slice %245 {offsets = [0, 384], sizes = [8, 128], strides = [1, 1]} : vector<8x512xf32> to vector<8x128xf32>
    %258 = math.tanh %257 : vector<8x128xf32>
    %259 = arith.mulf %255, %210 : vector<8x128xf32>
    %260 = arith.mulf %254, %258 : vector<8x128xf32>
    %261 = arith.addf %259, %260 : vector<8x128xf32>
    %262 = math.tanh %261 : vector<8x128xf32>
    %263 = arith.mulf %256, %262 : vector<8x128xf32>
    %264 = arith.index_cast %216 : i32 to index
    %c0_98 = arith.constant 0 : index
    %265 = vector.load %arg11[%264, %c0_98] : memref<64x128xf32, #tpu.memory_space<vmem>>, vector<8x128xf32>
    tpu.vector_store %arg11[%264, %c0_98], %263 {strides = array<i32>} : memref<64x128xf32, #tpu.memory_space<vmem>>, vector<8x128xf32>,
    %c5_i32 = arith.constant 5 : i32
    %c8_i32_99 = arith.constant 8 : i32
    %266 = arith.muli %c5_i32, %c8_i32_99 : i32
    %267 = tpu.assume_multiple %266, 8 : i32
    %268 = arith.index_cast %267 : i32 to index
    %c0_100 = arith.constant 0 : index
    %269 = vector.load %arg10[%268, %c0_100] : memref<64x512xf32, #tpu.memory_space<vmem>>, vector<8x512xf32>
    %c0_101 = arith.constant 0 : index
    %c0_102 = arith.constant 0 : index
    %270 = vector.load %arg2[%c0_101, %c0_102] : memref<128x512xf32, #tpu.memory_space<vmem>>, vector<128x512xf32>
    %cst_103 = arith.constant dense<0.000000e+00> : vector<8x512xf32>
    %271 = tpu.matmul %239, %270, %cst_103 {dimension_numbers = #tpu.dot_dimension_numbers<[1], [0], [0], [1], [0, 0, 1, 1], [], []>} : vector<8x128xf32>, vector<128x512xf32>, vector<8x512xf32> -> vector<8x512xf32>
    %272 = arith.addf %269, %271 : vector<8x512xf32>
    %273 = vector.extract_strided_slice %272 {offsets = [0, 0], sizes = [8, 384], strides = [1, 1]} : vector<8x512xf32> to vector<8x384xf32>
    %cst_104 = arith.constant 5.000000e-01 : f32
    %274 = vector.broadcast %cst_104 : f32 to vector<8x384xf32>
    %275 = arith.mulf %274, %273 : vector<8x384xf32>
    %276 = math.tanh %275 : vector<8x384xf32>
    %cst_105 = arith.constant 5.000000e-01 : f32
    %277 = vector.broadcast %cst_105 : f32 to vector<8x384xf32>
    %278 = arith.mulf %277, %276 : vector<8x384xf32>
    %cst_106 = arith.constant 5.000000e-01 : f32
    %279 = vector.broadcast %cst_106 : f32 to vector<8x384xf32>
    %280 = arith.addf %278, %279 : vector<8x384xf32>
    %281 = vector.extract_strided_slice %280 {offsets = [0, 0], sizes = [8, 128], strides = [1, 1]} : vector<8x384xf32> to vector<8x128xf32>
    %282 = vector.extract_strided_slice %280 {offsets = [0, 128], sizes = [8, 128], strides = [1, 1]} : vector<8x384xf32> to vector<8x128xf32>
    %283 = vector.extract_strided_slice %280 {offsets = [0, 256], sizes = [8, 128], strides = [1, 1]} : vector<8x384xf32> to vector<8x128xf32>
    %284 = vector.extract_strided_slice %272 {offsets = [0, 384], sizes = [8, 128], strides = [1, 1]} : vector<8x512xf32> to vector<8x128xf32>
    %285 = math.tanh %284 : vector<8x128xf32>
    %286 = arith.mulf %282, %237 : vector<8x128xf32>
    %287 = arith.mulf %281, %285 : vector<8x128xf32>
    %288 = arith.addf %286, %287 : vector<8x128xf32>
    %289 = math.tanh %288 : vector<8x128xf32>
    %290 = arith.mulf %283, %289 : vector<8x128xf32>
    %c0_107 = arith.constant 0 : index
    %c0_108 = arith.constant 0 : index
    %291 = vector.load %arg4[%c0_107, %c0_108] : memref<128x512xf32, #tpu.memory_space<vmem>>, vector<128x512xf32>
    %cst_109 = arith.constant dense<0.000000e+00> : vector<8x512xf32>
    %292 = tpu.matmul %290, %291, %cst_109 {dimension_numbers = #tpu.dot_dimension_numbers<[1], [0], [0], [1], [0, 0, 1, 1], [], []>} : vector<8x128xf32>, vector<128x512xf32>, vector<8x512xf32> -> vector<8x512xf32>
    %c0_110 = arith.constant 0 : index
    %c0_111 = arith.constant 0 : index
    %293 = vector.load %arg5[%c0_110, %c0_111] : memref<128x512xf32, #tpu.memory_space<vmem>>, vector<128x512xf32>
    %cst_112 = arith.constant dense<0.000000e+00> : vector<8x512xf32>
    %294 = tpu.matmul %263, %293, %cst_112 {dimension_numbers = #tpu.dot_dimension_numbers<[1], [0], [0], [1], [0, 0, 1, 1], [], []>} : vector<8x128xf32>, vector<128x512xf32>, vector<8x512xf32> -> vector<8x512xf32>
    %295 = arith.addf %292, %294 : vector<8x512xf32>
    %296 = arith.addf %295, %9 : vector<8x512xf32>
    %297 = vector.extract_strided_slice %296 {offsets = [0, 0], sizes = [8, 384], strides = [1, 1]} : vector<8x512xf32> to vector<8x384xf32>
    %cst_113 = arith.constant 5.000000e-01 : f32
    %298 = vector.broadcast %cst_113 : f32 to vector<8x384xf32>
    %299 = arith.mulf %298, %297 : vector<8x384xf32>
    %300 = math.tanh %299 : vector<8x384xf32>
    %cst_114 = arith.constant 5.000000e-01 : f32
    %301 = vector.broadcast %cst_114 : f32 to vector<8x384xf32>
    %302 = arith.mulf %301, %300 : vector<8x384xf32>
    %cst_115 = arith.constant 5.000000e-01 : f32
    %303 = vector.broadcast %cst_115 : f32 to vector<8x384xf32>
    %304 = arith.addf %302, %303 : vector<8x384xf32>
    %305 = vector.extract_strided_slice %304 {offsets = [0, 0], sizes = [8, 128], strides = [1, 1]} : vector<8x384xf32> to vector<8x128xf32>
    %306 = vector.extract_strided_slice %304 {offsets = [0, 128], sizes = [8, 128], strides = [1, 1]} : vector<8x384xf32> to vector<8x128xf32>
    %307 = vector.extract_strided_slice %304 {offsets = [0, 256], sizes = [8, 128], strides = [1, 1]} : vector<8x384xf32> to vector<8x128xf32>
    %308 = vector.extract_strided_slice %296 {offsets = [0, 384], sizes = [8, 128], strides = [1, 1]} : vector<8x512xf32> to vector<8x128xf32>
    %309 = math.tanh %308 : vector<8x128xf32>
    %310 = arith.mulf %306, %261 : vector<8x128xf32>
    %311 = arith.mulf %305, %309 : vector<8x128xf32>
    %312 = arith.addf %310, %311 : vector<8x128xf32>
    %313 = math.tanh %312 : vector<8x128xf32>
    %314 = arith.mulf %307, %313 : vector<8x128xf32>
    %315 = arith.index_cast %267 : i32 to index
    %c0_116 = arith.constant 0 : index
    %316 = vector.load %arg11[%315, %c0_116] : memref<64x128xf32, #tpu.memory_space<vmem>>, vector<8x128xf32>
    tpu.vector_store %arg11[%315, %c0_116], %314 {strides = array<i32>} : memref<64x128xf32, #tpu.memory_space<vmem>>, vector<8x128xf32>,
    %c6_i32 = arith.constant 6 : i32
    %c8_i32_117 = arith.constant 8 : i32
    %317 = arith.muli %c6_i32, %c8_i32_117 : i32
    %318 = tpu.assume_multiple %317, 8 : i32
    %319 = arith.index_cast %318 : i32 to index
    %c0_118 = arith.constant 0 : index
    %320 = vector.load %arg10[%319, %c0_118] : memref<64x512xf32, #tpu.memory_space<vmem>>, vector<8x512xf32>
    %c0_119 = arith.constant 0 : index
    %c0_120 = arith.constant 0 : index
    %321 = vector.load %arg2[%c0_119, %c0_120] : memref<128x512xf32, #tpu.memory_space<vmem>>, vector<128x512xf32>
    %cst_121 = arith.constant dense<0.000000e+00> : vector<8x512xf32>
    %322 = tpu.matmul %290, %321, %cst_121 {dimension_numbers = #tpu.dot_dimension_numbers<[1], [0], [0], [1], [0, 0, 1, 1], [], []>} : vector<8x128xf32>, vector<128x512xf32>, vector<8x512xf32> -> vector<8x512xf32>
    %323 = arith.addf %320, %322 : vector<8x512xf32>
    %324 = vector.extract_strided_slice %323 {offsets = [0, 0], sizes = [8, 384], strides = [1, 1]} : vector<8x512xf32> to vector<8x384xf32>
    %cst_122 = arith.constant 5.000000e-01 : f32
    %325 = vector.broadcast %cst_122 : f32 to vector<8x384xf32>
    %326 = arith.mulf %325, %324 : vector<8x384xf32>
    %327 = math.tanh %326 : vector<8x384xf32>
    %cst_123 = arith.constant 5.000000e-01 : f32
    %328 = vector.broadcast %cst_123 : f32 to vector<8x384xf32>
    %329 = arith.mulf %328, %327 : vector<8x384xf32>
    %cst_124 = arith.constant 5.000000e-01 : f32
    %330 = vector.broadcast %cst_124 : f32 to vector<8x384xf32>
    %331 = arith.addf %329, %330 : vector<8x384xf32>
    %332 = vector.extract_strided_slice %331 {offsets = [0, 0], sizes = [8, 128], strides = [1, 1]} : vector<8x384xf32> to vector<8x128xf32>
    %333 = vector.extract_strided_slice %331 {offsets = [0, 128], sizes = [8, 128], strides = [1, 1]} : vector<8x384xf32> to vector<8x128xf32>
    %334 = vector.extract_strided_slice %331 {offsets = [0, 256], sizes = [8, 128], strides = [1, 1]} : vector<8x384xf32> to vector<8x128xf32>
    %335 = vector.extract_strided_slice %323 {offsets = [0, 384], sizes = [8, 128], strides = [1, 1]} : vector<8x512xf32> to vector<8x128xf32>
    %336 = math.tanh %335 : vector<8x128xf32>
    %337 = arith.mulf %333, %288 : vector<8x128xf32>
    %338 = arith.mulf %332, %336 : vector<8x128xf32>
    %339 = arith.addf %337, %338 : vector<8x128xf32>
    %340 = math.tanh %339 : vector<8x128xf32>
    %341 = arith.mulf %334, %340 : vector<8x128xf32>
    %c0_125 = arith.constant 0 : index
    %c0_126 = arith.constant 0 : index
    %342 = vector.load %arg4[%c0_125, %c0_126] : memref<128x512xf32, #tpu.memory_space<vmem>>, vector<128x512xf32>
    %cst_127 = arith.constant dense<0.000000e+00> : vector<8x512xf32>
    %343 = tpu.matmul %341, %342, %cst_127 {dimension_numbers = #tpu.dot_dimension_numbers<[1], [0], [0], [1], [0, 0, 1, 1], [], []>} : vector<8x128xf32>, vector<128x512xf32>, vector<8x512xf32> -> vector<8x512xf32>
    %c0_128 = arith.constant 0 : index
    %c0_129 = arith.constant 0 : index
    %344 = vector.load %arg5[%c0_128, %c0_129] : memref<128x512xf32, #tpu.memory_space<vmem>>, vector<128x512xf32>
    %cst_130 = arith.constant dense<0.000000e+00> : vector<8x512xf32>
    %345 = tpu.matmul %314, %344, %cst_130 {dimension_numbers = #tpu.dot_dimension_numbers<[1], [0], [0], [1], [0, 0, 1, 1], [], []>} : vector<8x128xf32>, vector<128x512xf32>, vector<8x512xf32> -> vector<8x512xf32>
    %346 = arith.addf %343, %345 : vector<8x512xf32>
    %347 = arith.addf %346, %9 : vector<8x512xf32>
    %348 = vector.extract_strided_slice %347 {offsets = [0, 0], sizes = [8, 384], strides = [1, 1]} : vector<8x512xf32> to vector<8x384xf32>
    %cst_131 = arith.constant 5.000000e-01 : f32
    %349 = vector.broadcast %cst_131 : f32 to vector<8x384xf32>
    %350 = arith.mulf %349, %348 : vector<8x384xf32>
    %351 = math.tanh %350 : vector<8x384xf32>
    %cst_132 = arith.constant 5.000000e-01 : f32
    %352 = vector.broadcast %cst_132 : f32 to vector<8x384xf32>
    %353 = arith.mulf %352, %351 : vector<8x384xf32>
    %cst_133 = arith.constant 5.000000e-01 : f32
    %354 = vector.broadcast %cst_133 : f32 to vector<8x384xf32>
    %355 = arith.addf %353, %354 : vector<8x384xf32>
    %356 = vector.extract_strided_slice %355 {offsets = [0, 0], sizes = [8, 128], strides = [1, 1]} : vector<8x384xf32> to vector<8x128xf32>
    %357 = vector.extract_strided_slice %355 {offsets = [0, 128], sizes = [8, 128], strides = [1, 1]} : vector<8x384xf32> to vector<8x128xf32>
    %358 = vector.extract_strided_slice %355 {offsets = [0, 256], sizes = [8, 128], strides = [1, 1]} : vector<8x384xf32> to vector<8x128xf32>
    %359 = vector.extract_strided_slice %347 {offsets = [0, 384], sizes = [8, 128], strides = [1, 1]} : vector<8x512xf32> to vector<8x128xf32>
    %360 = math.tanh %359 : vector<8x128xf32>
    %361 = arith.mulf %357, %312 : vector<8x128xf32>
    %362 = arith.mulf %356, %360 : vector<8x128xf32>
    %363 = arith.addf %361, %362 : vector<8x128xf32>
    %364 = math.tanh %363 : vector<8x128xf32>
    %365 = arith.mulf %358, %364 : vector<8x128xf32>
    %366 = arith.index_cast %318 : i32 to index
    %c0_134 = arith.constant 0 : index
    %367 = vector.load %arg11[%366, %c0_134] : memref<64x128xf32, #tpu.memory_space<vmem>>, vector<8x128xf32>
    tpu.vector_store %arg11[%366, %c0_134], %365 {strides = array<i32>} : memref<64x128xf32, #tpu.memory_space<vmem>>, vector<8x128xf32>,
    %c7_i32 = arith.constant 7 : i32
    %c8_i32_135 = arith.constant 8 : i32
    %368 = arith.muli %c7_i32, %c8_i32_135 : i32
    %369 = tpu.assume_multiple %368, 8 : i32
    %370 = arith.index_cast %369 : i32 to index
    %c0_136 = arith.constant 0 : index
    %371 = vector.load %arg10[%370, %c0_136] : memref<64x512xf32, #tpu.memory_space<vmem>>, vector<8x512xf32>
    %c0_137 = arith.constant 0 : index
    %c0_138 = arith.constant 0 : index
    %372 = vector.load %arg2[%c0_137, %c0_138] : memref<128x512xf32, #tpu.memory_space<vmem>>, vector<128x512xf32>
    %cst_139 = arith.constant dense<0.000000e+00> : vector<8x512xf32>
    %373 = tpu.matmul %341, %372, %cst_139 {dimension_numbers = #tpu.dot_dimension_numbers<[1], [0], [0], [1], [0, 0, 1, 1], [], []>} : vector<8x128xf32>, vector<128x512xf32>, vector<8x512xf32> -> vector<8x512xf32>
    %374 = arith.addf %371, %373 : vector<8x512xf32>
    %375 = vector.extract_strided_slice %374 {offsets = [0, 0], sizes = [8, 384], strides = [1, 1]} : vector<8x512xf32> to vector<8x384xf32>
    %cst_140 = arith.constant 5.000000e-01 : f32
    %376 = vector.broadcast %cst_140 : f32 to vector<8x384xf32>
    %377 = arith.mulf %376, %375 : vector<8x384xf32>
    %378 = math.tanh %377 : vector<8x384xf32>
    %cst_141 = arith.constant 5.000000e-01 : f32
    %379 = vector.broadcast %cst_141 : f32 to vector<8x384xf32>
    %380 = arith.mulf %379, %378 : vector<8x384xf32>
    %cst_142 = arith.constant 5.000000e-01 : f32
    %381 = vector.broadcast %cst_142 : f32 to vector<8x384xf32>
    %382 = arith.addf %380, %381 : vector<8x384xf32>
    %383 = vector.extract_strided_slice %382 {offsets = [0, 0], sizes = [8, 128], strides = [1, 1]} : vector<8x384xf32> to vector<8x128xf32>
    %384 = vector.extract_strided_slice %382 {offsets = [0, 128], sizes = [8, 128], strides = [1, 1]} : vector<8x384xf32> to vector<8x128xf32>
    %385 = vector.extract_strided_slice %382 {offsets = [0, 256], sizes = [8, 128], strides = [1, 1]} : vector<8x384xf32> to vector<8x128xf32>
    %386 = vector.extract_strided_slice %374 {offsets = [0, 384], sizes = [8, 128], strides = [1, 1]} : vector<8x512xf32> to vector<8x128xf32>
    %387 = math.tanh %386 : vector<8x128xf32>
    %388 = arith.mulf %384, %339 : vector<8x128xf32>
    %389 = arith.mulf %383, %387 : vector<8x128xf32>
    %390 = arith.addf %388, %389 : vector<8x128xf32>
    %391 = math.tanh %390 : vector<8x128xf32>
    %392 = arith.mulf %385, %391 : vector<8x128xf32>
    %c0_143 = arith.constant 0 : index
    %c0_144 = arith.constant 0 : index
    %393 = vector.load %arg4[%c0_143, %c0_144] : memref<128x512xf32, #tpu.memory_space<vmem>>, vector<128x512xf32>
    %cst_145 = arith.constant dense<0.000000e+00> : vector<8x512xf32>
    %394 = tpu.matmul %392, %393, %cst_145 {dimension_numbers = #tpu.dot_dimension_numbers<[1], [0], [0], [1], [0, 0, 1, 1], [], []>} : vector<8x128xf32>, vector<128x512xf32>, vector<8x512xf32> -> vector<8x512xf32>
    %c0_146 = arith.constant 0 : index
    %c0_147 = arith.constant 0 : index
    %395 = vector.load %arg5[%c0_146, %c0_147] : memref<128x512xf32, #tpu.memory_space<vmem>>, vector<128x512xf32>
    %cst_148 = arith.constant dense<0.000000e+00> : vector<8x512xf32>
    %396 = tpu.matmul %365, %395, %cst_148 {dimension_numbers = #tpu.dot_dimension_numbers<[1], [0], [0], [1], [0, 0, 1, 1], [], []>} : vector<8x128xf32>, vector<128x512xf32>, vector<8x512xf32> -> vector<8x512xf32>
    %397 = arith.addf %394, %396 : vector<8x512xf32>
    %398 = arith.addf %397, %9 : vector<8x512xf32>
    %399 = vector.extract_strided_slice %398 {offsets = [0, 0], sizes = [8, 384], strides = [1, 1]} : vector<8x512xf32> to vector<8x384xf32>
    %cst_149 = arith.constant 5.000000e-01 : f32
    %400 = vector.broadcast %cst_149 : f32 to vector<8x384xf32>
    %401 = arith.mulf %400, %399 : vector<8x384xf32>
    %402 = math.tanh %401 : vector<8x384xf32>
    %cst_150 = arith.constant 5.000000e-01 : f32
    %403 = vector.broadcast %cst_150 : f32 to vector<8x384xf32>
    %404 = arith.mulf %403, %402 : vector<8x384xf32>
    %cst_151 = arith.constant 5.000000e-01 : f32
    %405 = vector.broadcast %cst_151 : f32 to vector<8x384xf32>
    %406 = arith.addf %404, %405 : vector<8x384xf32>
    %407 = vector.extract_strided_slice %406 {offsets = [0, 0], sizes = [8, 128], strides = [1, 1]} : vector<8x384xf32> to vector<8x128xf32>
    %408 = vector.extract_strided_slice %406 {offsets = [0, 128], sizes = [8, 128], strides = [1, 1]} : vector<8x384xf32> to vector<8x128xf32>
    %409 = vector.extract_strided_slice %406 {offsets = [0, 256], sizes = [8, 128], strides = [1, 1]} : vector<8x384xf32> to vector<8x128xf32>
    %410 = vector.extract_strided_slice %398 {offsets = [0, 384], sizes = [8, 128], strides = [1, 1]} : vector<8x512xf32> to vector<8x128xf32>
    %411 = math.tanh %410 : vector<8x128xf32>
    %412 = arith.mulf %408, %363 : vector<8x128xf32>
    %413 = arith.mulf %407, %411 : vector<8x128xf32>
    %414 = arith.addf %412, %413 : vector<8x128xf32>
    %415 = math.tanh %414 : vector<8x128xf32>
    %416 = arith.mulf %409, %415 : vector<8x128xf32>
    %417 = arith.index_cast %369 : i32 to index
    %c0_152 = arith.constant 0 : index
    %418 = vector.load %arg11[%417, %c0_152] : memref<64x128xf32, #tpu.memory_space<vmem>>, vector<8x128xf32>
    tpu.vector_store %arg11[%417, %c0_152], %416 {strides = array<i32>} : memref<64x128xf32, #tpu.memory_space<vmem>>, vector<8x128xf32>,
    %c8_i32_153 = arith.constant 8 : i32
    %c0_154 = arith.constant 0 : index
    %c0_155 = arith.constant 0 : index
    %419 = vector.load %arg11[%c0_154, %c0_155] : memref<64x128xf32, #tpu.memory_space<vmem>>, vector<64x128xf32>
    %c0_156 = arith.constant 0 : index
    %c0_157 = arith.constant 0 : index
    %420 = vector.load %arg7[%c0_156, %c0_157] : memref<128x128xf32, #tpu.memory_space<vmem>>, vector<128x128xf32>
    %cst_158 = arith.constant dense<0.000000e+00> : vector<64x128xf32>
    %421 = tpu.matmul %419, %420, %cst_158 {dimension_numbers = #tpu.dot_dimension_numbers<[1], [0], [0], [1], [0, 0, 1, 1], [], []>} : vector<64x128xf32>, vector<128x128xf32>, vector<64x128xf32> -> vector<64x128xf32>
    %c0_159 = arith.constant 0 : index
    %c0_160 = arith.constant 0 : index
    %422 = vector.load %arg8[%c0_159, %c0_160] : memref<1x128xf32, #tpu.memory_space<vmem>>, vector<1x128xf32>
    %423 = vector.broadcast %422 : vector<1x128xf32> to vector<64x128xf32>
    %424 = arith.addf %421, %423 : vector<64x128xf32>
    %c0_161 = arith.constant 0 : index
    %c0_162 = arith.constant 0 : index
    %425 = vector.load %arg9[%c0_161, %c0_162] : memref<64x128xf32, #tpu.memory_space<vmem>>, vector<64x128xf32>
    tpu.vector_store %arg9[%c0_161, %c0_162], %424 {strides = array<i32>} : memref<64x128xf32, #tpu.memory_space<vmem>>, vector<64x128xf32>,
    return
  }
}

</mosaic_0001>

<bundles_post_ra>
// kernel: tpu_custom_call.1
= control target key start
LH: loop header
LB: loop body
LE: loop exit
PB: predicated region body
PF: predicated region fallthrough
CT: control target
= control target key end

     0   :  { %14 = vsyncpa [#allocation5], 0  ;;  %s10026_s0 = inlined_call_operand.vmem [shape: f32[64,8], index: 0, kind: input, shape index: {}]   ;;  %s10027_s1 = inlined_call_operand.vmem [shape: f32[8,512], index: 1, kind: input, shape index: {}]   ;;  %s10028_s2 = inlined_call_operand.hbm [shape: f32[128,512], index: 2, kind: input, shape index: {}]   ;;  %s10029_s3 = inlined_call_operand.vmem [shape: f32[1,512], index: 3, kind: input, shape index: {}]   ;;  %s10030_s4 = inlined_call_operand.hbm [shape: f32[128,512], index: 4, kind: input, shape index: {}]   ;;  %s10031_s5 = inlined_call_operand.hbm [shape: f32[128,512], index: 5, kind: input, shape index: {}]   ;;  %s10032_s6 = inlined_call_operand.vmem [shape: f32[1,512], index: 6, kind: input, shape index: {}]   ;;  %s10033_s7 = inlined_call_operand.hbm [shape: f32[128,128], index: 7, kind: input, shape index: {}]   ;;  %s10034_s8 = inlined_call_operand.vmem [shape: f32[1,128], index: 8, kind: input, shape index: {}]   ;;  %s10035_s9 = inlined_call_operand.hbm [shape: f32[64,128], index: 9, kind: output, shape index: {}]  }
   0x1   :  { %15 = vsyncpa [#allocation8], 0 }
   0x2   :  { %16 = vsyncpa [#allocation11], 0 }
   0x3   :  { %17 = vsyncpa [#allocation6], 0  ;;  %s8001_s30 = smov [#allocation7]   ;;  %s8002_s11 = smov [#allocation4]  }
   0x4   :  { %s41_s10 = sshll.u32 %s8001_s30, 4  ;;  %s27_s12 = sshll.u32 %s8002_s11, 4  ;;  %s42_s10 = int_to_ptr.vmem [resolvable:$true] %s41_s10  ;;  %s8061_s12 = int_to_ptr.vmem [resolvable:$true] %s27_s12 }
   0x5   :  { %s7883_s15 = scalar_lea.hbm %s10030_s4, 8192 }
   0x6   :  { %p7884_p0 = scmp.ne.s32.totalorder %s10030_s4, %s7883_s15  ;;  %p7887_p1 = scmp.lt.u32.totalorder %s7883_s15, %s10030_s4 }
   0x8   :  { %p7889_p2 = pnand %p7887_p1, %p7884_p0 }
   0xa   :  { %7892 = shalt.err (!%p7889_p2)
}
   0xb   :  { %s7893_s20 = scalar_lea.vmem %s42_s10, 8192  ;;  %p7898_p4 = scmp.lt.s32.totalorder %s42_s10, %s42_s10 }
   0xc   :  { %p7894_p3 = scmp.ne.s32.totalorder %s42_s10, %s7893_s20  ;;  %p7899_p5 = scmp.lt.s32.totalorder %s7893_s20, %s7893_s20 }
   0xe   :  { %p7900_p6 = por %p7899_p5, %p7898_p4 }
  0x10   :  { %p7901_p7 = pnand %p7900_p6, %p7894_p3 }
  0x12   :  { %7904 = shalt.err (!%p7901_p7)
}
  0x13   :  { %s8003_s21 = smov 512   ;;  %s8004_s22 = smov 32  }
  0x14   :  { %47 = dma.hbm_to_vmem [thread:$0]  %s10030_s4, 8192, %s42_s10, [#allocation8], %s8003_s21, %s8003_s21, %s8004_s22  }
  0x15   :  { %s7905_s27 = scalar_lea.hbm %s10028_s2, 8192 }
  0x16   :  { %p7906_p8 = scmp.ne.s32.totalorder %s10028_s2, %s7905_s27  ;;  %p7909_p9 = scmp.lt.u32.totalorder %s7905_s27, %s10028_s2 }
  0x18   :  { %p7911_p10 = pnand %p7909_p9, %p7906_p8 }
  0x1a   :  { %7914 = shalt.err (!%p7911_p10)
}
  0x1b   :  { %s7915_s13 = scalar_lea.vmem %s8061_s12, 8192  ;;  %p7920_p12 = scmp.lt.s32.totalorder %s8061_s12, %s8061_s12 }
  0x1c   :  { %p7916_p11 = scmp.ne.s32.totalorder %s8061_s12, %s7915_s13  ;;  %p7921_p13 = scmp.lt.s32.totalorder %s7915_s13, %s7915_s13 }
  0x1e   :  { %p7922_p0 = por %p7921_p13, %p7920_p12 }
  0x20   :  { %p7923_p1 = pnand %p7922_p0, %p7916_p11 }
  0x22   :  { %7926 = shalt.err (!%p7923_p1)
}
  0x23   :  { %33 = dma.hbm_to_vmem [thread:$0]  %s10028_s2, 8192, %s8061_s12, [#allocation5], %s8003_s21, %s8003_s21, %s8004_s22  }
  0x24   :  { %s8005_s14 = smov [#allocation9]   ;;  %s8006_s16 = smov [#allocation10]  }
  0x25   :  { %s53_s15 = sshll.u32 %s8005_s14, 4  ;;  %s67_s17 = sshll.u32 %s8006_s16, 4  ;;  %s54_s15 = int_to_ptr.vmem [resolvable:$true] %s53_s15  ;;  %s8098_s17 = int_to_ptr.vmem [resolvable:$true] %s67_s17 }
  0x26   :  { %s7927_s20 = scalar_lea.hbm %s10031_s5, 8192 }
  0x27   :  { %p7928_p2 = scmp.ne.s32.totalorder %s10031_s5, %s7927_s20  ;;  %p7931_p3 = scmp.lt.u32.totalorder %s7927_s20, %s10031_s5 }
  0x29   :  { %p7933_p4 = pnand %p7931_p3, %p7928_p2 }
  0x2b   :  { %7936 = shalt.err (!%p7933_p4)
}
  0x2c   :  { %s7937_s2 = scalar_lea.vmem %s54_s15, 8192  ;;  %p7942_p6 = scmp.lt.s32.totalorder %s54_s15, %s54_s15 }
  0x2d   :  { %p7938_p5 = scmp.ne.s32.totalorder %s54_s15, %s7937_s2  ;;  %p7943_p7 = scmp.lt.s32.totalorder %s7937_s2, %s7937_s2 }
  0x2f   :  { %p7944_p8 = por %p7943_p7, %p7942_p6 }
  0x31   :  { %p7945_p9 = pnand %p7944_p8, %p7938_p5 }
  0x33   :  { %7948 = shalt.err (!%p7945_p9)
}
  0x34   :  { %59 = dma.hbm_to_vmem [thread:$0]  %s10031_s5, 8192, %s54_s15, [#allocation8], %s8003_s21, %s8003_s21, %s8004_s22  }
  0x35   :  { %s7949_s30 = scalar_lea.hbm %s10033_s7, 2048 }
  0x36   :  { %p7950_p10 = scmp.ne.s32.totalorder %s10033_s7, %s7949_s30  ;;  %p7953_p11 = scmp.lt.u32.totalorder %s7949_s30, %s10033_s7 }
  0x38   :  { %p7955_p12 = pnand %p7953_p11, %p7950_p10 }
  0x3a   :  { %7958 = shalt.err (!%p7955_p12)
}
  0x3b   :  { %s7959_s14 = scalar_lea.vmem %s8098_s17, 2048  ;;  %p7964_p0 = scmp.lt.s32.totalorder %s8098_s17, %s8098_s17 }
  0x3c   :  { %p7960_p13 = scmp.ne.s32.totalorder %s8098_s17, %s7959_s14  ;;  %p7965_p1 = scmp.lt.s32.totalorder %s7959_s14, %s7959_s14 }
  0x3e   :  { %p7966_p2 = por %p7965_p1, %p7964_p0 }
  0x40   :  { %p7967_p3 = pnand %p7966_p2, %p7960_p13 }
  0x42   :  { %7970 = shalt.err (!%p7967_p3)
}
  0x43   :  { %s8007_s5 = smov 128   ;;  %s8008_s21 = smov 8  }
  0x44   :  { %73 = dma.hbm_to_vmem [thread:$0]  %s10033_s7, 2048, %s8098_s17, [#allocation11], %s8007_s5, %s8007_s5, %s8008_s21  }
  0x45   :  { %7993 = dma.done.wait [#allocation5], 8192  }
  0x46   :  { %7994 = vsyncadd [#allocation5], 4294959104 }
  0x47   :  { %7995 = dma.done.wait [#allocation8], 16384  }
  0x48   :  { %7996 = vsyncadd [#allocation8], 4294950912 }
  0x49   :  { %7997 = dma.done.wait [#allocation11], 2048  }
  0x4a   :  { %7998 = vsyncadd [#allocation11], 4294965248  ;;  %v10036_v0 = vmov 0.0   ;;  %v99_v1 = vld [vmem:[%s10027_s1 + $0x18] sm:$0xff]  ;;  %v98_v2 = vld [vmem:[%s10027_s1 + $0x10] sm:$0xff]  ;;  %vm122_vm0 = vcmask 64512  }
  0x4b   :  { %324 = vmatprep.mubr.f32.mxu1 %v10036_v0  ;;  %211 = vmatprep.mubr.f32.mxu0 %v10036_v0  ;;  %v88_v3 = vld [vmem:[%s10026_s0] sm:$0xff]  ;;  %v435_v4 = vld [vmem:[#allocation4 + $0x8] sm:$0xff]  ;;  %v90_v24 = vld [vmem:[%s10026_s0 + $0x10] sm:$0xff] }
  0x4c   :  { %260 = vmatprep.subr.mxu1 %v99_v1  ;;  %v439_v5 = vld [vmem:[#allocation4 + $0x28] sm:$0xff]  ;;  %v434_v6 = vld [vmem:[#allocation4] sm:$0xff]  ;;  %v91_v31 = vld [vmem:[%s10026_s0 + $0x18] sm:$0xff] }
  0x4d   :  { %261 = vmatpush1.msra.mxu1 %v98_v2  ;;  %v8146_v7 = vpack.c.bf16 %v439_v5, %v435_v4  ;;  %v438_v8 = vld [vmem:[#allocation4 + $0x20] sm:$0xff]  ;;  %v443_v9 = vld [vmem:[#allocation4 + $0x48] sm:$0xff]  ;;  %v94_v54 = vld [vmem:[%s10026_s0 + $0x30] sm:$0xff] }
  0x4e   :  { %5972 = vmatmul.mubr.msk.f32.vlgmr.msra.gmra.mrb[0].mxu1 %vm122_vm0, %v88_v3  ;;  %v8149_v10 = vpack.c.bf16 %v438_v8, %v434_v6  ;;  %v447_v11 = vld [vmem:[#allocation4 + $0x68] sm:$0xff]  ;;  %v442_v12 = vld [vmem:[#allocation4 + $0x40] sm:$0xff]  ;;  %v437_v59 = vld [vmem:[#allocation4 + $0x18] sm:$0xff] }
  0x4f   :  { %v446_v13 = vld [vmem:[#allocation4 + $0x60] sm:$0xff]  ;;  %6050 = vmatprep.subr.bf16.mxu1 %v8146_v7  ;;  %330 = vmatprep.mubr.f32.mxu1 %v10036_v0  ;;  %v89_v14 = vld [vmem:[%s10026_s0 + $0x8] sm:$0xff]  ;;  %v8156_v15 = vpack.c.bf16 %v447_v11, %v443_v9  ;;  %v441_v60 = vld [vmem:[#allocation4 + $0x38] sm:$0xff] }
  0x50   :  { %v451_v16 = vld [vmem:[#allocation4 + $0x88] sm:$0xff]  ;;  %6052 = vmatpush1.bf16.msra.mxu1 %v8149_v10  ;;  %v8159_v18 = vpack.c.bf16 %v446_v13, %v442_v12  ;;  %v450_v20 = vld [vmem:[#allocation4 + $0x80] sm:$0xff]  ;;  %v95_v61 = vld [vmem:[%s10026_s0 + $0x38] sm:$0xff]  ;;  %v8242_v63 = vpack.c.bf16 %v441_v60, %v437_v59 }
  0x51   :  { %v455_v17 = vld [vmem:[#allocation4 + $0xa8] sm:$0xff]  ;;  %6054 = vmatprep.subr.bf16.mxu1 %v8156_v15  ;;  %v454_v21 = vld [vmem:[#allocation4 + $0xa0] sm:$0xff]  ;;  %v436_v1 = vld [vmem:[#allocation4 + $0x10] sm:$0xff] }
  0x52   :  { %v8162_v19 = vpack.c.bf16 %v455_v17, %v451_v16  ;;  %5973 = vmatmul.mubr.msk.f32.gmra.mrb[2].mxu1 %vm122_vm0, %v89_v14  ;;  %v459_v22 = vld [vmem:[#allocation4 + $0xc8] sm:$0xff]  ;;  %v8170_v25 = vpack.c.bf16 %v454_v21, %v450_v20  ;;  %v458_v27 = vld [vmem:[#allocation4 + $0xc0] sm:$0xff]  ;;  %v440_v2 = vld [vmem:[#allocation4 + $0x30] sm:$0xff] }
  0x53   :  { %v463_v23 = vld [vmem:[#allocation4 + $0xe8] sm:$0xff]  ;;  %336 = vmatprep.mubr.f32.mxu1 %v10036_v0  ;;  %v462_v28 = vld [vmem:[#allocation4 + $0xe0] sm:$0xff]  ;;  %v449_v4 = vld [vmem:[#allocation4 + $0x78] sm:$0xff]  ;;  %v8249_v5 = vpack.c.bf16 %v440_v2, %v436_v1 }
  0x54   :  { %6056 = vmatpush1.bf16.msra.mxu1 %v8159_v18  ;;  %v8173_v26 = vpack.c.bf16 %v463_v23, %v459_v22  ;;  %v467_v29 = vld [vmem:[#allocation4 + $0x108] sm:$0xff]  ;;  %v8184_v33 = vpack.c.bf16 %v462_v28, %v458_v27  ;;  %v96_v34 = vld [vmem:[%s10027_s1] sm:$0xff]  ;;  %v444_v8 = vld [vmem:[#allocation4 + $0x50] sm:$0xff] }
  0x55   :  { %6058 = vmatprep.subr.bf16.mxu1 %v8162_v19  ;;  %v471_v30 = vld [vmem:[#allocation4 + $0x128] sm:$0xff]  ;;  %v466_v36 = vld [vmem:[#allocation4 + $0x100] sm:$0xff]  ;;  %v448_v9 = vld [vmem:[#allocation4 + $0x70] sm:$0xff] }
  0x56   :  { %5974 = vmatmul.mubr.msk.f32.gmra.mrb[4].mxu1 %vm122_vm0, %v90_v24  ;;  %v97_v32 = vld [vmem:[%s10027_s1 + $0x8] sm:$0xff]  ;;  %v8190_v35 = vpack.c.bf16 %v471_v30, %v467_v29  ;;  %v470_v37 = vld [vmem:[#allocation4 + $0x120] sm:$0xff]  ;;  %v453_v11 = vld [vmem:[#allocation4 + $0x98] sm:$0xff]  ;;  %v8258_v13 = vpack.c.bf16 %v448_v9, %v444_v8 }
  0x57   :  { %342 = vmatprep.mubr.f32.mxu1 %v10036_v0  ;;  %147 = vmatprep.subr.mxu0 %v97_v32  ;;  %v475_v38 = vld [vmem:[#allocation4 + $0x148] sm:$0xff]  ;;  %v92_v40 = vld [vmem:[%s10026_s0 + $0x20] sm:$0xff]  ;;  %v8200_v41 = vpack.c.bf16 %v470_v37, %v466_v36  ;;  %v457_v12 = vld [vmem:[#allocation4 + $0xb8] sm:$0xff] }
  0x58   :  { %6060 = vmatpush1.bf16.msra.mxu1 %v8170_v25  ;;  %148 = vmatpush1.msra.mxu0 %v96_v34  ;;  %v479_v39 = vld [vmem:[#allocation4 + $0x168] sm:$0xff]  ;;  %v474_v43 = vld [vmem:[#allocation4 + $0x140] sm:$0xff]  ;;  %v452_v16 = vld [vmem:[#allocation4 + $0x90] sm:$0xff] }
  0x59   :  { %6062 = vmatprep.subr.bf16.mxu1 %v8173_v26  ;;  %5964 = vmatmul.mubr.msk.f32.vlgmr.msra.gmra.mrb[0].mxu0 %vm122_vm0, %v88_v3  ;;  %v8203_v42 = vpack.c.bf16 %v479_v39, %v475_v38  ;;  %v478_v44 = vld [vmem:[#allocation4 + $0x160] sm:$0xff]  ;;  %v483_v45 = vld [vmem:[#allocation4 + $0x188] sm:$0xff]  ;;  %v445_v3 = vld [vmem:[#allocation4 + $0x58] sm:$0xff] }
  0x5a   :  { %5975 = vmatmul.mubr.msk.f32.gmra.mrb[6].mxu1 %vm122_vm0, %v91_v31  ;;  %217 = vmatprep.mubr.f32.mxu0 %v10036_v0  ;;  %v487_v46 = vld [vmem:[#allocation4 + $0x1a8] sm:$0xff]  ;;  %v8213_v48 = vpack.c.bf16 %v478_v44, %v474_v43  ;;  %v482_v50 = vld [vmem:[#allocation4 + $0x180] sm:$0xff]  ;;  %v8252_v6 = vpack.c.bf16 %v449_v4, %v445_v3  ;;  %v456_v17 = vld [vmem:[#allocation4 + $0xb0] sm:$0xff] }
  0x5b   :  { %348 = vmatprep.mubr.f32.mxu1 %v10036_v0  ;;  %v93_v47 = vld [vmem:[%s10026_s0 + $0x28] sm:$0xff]  ;;  %v8216_v49 = vpack.c.bf16 %v487_v46, %v483_v45  ;;  %v486_v51 = vld [vmem:[#allocation4 + $0x1a0] sm:$0xff]  ;;  %v461_v20 = vld [vmem:[#allocation4 + $0xd8] sm:$0xff]  ;;  %v8267_v22 = vpack.c.bf16 %v456_v17, %v452_v16 }
  0x5c   :  { %6064 = vmatpush1.bf16.msra.mxu1 %v8184_v33  ;;  %v491_v52 = vld [vmem:[#allocation4 + $0x1c8] sm:$0xff]  ;;  %v8226_v55 = vpack.c.bf16 %v486_v51, %v482_v50  ;;  %v490_v57 = vld [vmem:[#allocation4 + $0x1c0] sm:$0xff]  ;;  %v465_v21 = vld [vmem:[#allocation4 + $0xf8] sm:$0xff] }
  0x5d   :  { %6066 = vmatprep.subr.bf16.mxu1 %v8190_v35  ;;  %5965 = vmatmul.mubr.msk.f32.gmra.mrb[2].mxu0 %vm122_vm0, %v89_v14  ;;  %v495_v53 = vld [vmem:[#allocation4 + $0x1e8] sm:$0xff]  ;;  %v494_v58 = vld [vmem:[#allocation4 + $0x1e0] sm:$0xff]  ;;  %v8262_v14 = vpack.c.bf16 %v457_v12, %v453_v11  ;;  %v8270_v23 = vpack.c.bf16 %v465_v21, %v461_v20  ;;  %v464_v27 = vld [vmem:[#allocation4 + $0xf0] sm:$0xff] }
  0x5e   :  { %5976 = vmatmul.mubr.msk.f32.gmra.mrb[8].mxu1 %vm122_vm0, %v92_v40  ;;  %223 = vmatprep.mubr.f32.mxu0 %v10036_v0  ;;  %v8229_v56 = vpack.c.bf16 %v495_v53, %v491_v52  ;;  %v8239_v62 = vpack.c.bf16 %v494_v58, %v490_v57  ;;  %v469_v28 = vld [vmem:[#allocation4 + $0x118] sm:$0xff]  ;;  %v468_v32 = vld [vmem:[#allocation4 + $0x110] sm:$0xff]  ;;  %v731_v1 = vld [vmem:[#allocation9 + $0x28] sm:$0xff] }
  0x5f   :  { %354 = vmatprep.mubr.f32.mxu1 %v10036_v0  ;;  %v473_v29 = vld [vmem:[#allocation4 + $0x138] sm:$0xff]  ;;  %v472_v34 = vld [vmem:[#allocation4 + $0x130] sm:$0xff]  ;;  %v726_v9 = vld [vmem:[#allocation9] sm:$0xff] }
  0x60   :  { %6068 = vmatpush1.bf16.msra.mxu1 %v8200_v41  ;;  %v477_v36 = vld [vmem:[#allocation4 + $0x158] sm:$0xff]  ;;  %v8281_v38 = vpack.c.bf16 %v472_v34, %v468_v32  ;;  %v480_v43 = vld [vmem:[#allocation4 + $0x170] sm:$0xff]  ;;  %v730_v11 = vld [vmem:[#allocation9 + $0x20] sm:$0xff] }
  0x61   :  { %6070 = vmatprep.subr.bf16.mxu1 %v8203_v42  ;;  %5966 = vmatmul.mubr.msk.f32.gmra.mrb[4].mxu0 %vm122_vm0, %v90_v24  ;;  %v460_v24 = vld [vmem:[#allocation4 + $0xd0] sm:$0xff]  ;;  %v481_v37 = vld [vmem:[#allocation4 + $0x178] sm:$0xff]  ;;  %v8311_v16 = vpack.c.bf16 %v730_v11, %v726_v9  ;;  %v735_v21 = vld [vmem:[#allocation9 + $0x48] sm:$0xff] }
  0x62   :  { %5977 = vmatmul.mubr.msk.f32.gmra.mrb[10].mxu1 %vm122_vm0, %v93_v47  ;;  %229 = vmatprep.mubr.f32.mxu0 %v10036_v0  ;;  %v8275_v30 = vpack.c.bf16 %v464_v27, %v460_v24  ;;  %v8284_v39 = vpack.c.bf16 %v481_v37, %v477_v36  ;;  %v485_v44 = vld [vmem:[#allocation4 + $0x198] sm:$0xff]  ;;  %v484_v50 = vld [vmem:[#allocation4 + $0x190] sm:$0xff]  ;;  %v739_v24 = vld [vmem:[#allocation9 + $0x68] sm:$0xff] }
  0x63   :  { %360 = vmatprep.mubr.f32.mxu1 %v10036_v0  ;;  %v489_v45 = vld [vmem:[#allocation4 + $0x1b8] sm:$0xff]  ;;  %v488_v51 = vld [vmem:[#allocation4 + $0x1b0] sm:$0xff]  ;;  %v734_v32 = vld [vmem:[#allocation9 + $0x40] sm:$0xff] }
  0x64   :  { %6072 = vmatpush1.bf16.msra.mxu1 %v8213_v48  ;;  %v493_v52 = vld [vmem:[#allocation4 + $0x1d8] sm:$0xff]  ;;  %v492_v58 = vld [vmem:[#allocation4 + $0x1d0] sm:$0xff]  ;;  %v738_v34 = vld [vmem:[#allocation9 + $0x60] sm:$0xff] }
  0x65   :  { %6074 = vmatprep.subr.bf16.mxu1 %v8216_v49  ;;  %5967 = vmatmul.mubr.msk.f32.gmra.mrb[6].mxu0 %vm122_vm0, %v91_v31  ;;  %v8278_v31 = vpack.c.bf16 %v473_v29, %v469_v28  ;;  %v497_v53 = vld [vmem:[#allocation4 + $0x1f8] sm:$0xff]  ;;  %v496_v59 = vld [vmem:[#allocation4 + $0x1f0] sm:$0xff]  ;;  %v8317_v28 = vpack.c.bf16 %v739_v24, %v735_v21  ;;  %v8321_v37 = vpack.c.bf16 %v738_v34, %v734_v32  ;;  %v751_v11 = vld [vmem:[#allocation9 + $0xc8] sm:$0xff] }
  0x66   :  { %5978 = vmatmul.mubr.msk.f32.gmra.mrb[12].mxu1 %vm122_vm0, %v94_v54  ;;  %235 = vmatprep.mubr.f32.mxu0 %v10036_v0  ;;  %v8296_v57 = vpack.c.bf16 %v497_v53, %v493_v52  ;;  %v8299_v60 = vpack.c.bf16 %v496_v59, %v492_v58  ;;  %v729_v2 = vld [vmem:[#allocation9 + $0x18] sm:$0xff]  ;;  %v728_v12 = vld [vmem:[#allocation9 + $0x10] sm:$0xff]  ;;  %v742_v58 = vld [vmem:[#allocation9 + $0x80] sm:$0xff] }
  0x67   :  { %366 = vmatprep.mubr.f32.mxu1 %v10036_v0  ;;  %v733_v4 = vld [vmem:[#allocation9 + $0x38] sm:$0xff]  ;;  %v732_v17 = vld [vmem:[#allocation9 + $0x30] sm:$0xff]  ;;  %v746_v59 = vld [vmem:[#allocation9 + $0xa0] sm:$0xff] }
  0x68   :  { %6076 = vmatpush1.bf16.msra.mxu1 %v8226_v55  ;;  %v8307_v8 = vpack.c.bf16 %v733_v4, %v729_v2  ;;  %v8313_v20 = vpack.c.bf16 %v732_v17, %v728_v12  ;;  %v737_v27 = vld [vmem:[#allocation9 + $0x58] sm:$0xff]  ;;  %v744_v2 = vld [vmem:[#allocation9 + $0x90] sm:$0xff]  ;;  %v755_v12 = vld [vmem:[#allocation9 + $0xe8] sm:$0xff] }
  0x69   :  { %6078 = vmatprep.subr.bf16.mxu1 %v8229_v56  ;;  %5968 = vmatmul.mubr.msk.f32.gmra.mrb[8].mxu0 %vm122_vm0, %v92_v40  ;;  %v476_v40 = vld [vmem:[#allocation4 + $0x150] sm:$0xff]  ;;  %v741_v29 = vld [vmem:[#allocation9 + $0x78] sm:$0xff]  ;;  %v8341_v21 = vpack.c.bf16 %v755_v12, %v751_v11 }
  0x6a   :  { %5979 = vmatmul.mubr.msk.f32.gmra.mrb[14].mxu1 %vm122_vm0, %v95_v61  ;;  %241 = vmatprep.mubr.f32.mxu0 %v10036_v0  ;;  %v8287_v46 = vpack.c.bf16 %v480_v43, %v476_v40  ;;  %v8319_v36 = vpack.c.bf16 %v741_v29, %v737_v27  ;;  %v736_v40 = vld [vmem:[#allocation9 + $0x50] sm:$0xff]  ;;  %v749_v53 = vld [vmem:[#allocation9 + $0xb8] sm:$0xff]  ;;  %v750_v27 = vld [vmem:[#allocation9 + $0xc0] sm:$0xff] }
  0x6b   :  { %562 = vmatprep.mubr.f32.mxu1 %v10036_v0  ;;  %v740_v43 = vld [vmem:[#allocation9 + $0x70] sm:$0xff]  ;;  %v753_v17 = vld [vmem:[#allocation9 + $0xd8] sm:$0xff]  ;;  %v754_v29 = vld [vmem:[#allocation9 + $0xe0] sm:$0xff] }
  0x6c   :  { %6080 = vmatpush1.bf16.msra.mxu1 %v8239_v62  ;;  %v748_v4 = vld [vmem:[#allocation9 + $0xb0] sm:$0xff]  ;;  %v757_v24 = vld [vmem:[#allocation9 + $0xf8] sm:$0xff]  ;;  %v8345_v34 = vpack.c.bf16 %v754_v29, %v750_v27  ;;  %v767_v29 = vld [vmem:[#allocation9 + $0x148] sm:$0xff] }
  0x6d   :  { %6082 = vmatprep.subr.bf16.mxu1 %v8242_v63  ;;  %5969 = vmatmul.mubr.msk.f32.gmra.mrb[10].mxu0 %vm122_vm0, %v93_v47  ;;  %v8290_v47 = vpack.c.bf16 %v489_v45, %v485_v44  ;;  %v8324_v44 = vpack.c.bf16 %v740_v43, %v736_v40  ;;  %v743_v45 = vld [vmem:[#allocation9 + $0x88] sm:$0xff]  ;;  %v8336_v9 = vpack.c.bf16 %v748_v4, %v744_v2  ;;  %v752_v40 = vld [vmem:[#allocation9 + $0xd0] sm:$0xff]  ;;  %v758_v2 = vld [vmem:[#allocation9 + $0x100] sm:$0xff] }
  0x6e   :  { %247 = vmatprep.mubr.f32.mxu0 %v10036_v0  ;;  %v8343_v32 = vpack.c.bf16 %v757_v24, %v753_v17  ;;  %10275 = vst [vmem:[#allocation17_spill] sm:$0xff] %v8345_v34  ;;  %v756_v43 = vld [vmem:[#allocation9 + $0xf0] sm:$0xff]  ;;  %v762_v4 = vld [vmem:[#allocation9 + $0x120] sm:$0xff] }
  0x6f   :  { %563 = vmatmul.mubr.f32.vlgmr.msra.gmra.mrb[16].mxu1 %v10036_v0  ;;  %v8357_v12 = vpack.c.bf16 %v762_v4, %v758_v2  ;;  %v760_v17 = vld [vmem:[#allocation9 + $0x110] sm:$0xff] }
  0x70   :  { %6084 = vmatpush1.bf16.msra.mxu1 %v8249_v5  ;;  %633 = vmatprep.mubr.f32.mxu1 %v10036_v0  ;;  %v764_v24 = vld [vmem:[#allocation9 + $0x130] sm:$0xff] }
  0x71   :  { %6086 = vmatprep.subr.bf16.mxu1 %v8252_v6  ;;  %5970 = vmatmul.mubr.msk.f32.gmra.mrb[12].mxu0 %vm122_vm0, %v94_v54  ;;  %v8293_v54 = vpack.c.bf16 %v488_v51, %v484_v50  ;;  %v747_v50 = vld [vmem:[#allocation9 + $0xa8] sm:$0xff]  ;;  %v745_v51 = vld [vmem:[#allocation9 + $0x98] sm:$0xff]  ;;  %10279 = vst [vmem:[#allocation21_spill] sm:$0xff] %v8357_v12  ;;  %v8360_v27 = vpack.c.bf16 %v764_v24, %v760_v17  ;;  %v768_v17 = vld [vmem:[#allocation9 + $0x150] sm:$0xff] }
  0x72   :  { %253 = vmatprep.mubr.f32.mxu0 %v10036_v0  ;;  %v8329_v52 = vpack.c.bf16 %v747_v50, %v743_v45  ;;  %v8348_v45 = vpack.c.bf16 %v756_v43, %v752_v40  ;;  %v759_v50 = vld [vmem:[#allocation9 + $0x108] sm:$0xff]  ;;  %v769_v43 = vld [vmem:[#allocation9 + $0x158] sm:$0xff]  ;;  %v772_v24 = vld [vmem:[#allocation9 + $0x170] sm:$0xff] }
  0x73   :  { %10280 = vst [vmem:[#allocation22_spill] sm:$0xff] %v8360_v27  ;;  %v771_v40 = vld [vmem:[#allocation9 + $0x168] sm:$0xff] }
  0x74   :  { %6088 = vmatpush1.bf16.msra.mxu1 %v8258_v13  ;;  %10276 = vst [vmem:[#allocation18_spill] sm:$0xff] %v8348_v45 }
  0x75   :  { %6090 = vmatprep.subr.bf16.mxu1 %v8262_v14  ;;  %5971 = vmatmul.mubr.msk.f32.gmra.mrb[14].mxu0 %vm122_vm0, %v95_v61  ;;  %v727_v61 = vld [vmem:[#allocation9 + $0x8] sm:$0xff] }
  0x76   :  { %854 = vmatprep.mubr.f32.mxu0 %v10036_v0  ;;  %v8305_v3 = vpack.c.bf16 %v731_v1, %v727_v61  ;;  %v8331_v61 = vpack.c.bf16 %v749_v53, %v745_v51  ;;  %v8333_v1 = vpack.c.bf16 %v746_v59, %v742_v58  ;;  %v763_v51 = vld [vmem:[#allocation9 + $0x128] sm:$0xff]  ;;  %v761_v53 = vld [vmem:[#allocation9 + $0x118] sm:$0xff] }
  0x77   :  { %v8353_v58 = vpack.c.bf16 %v763_v51, %v759_v50  ;;  %v765_v59 = vld [vmem:[#allocation9 + $0x138] sm:$0xff]  ;;  %v8365_v50 = vpack.c.bf16 %v771_v40, %v767_v29  ;;  %v779_v29 = vld [vmem:[#allocation9 + $0x1a8] sm:$0xff] }
  0x78   :  { %6092 = vmatpush1.bf16.msra.mxu1 %v8267_v22  ;;  %6114 = vmatprep.subr.bf16.mxu0 %v8305_v3  ;;  %v8355_v11 = vpack.c.bf16 %v765_v59, %v761_v53  ;;  %v773_v51 = vld [vmem:[#allocation9 + $0x178] sm:$0xff]  ;;  %v766_v53 = vld [vmem:[#allocation9 + $0x140] sm:$0xff] }
  0x79   :  { %6094 = vmatprep.subr.bf16.mxu1 %v8270_v23  ;;  %6116 = vmatpush1.bf16.msra.mxu0 %v8311_v16  ;;  %10277 = vst [vmem:[#allocation19_spill] sm:$0xff] %v8353_v58  ;;  %10281 = vst [vmem:[#allocation23_spill] sm:$0xff] %v8365_v50  ;;  %v770_v59 = vld [vmem:[#allocation9 + $0x160] sm:$0xff]  ;;  %v8367_v2 = vpack.c.bf16 %v773_v51, %v769_v43  ;;  %v777_v40 = vld [vmem:[#allocation9 + $0x198] sm:$0xff] }
  0x7a   :  { %6118 = vmatprep.subr.bf16.mxu0 %v8317_v28  ;;  %10278 = vst [vmem:[#allocation20_spill] sm:$0xff] %v8355_v11  ;;  %v8369_v4 = vpack.c.bf16 %v770_v59, %v766_v53  ;;  %v781_v43 = vld [vmem:[#allocation9 + $0x1b8] sm:$0xff]  ;;  %v774_v51 = vld [vmem:[#allocation9 + $0x180] sm:$0xff] }
  0x7b   :  { %10282 = vst [vmem:[#allocation24_spill] sm:$0xff] %v8367_v2  ;;  %v778_v53 = vld [vmem:[#allocation9 + $0x1a0] sm:$0xff]  ;;  %v8379_v59 = vpack.c.bf16 %v781_v43, %v777_v40 }
  0x7c   :  { %6096 = vmatpush1.bf16.msra.mxu1 %v8275_v30  ;;  %10283 = vst [vmem:[#allocation25_spill] sm:$0xff] %v8369_v4  ;;  %v782_v40 = vld [vmem:[#allocation9 + $0x1c0] sm:$0xff] }
  0x7d   :  { %6098 = vmatprep.subr.bf16.mxu1 %v8278_v31  ;;  %6120 = vmatpush1.bf16.msra.mxu0 %v8321_v37  ;;  %10286 = vst [vmem:[#allocation28_spill] sm:$0xff] %v8379_v59  ;;  %v786_v43 = vld [vmem:[#allocation9 + $0x1e0] sm:$0xff] }
  0x7e   :  { %6122 = vmatprep.subr.bf16.mxu0 %v8329_v52 }
  0x80   :  { %6100 = vmatpush1.bf16.msra.mxu1 %v8281_v38 }
  0x81   :  { %6102 = vmatprep.subr.bf16.mxu1 %v8284_v39  ;;  %6124 = vmatpush1.bf16.msra.mxu0 %v8333_v1 }
  0x82   :  { %6126 = vmatprep.subr.bf16.mxu0 %v8341_v21 }
  0x84   :  { %6104 = vmatpush1.bf16.msra.mxu1 %v8287_v46 }
  0x85   :  { %6106 = vmatprep.subr.bf16.mxu1 %v8290_v47  ;;  %6128 = vmatpush1.bf16.msra.mxu0 %v8345_v34 }
  0x86   :  { %6130 = vmatprep.subr.bf16.mxu0 %v8353_v58  ;;  %v785_v58 = vld [vmem:[#allocation9 + $0x1d8] sm:$0xff] }
  0x88   :  { %6108 = vmatpush1.bf16.msra.mxu1 %v8293_v54 }
  0x89   :  { %6110 = vmatprep.subr.bf16.mxu1 %v8296_v57  ;;  %6132 = vmatpush1.bf16.msra.mxu0 %v8357_v12 }
  0x8a   :  { %6134 = vmatprep.subr.bf16.mxu0 %v8365_v50  ;;  %v783_v50 = vld [vmem:[#allocation9 + $0x1c8] sm:$0xff] }
  0x8c   :  { %6112 = vmatpush1.bf16.msra.mxu1 %v8299_v60 }
  0x8d   :  { %6146 = vmatprep.subr.bf16.mxu1 %v8307_v8  ;;  %6136 = vmatpush1.bf16.msra.mxu0 %v8369_v4 }
  0x8f   :  { %634 = vmatmul.mubr.f32.vlgmr.msra.gmra.mrb[0].mxu1 %v10036_v0 }
  0x90   :  { %925 = vmatprep.mubr.f32.mxu1 %v10036_v0  ;;  %6148 = vmatpush1.bf16.msra.mxu1 %v8313_v20  ;;  %v8372_v0 = vpack.c.bf16 %v772_v24, %v768_v17  ;;  %v776_v17 = vld [vmem:[#allocation9 + $0x190] sm:$0xff] }
  0x91   :  { %6150 = vmatprep.subr.bf16.mxu1 %v8319_v36  ;;  %v780_v24 = vld [vmem:[#allocation9 + $0x1b0] sm:$0xff] }
  0x92   :  { %10284 = vst [vmem:[#allocation26_spill] sm:$0xff] %v8372_v0  ;;  %v8384_v4 = vpack.c.bf16 %v780_v24, %v776_v17  ;;  %v788_v17 = vld [vmem:[#allocation9 + $0x1f0] sm:$0xff]  ;;  %v663_v24 = vld [vmem:[#allocation7 + $0x8] sm:$0xff] }
  0x94   :  { %6152 = vmatpush1.bf16.msra.mxu1 %v8324_v44  ;;  %10288 = vst [vmem:[#allocation30_spill] sm:$0xff] %v8384_v4 }
  0x95   :  { %6154 = vmatprep.subr.bf16.mxu1 %v8331_v61 }
  0x98   :  { %6156 = vmatpush1.bf16.msra.mxu1 %v8336_v9 }
  0x99   :  { %6158 = vmatprep.subr.bf16.mxu1 %v8343_v32 }
  0x9c   :  { %6160 = vmatpush1.bf16.msra.mxu1 %v8348_v45  ;;  %v789_v45 = vld [vmem:[#allocation9 + $0x1f8] sm:$0xff] }
  0x9d   :  { %6162 = vmatprep.subr.bf16.mxu1 %v8355_v11  ;;  %v8381_v11 = vpack.c.bf16 %v778_v53, %v774_v51  ;;  %v784_v51 = vld [vmem:[#allocation9 + $0x1d0] sm:$0xff]  ;;  %v8393_v53 = vpack.c.bf16 %v786_v43, %v782_v40  ;;  %v662_v40 = vld [vmem:[#allocation7] sm:$0xff] }
  0x9e   :  { %v666_v43 = vld [vmem:[#allocation7 + $0x20] sm:$0xff] }
  0x9f   :  { %10287 = vst [vmem:[#allocation29_spill] sm:$0xff] %v8381_v11  ;;  %10291 = vst [vmem:[#allocation33_spill] sm:$0xff] %v8393_v53 }
  0xa0   :  { %6164 = vmatpush1.bf16.msra.mxu1 %v8360_v27  ;;  %v775_v27 = vld [vmem:[#allocation9 + $0x188] sm:$0xff] }
  0xa1   :  { %6166 = vmatprep.subr.bf16.mxu1 %v8367_v2  ;;  %v8377_v12 = vpack.c.bf16 %v779_v29, %v775_v27  ;;  %v787_v2 = vld [vmem:[#allocation9 + $0x1e8] sm:$0xff]  ;;  %v8390_v29 = vpack.c.bf16 %v789_v45, %v785_v58  ;;  %v665_v45 = vld [vmem:[#allocation7 + $0x18] sm:$0xff] }
  0xa2   :  { %v8388_v27 = vpack.c.bf16 %v787_v2, %v783_v50  ;;  %v669_v58 = vld [vmem:[#allocation7 + $0x38] sm:$0xff] }
  0xa3   :  { %10285 = vst [vmem:[#allocation27_spill] sm:$0xff] %v8377_v12  ;;  %6138 = vmatprep.subr.bf16.mxu0 %v8377_v12  ;;  %10290 = vst [vmem:[#allocation32_spill] sm:$0xff] %v8390_v29  ;;  %v667_v12 = vld [vmem:[#allocation7 + $0x28] sm:$0xff]  ;;  %v8401_v2 = vpack.c.bf16 %v669_v58, %v665_v45  ;;  %v673_v58 = vld [vmem:[#allocation7 + $0x58] sm:$0xff] }
  0xa4   :  { %6168 = vmatpush1.bf16.msra.mxu1 %v8372_v0  ;;  %6140 = vmatpush1.bf16.msra.mxu0 %v8381_v11  ;;  %10289 = vst [vmem:[#allocation31_spill] sm:$0xff] %v8388_v27  ;;  %v8399_v50 = vpack.c.bf16 %v667_v12, %v663_v24  ;;  %v10296_v12 = vmov 0.0   ;;  %v671_v24 = vld [vmem:[#allocation7 + $0x48] sm:$0xff]  ;;  %v713_v0 = vld [vmem:[#allocation7 + $0x198] sm:$0xff] }
  0xa5   :  { %6170 = vmatprep.subr.bf16.mxu1 %v8379_v59  ;;  %6142 = vmatprep.subr.bf16.mxu0 %v8388_v27  ;;  %v8397_v59 = vpack.c.bf16 %v788_v17, %v784_v51  ;;  %10294 = vst [vmem:[#allocation36_spill] sm:$0xff] %v8401_v2  ;;  %v668_v51 = vld [vmem:[#allocation7 + $0x30] sm:$0xff]  ;;  %v675_v45 = vld [vmem:[#allocation7 + $0x68] sm:$0xff] }
  0xa6   :  { %10293 = vst [vmem:[#allocation35_spill] sm:$0xff] %v8399_v50 }
  0xa7   :  { %10292 = vst [vmem:[#allocation34_spill] sm:$0xff] %v8397_v59 }
  0xa8   :  { %6172 = vmatpush1.bf16.msra.mxu1 %v8384_v4  ;;  %6144 = vmatpush1.bf16.msra.mxu0 %v8393_v53  ;;  %v664_v4 = vld [vmem:[#allocation7 + $0x10] sm:$0xff] }
  0xa9   :  { %6174 = vmatprep.subr.bf16.mxu1 %v8390_v29  ;;  %6178 = vmatprep.subr.bf16.mxu0 %v8399_v50  ;;  %v8407_v29 = vpack.c.bf16 %v666_v43, %v662_v40  ;;  %v8410_v17 = vpack.c.bf16 %v668_v51, %v664_v4  ;;  %v8415_v50 = vpack.c.bf16 %v675_v45, %v671_v24  ;;  %v674_v40 = vld [vmem:[#allocation7 + $0x60] sm:$0xff]  ;;  %v672_v51 = vld [vmem:[#allocation7 + $0x50] sm:$0xff]  ;;  %v679_v24 = vld [vmem:[#allocation7 + $0x88] sm:$0xff] }
  0xaa   :  { %v676_v53 = vld [vmem:[#allocation7 + $0x70] sm:$0xff]  ;;  %v683_v45 = vld [vmem:[#allocation7 + $0xa8] sm:$0xff] }
  0xab   :  { %10295 = vst [vmem:[#allocation37_spill] sm:$0xff] %v8407_v29  ;;  %855 = vmatmul.mubr.f32.vlgmr.msra.gmra.mrb[16].mxu0 %v10296_v12  ;;  %10297 = vst [vmem:[#allocation38_spill] sm:$0xff] %v8410_v17 }
  0xac   :  { %6176 = vmatpush1.bf16.msra.mxu1 %v8397_v59  ;;  %6180 = vmatpush1.bf16.msra.mxu0 %v8407_v29  ;;  %10298 = vst [vmem:[#allocation39_spill] sm:$0xff] %v8415_v50  ;;  %v677_v59 = vld [vmem:[#allocation7 + $0x78] sm:$0xff]  ;;  %v8424_v29 = vpack.c.bf16 %v676_v53, %v672_v51  ;;  %v680_v53 = vld [vmem:[#allocation7 + $0x90] sm:$0xff] }
  0xad   :  { %6210 = vmatprep.subr.bf16.mxu1 %v8401_v2  ;;  %v670_v2 = vld [vmem:[#allocation7 + $0x40] sm:$0xff]  ;;  %996 = vmatprep.mubr.f32.mxu0 %v10296_v12  ;;  %v8418_v43 = vpack.c.bf16 %v677_v59, %v673_v58  ;;  %v8429_v59 = vpack.c.bf16 %v683_v45, %v679_v24  ;;  %v684_v51 = vld [vmem:[#allocation7 + $0xb0] sm:$0xff]  ;;  %v691_v24 = vld [vmem:[#allocation7 + $0xe8] sm:$0xff] }
  0xae   :  { %v8420_v4 = vpack.c.bf16 %v674_v40, %v670_v2  ;;  %6182 = vmatprep.subr.bf16.mxu0 %v8415_v50  ;;  %10301 = vst [vmem:[#allocation42_spill] sm:$0xff] %v8424_v29  ;;  %v685_v2 = vld [vmem:[#allocation7 + $0xb8] sm:$0xff]  ;;  %v678_v58 = vld [vmem:[#allocation7 + $0x80] sm:$0xff] }
  0xaf   :  { %926 = vmatmul.mubr.f32.vlgmr.msra.gmra.mrb[18].mxu1 %v10296_v12  ;;  %10299 = vst [vmem:[#allocation40_spill] sm:$0xff] %v8418_v43  ;;  %10302 = vst [vmem:[#allocation43_spill] sm:$0xff] %v8429_v59  ;;  %v682_v40 = vld [vmem:[#allocation7 + $0xa0] sm:$0xff]  ;;  %v689_v45 = vld [vmem:[#allocation7 + $0xd8] sm:$0xff] }
  0xb0   :  { %6212 = vmatpush1.bf16.msra.mxu1 %v8410_v17  ;;  %10300 = vst [vmem:[#allocation41_spill] sm:$0xff] %v8420_v4  ;;  %1067 = vmatprep.mubr.f32.mxu1 %v10296_v12  ;;  %v681_v17 = vld [vmem:[#allocation7 + $0x98] sm:$0xff]  ;;  %v8433_v11 = vpack.c.bf16 %v682_v40, %v678_v58  ;;  %v690_v58 = vld [vmem:[#allocation7 + $0xe0] sm:$0xff] }
  0xb1   :  { %6214 = vmatprep.subr.bf16.mxu1 %v8418_v43  ;;  %6184 = vmatpush1.bf16.msra.mxu0 %v8420_v4  ;;  %v8431_v27 = vpack.c.bf16 %v685_v2, %v681_v17  ;;  %v8436_v43 = vpack.c.bf16 %v684_v51, %v680_v53  ;;  %v693_v17 = vld [vmem:[#allocation7 + $0xf8] sm:$0xff]  ;;  %v686_v2 = vld [vmem:[#allocation7 + $0xc0] sm:$0xff]  ;;  %v688_v53 = vld [vmem:[#allocation7 + $0xd0] sm:$0xff] }
  0xb2   :  { %10304 = vst [vmem:[#allocation45_spill] sm:$0xff] %v8433_v11  ;;  %6186 = vmatprep.subr.bf16.mxu0 %v8429_v59  ;;  %v8443_v40 = vpack.c.bf16 %v693_v17, %v689_v45  ;;  %v8445_v50 = vpack.c.bf16 %v690_v58, %v686_v2  ;;  %v692_v51 = vld [vmem:[#allocation7 + $0xf0] sm:$0xff]  ;;  %v701_v45 = vld [vmem:[#allocation7 + $0x138] sm:$0xff]  ;;  %v694_v17 = vld [vmem:[#allocation7 + $0x100] sm:$0xff] }
  0xb3   :  { %10303 = vst [vmem:[#allocation44_spill] sm:$0xff] %v8431_v27  ;;  %10305 = vst [vmem:[#allocation46_spill] sm:$0xff] %v8436_v43  ;;  %v698_v2 = vld [vmem:[#allocation7 + $0x120] sm:$0xff] }
  0xb4   :  { %6216 = vmatpush1.bf16.msra.mxu1 %v8424_v29  ;;  %v687_v29 = vld [vmem:[#allocation7 + $0xc8] sm:$0xff]  ;;  %10307 = vst [vmem:[#allocation48_spill] sm:$0xff] %v8443_v40  ;;  %10308 = vst [vmem:[#allocation49_spill] sm:$0xff] %v8445_v50  ;;  %v8457_v59 = vpack.c.bf16 %v698_v2, %v694_v17  ;;  %v706_v17 = vld [vmem:[#allocation7 + $0x160] sm:$0xff] }
  0xb5   :  { %6218 = vmatprep.subr.bf16.mxu1 %v8431_v27  ;;  %6188 = vmatpush1.bf16.msra.mxu0 %v8433_v11  ;;  %v8441_v4 = vpack.c.bf16 %v691_v24, %v687_v29  ;;  %v8448_v27 = vpack.c.bf16 %v692_v51, %v688_v53  ;;  %v699_v29 = vld [vmem:[#allocation7 + $0x128] sm:$0xff]  ;;  %v697_v24 = vld [vmem:[#allocation7 + $0x118] sm:$0xff]  ;;  %v696_v53 = vld [vmem:[#allocation7 + $0x110] sm:$0xff] }
  0xb6   :  { %v8455_v58 = vpack.c.bf16 %v701_v45, %v697_v24  ;;  %10312 = vst [vmem:[#allocation53_spill] sm:$0xff] %v8457_v59  ;;  %v700_v51 = vld [vmem:[#allocation7 + $0x130] sm:$0xff]  ;;  %v709_v24 = vld [vmem:[#allocation7 + $0x178] sm:$0xff]  ;;  %v702_v45 = vld [vmem:[#allocation7 + $0x140] sm:$0xff] }
  0xb7   :  { %10306 = vst [vmem:[#allocation47_spill] sm:$0xff] %v8441_v4  ;;  %6190 = vmatprep.subr.bf16.mxu0 %v8441_v4  ;;  %10309 = vst [vmem:[#allocation50_spill] sm:$0xff] %v8448_v27  ;;  %v8469_v4 = vpack.c.bf16 %v706_v17, %v702_v45 }
  0xb8   :  { %6220 = vmatpush1.bf16.msra.mxu1 %v8436_v43  ;;  %v695_v43 = vld [vmem:[#allocation7 + $0x108] sm:$0xff]  ;;  %10311 = vst [vmem:[#allocation52_spill] sm:$0xff] %v8455_v58 }
  0xb9   :  { %6222 = vmatprep.subr.bf16.mxu1 %v8443_v40  ;;  %6192 = vmatpush1.bf16.msra.mxu0 %v8445_v50  ;;  %v8453_v11 = vpack.c.bf16 %v699_v29, %v695_v43  ;;  %v8460_v40 = vpack.c.bf16 %v700_v51, %v696_v53  ;;  %v707_v43 = vld [vmem:[#allocation7 + $0x168] sm:$0xff]  ;;  %v705_v29 = vld [vmem:[#allocation7 + $0x158] sm:$0xff]  ;;  %10316 = vst [vmem:[#allocation57_spill] sm:$0xff] %v8469_v4  ;;  %v704_v53 = vld [vmem:[#allocation7 + $0x150] sm:$0xff] }
  0xba   :  { %v8467_v2 = vpack.c.bf16 %v709_v24, %v705_v29  ;;  %v708_v51 = vld [vmem:[#allocation7 + $0x170] sm:$0xff]  ;;  %v710_v29 = vld [vmem:[#allocation7 + $0x180] sm:$0xff] }
  0xbb   :  { %10310 = vst [vmem:[#allocation51_spill] sm:$0xff] %v8453_v11  ;;  %6194 = vmatprep.subr.bf16.mxu0 %v8453_v11  ;;  %10313 = vst [vmem:[#allocation54_spill] sm:$0xff] %v8460_v40  ;;  %v715_v11 = vld [vmem:[#allocation7 + $0x1a8] sm:$0xff]  ;;  %v714_v24 = vld [vmem:[#allocation7 + $0x1a0] sm:$0xff] }
  0xbc   :  { %6224 = vmatpush1.bf16.msra.mxu1 %v8448_v27  ;;  %v703_v27 = vld [vmem:[#allocation7 + $0x148] sm:$0xff]  ;;  %10315 = vst [vmem:[#allocation56_spill] sm:$0xff] %v8467_v2  ;;  %v8481_v17 = vpack.c.bf16 %v714_v24, %v710_v29  ;;  %v720_v29 = vld [vmem:[#allocation7 + $0x1d0] sm:$0xff] }
  0xbd   :  { %6226 = vmatprep.subr.bf16.mxu1 %v8455_v58  ;;  %6196 = vmatpush1.bf16.msra.mxu0 %v8457_v59  ;;  %v8465_v50 = vpack.c.bf16 %v707_v43, %v703_v27  ;;  %v8472_v58 = vpack.c.bf16 %v708_v51, %v704_v53  ;;  %v711_v59 = vld [vmem:[#allocation7 + $0x188] sm:$0xff]  ;;  %v717_v43 = vld [vmem:[#allocation7 + $0x1b8] sm:$0xff]  ;;  %v712_v53 = vld [vmem:[#allocation7 + $0x190] sm:$0xff] }
  0xbe   :  { %v8476_v27 = vpack.c.bf16 %v715_v11, %v711_v59  ;;  %v8479_v45 = vpack.c.bf16 %v717_v43, %v713_v0  ;;  %10320 = vst [vmem:[#allocation61_spill] sm:$0xff] %v8481_v17  ;;  %v716_v51 = vld [vmem:[#allocation7 + $0x1b0] sm:$0xff]  ;;  %v725_v11 = vld [vmem:[#allocation7 + $0x1f8] sm:$0xff]  ;;  %v718_v0 = vld [vmem:[#allocation7 + $0x1c0] sm:$0xff] }
  0xbf   :  { %10314 = vst [vmem:[#allocation55_spill] sm:$0xff] %v8465_v50  ;;  %6198 = vmatprep.subr.bf16.mxu0 %v8465_v50  ;;  %10317 = vst [vmem:[#allocation58_spill] sm:$0xff] %v8472_v58  ;;  %v719_v50 = vld [vmem:[#allocation7 + $0x1c8] sm:$0xff]  ;;  %v722_v43 = vld [vmem:[#allocation7 + $0x1e0] sm:$0xff] }
  0xc0   :  { %6228 = vmatpush1.bf16.msra.mxu1 %v8460_v40  ;;  %10318 = vst [vmem:[#allocation59_spill] sm:$0xff] %v8476_v27  ;;  %10319 = vst [vmem:[#allocation60_spill] sm:$0xff] %v8479_v45  ;;  %v8484_v40 = vpack.c.bf16 %v716_v51, %v712_v53  ;;  %v8492_v24 = vpack.c.bf16 %v722_v43, %v718_v0 }
  0xc1   :  { %6230 = vmatprep.subr.bf16.mxu1 %v8467_v2  ;;  %6200 = vmatpush1.bf16.msra.mxu0 %v8469_v4  ;;  %v723_v2 = vld [vmem:[#allocation7 + $0x1e8] sm:$0xff]  ;;  %v721_v4 = vld [vmem:[#allocation7 + $0x1d8] sm:$0xff] }
  0xc2   :  { %6202 = vmatprep.subr.bf16.mxu0 %v8476_v27  ;;  %10321 = vst [vmem:[#allocation62_spill] sm:$0xff] %v8484_v40  ;;  %v8487_v59 = vpack.c.bf16 %v723_v2, %v719_v50  ;;  %v8489_v34 = vpack.c.bf16 %v725_v11, %v721_v4  ;;  %10324 = vst [vmem:[#allocation65_spill] sm:$0xff] %v8492_v24  ;;  %v102_v2 = vlaneseq }
  0xc4   :  { %6232 = vmatpush1.bf16.msra.mxu1 %v8472_v58  ;;  %10322 = vst [vmem:[#allocation63_spill] sm:$0xff] %v8487_v59  ;;  %10323 = vst [vmem:[#allocation64_spill] sm:$0xff] %v8489_v34  ;;  %v724_v58 = vld [vmem:[#allocation7 + $0x1f0] sm:$0xff]  ;;  %v8503_v51 = vshrl.u32 %v102_v2, 7 }
  0xc5   :  { %6234 = vmatprep.subr.bf16.mxu1 %v8479_v45  ;;  %6204 = vmatpush1.bf16.msra.mxu0 %v8481_v17  ;;  %v8496_v53 = vpack.c.bf16 %v724_v58, %v720_v29  ;;  %v100_v58 = vld [vmem:[%s10029_s3] sm:$0xf] }
  0xc6   :  { %6206 = vmatprep.subr.bf16.mxu0 %v8487_v59  ;;  %v10086_v11 = vsub.s32 0, %v8503_v51  ;;  %v10087_v0 = vsub.s32 1, %v8503_v51  ;;  %v10089_v17 = vsub.s32 3, %v8503_v51 }
  0xc7   :  { %10325 = vst [vmem:[#allocation66_spill] sm:$0xff] %v8496_v53 }
  0xc8   :  { %6236 = vmatpush1.bf16.msra.mxu1 %v8484_v40  ;;  %v8512_v43 = vrot.slane %v100_v58, %v10086_v11  ;;  %v10095_v11 = vsub.s32 2, %v8503_v51 }
  0xc9   :  { %6238 = vmatprep.subr.bf16.mxu1 %v8489_v34  ;;  %6208 = vmatpush1.bf16.msra.mxu0 %v8492_v24 }
  0xca   :  { %6242 = vmatprep.subr.bf16.mxu0 %v8146_v7  ;;  %10326 = vst [vmem:[#allocation67_spill] sm:$0xff] %v8512_v43  ;;  %v8516_v7 = vrot.slane %v100_v58, %v10087_v0  ;;  %v8524_v0 = vrot.slane %v100_v58, %v10089_v17 }
  0xcc   :  { %6240 = vmatpush1.bf16.msra.mxu1 %v8496_v53  ;;  %10327 = vst [vmem:[#allocation68_spill] sm:$0xff] %v8516_v7  ;;  %10328 = vst [vmem:[#allocation69_spill] sm:$0xff] %v8524_v0 }
  0xcd   :  { %6274 = vmatprep.subr.bf16.mxu1 %v8242_v63 }
 0x12c   :  { %v213_v50 = vpop.f32.mrb[0].mxu0 }
 0x12d   :  { %v215_v4 = vpop.f32.mrb[1].mxu0  ;;  %v214_v63 = vadd.f32 %v213_v50, %v8512_v43  ;;  %v8528_v50 = vrot.slane %v100_v58, %v10095_v11 }
 0x12e   :  { %v216_v29 = vadd.f32 %v215_v4, %v8516_v7 }
 0x12f   :  { %10329 = vst [vmem:[#allocation70_spill] sm:$0xff] %v8528_v50 }
 0x142   :  { %v564_v2 = vpop.f32.mrb[16].mxu1 }
 0x143   :  { %v640_v53 = vadd.f32 %v564_v2, %v214_v63  ;;  %v566_v24 = vpop.f32.mrb[17].mxu1 }
 0x144   :  { %v641_v34 = vadd.f32 %v566_v24, %v216_v29 }
 0x145   :  { %v644_v40 = vmul.f32 0.5, %v640_v53 }
 0x146   :  { %v645_v59 = vmul.f32 0.5, %v641_v34 }
 0x148   :  { %7723 = vtanh.f32 %v645_v59 }
 0x149   :  { %7725 = vtanh.f32 %v644_v40 }
 0x152   :  { %v7724_v59 = vpop.eup %7723 }
 0x153   :  { %v7726_v53 = vpop.eup %7725  ;;  %v651_v29 = vmul.f32 0.5, %v7724_v59 }
 0x154   :  { %v650_v40 = vmul.f32 0.5, %v7726_v53 }
 0x155   :  { %v654_v45 = vadd.f32 0.5, %v651_v29 }
 0x156   :  { %v653_v17 = vadd.f32 0.5, %v650_v40 }
 0x157   :  { %v657_v7 = vmul.f32 0.0, %v654_v45 }
 0x162   :  { %v635_v4 = vpop.f32.mrb[0].mxu1 }
 0x163   :  { %v637_v63 = vpop.f32.mrb[1].mxu1  ;;  %v7635_v34 = vadd.f32 %v635_v4, %v8528_v50 }
 0x164   :  { %v7636_v24 = vadd.f32 %v637_v63, %v8524_v0 }
 0x165   :  { %v646_v2 = vmul.f32 0.5, %v7635_v34  ;;  %v10358_v34 = vld [vmem:[#allocation67_spill] sm:$0xff] }
 0x166   :  { %7727 = vtanh.f32 %v7636_v24 }
 0x167   :  { %7729 = vtanh.f32 %v646_v2  ;;  %v10359_v2 = vld [vmem:[#allocation68_spill] sm:$0xff] }
 0x170   :  { %v7728_v27 = vpop.eup %7727 }
 0x171   :  { %v658_v43 = vmul.f32 %v7728_v27, %v653_v17  ;;  %v7730_v11 = vpop.eup %7729 }
 0x172   :  { %v652_v63 = vmul.f32 0.5, %v7730_v11 }
 0x173   :  { %v8532_v58 = vadd.f32 %v658_v43, %v657_v7 }
 0x174   :  { %v655_v0 = vadd.f32 0.5, %v652_v63 }
 0x175   :  { %7731 = vtanh.f32 %v8532_v58 }
 0x17f   :  { %v7732_v4 = vpop.eup %7731 }
 0x180   :  { %v661_v50 = vmul.f32 %v7732_v4, %v655_v0 }
 0x182   :  { %997 = vmatmul.mubr.f32.vlgmr.msra.gmra.mrb[16].mxu0 %v661_v50  ;;  %1068 = vmatmul.mubr.f32.vlgmr.msra.gmra.mrb[18].mxu1 %v661_v50 }
 0x183   :  { %6244 = vmatpush1.bf16.msra.mxu0 %v8149_v10  ;;  %6276 = vmatpush1.bf16.msra.mxu1 %v8249_v5  ;;  %v10330_v10 = vld [vmem:[#allocation17_spill] sm:$0xff]  ;;  %v10345_v5 = vld [vmem:[#allocation32_spill] sm:$0xff] }
 0x184   :  { %6246 = vmatprep.subr.bf16.mxu0 %v8156_v15  ;;  %6278 = vmatprep.subr.bf16.mxu1 %v8252_v6  ;;  %v10331_v15 = vld [vmem:[#allocation18_spill] sm:$0xff]  ;;  %v10346_v6 = vld [vmem:[#allocation33_spill] sm:$0xff] }
 0x185   :  { %1232 = vmatprep.mubr.f32.mxu0 %v10296_v12  ;;  %1303 = vmatprep.mubr.f32.mxu1 %v10296_v12 }
 0x187   :  { %6248 = vmatpush1.bf16.msra.mxu0 %v8159_v18  ;;  %6280 = vmatpush1.bf16.msra.mxu1 %v8258_v13  ;;  %v10332_v18 = vld [vmem:[#allocation19_spill] sm:$0xff]  ;;  %v10347_v13 = vld [vmem:[#allocation34_spill] sm:$0xff] }
 0x188   :  { %6250 = vmatprep.subr.bf16.mxu0 %v8162_v19  ;;  %6282 = vmatprep.subr.bf16.mxu1 %v8262_v14  ;;  %v10333_v19 = vld [vmem:[#allocation20_spill] sm:$0xff]  ;;  %v10348_v14 = vld [vmem:[#allocation35_spill] sm:$0xff] }
 0x18b   :  { %6252 = vmatpush1.bf16.msra.mxu0 %v8170_v25  ;;  %6284 = vmatpush1.bf16.msra.mxu1 %v8267_v22  ;;  %v10334_v25 = vld [vmem:[#allocation21_spill] sm:$0xff]  ;;  %v10349_v22 = vld [vmem:[#allocation36_spill] sm:$0xff] }
 0x18c   :  { %6254 = vmatprep.subr.bf16.mxu0 %v8173_v26  ;;  %6286 = vmatprep.subr.bf16.mxu1 %v8270_v23  ;;  %v10335_v26 = vld [vmem:[#allocation22_spill] sm:$0xff]  ;;  %v405_v23 = vld [vmem:[%s10032_s6] sm:$0xf] }
 0x18f   :  { %6256 = vmatpush1.bf16.msra.mxu0 %v8184_v33  ;;  %6288 = vmatpush1.bf16.msra.mxu1 %v8275_v30  ;;  %v10336_v33 = vld [vmem:[#allocation23_spill] sm:$0xff]  ;;  %v10350_v30 = vsub.s32 0, %v8503_v51 }
 0x190   :  { %6258 = vmatprep.subr.bf16.mxu0 %v8190_v35  ;;  %6290 = vmatprep.subr.bf16.mxu1 %v8278_v31  ;;  %v10337_v35 = vld [vmem:[#allocation24_spill] sm:$0xff] }
 0x191   :  { %v8608_v31 = vrot.slane %v405_v23, %v10350_v30  ;;  %v10373_v30 = vld [vmem:[#allocation47_spill] sm:$0xff] }
 0x193   :  { %6260 = vmatpush1.bf16.msra.mxu0 %v8200_v41  ;;  %6292 = vmatpush1.bf16.msra.mxu1 %v8281_v38  ;;  %v10338_v41 = vld [vmem:[#allocation25_spill] sm:$0xff]  ;;  %10351 = vst [vmem:[#allocation17_spill] sm:$0xff] %v8608_v31  ;;  %v10352_v38 = vsub.s32 1, %v8503_v51 }
 0x194   :  { %6262 = vmatprep.subr.bf16.mxu0 %v8203_v42  ;;  %6294 = vmatprep.subr.bf16.mxu1 %v8284_v39  ;;  %v10339_v42 = vld [vmem:[#allocation26_spill] sm:$0xff] }
 0x195   :  { %v8612_v39 = vrot.slane %v405_v23, %v10352_v38  ;;  %v10374_v38 = vld [vmem:[#allocation48_spill] sm:$0xff] }
 0x197   :  { %6264 = vmatpush1.bf16.msra.mxu0 %v8213_v48  ;;  %6296 = vmatpush1.bf16.msra.mxu1 %v8287_v46  ;;  %v10340_v48 = vld [vmem:[#allocation27_spill] sm:$0xff]  ;;  %10353 = vst [vmem:[#allocation18_spill] sm:$0xff] %v8612_v39 }
 0x198   :  { %6266 = vmatprep.subr.bf16.mxu0 %v8216_v49  ;;  %6298 = vmatprep.subr.bf16.mxu1 %v8290_v47  ;;  %v10341_v49 = vld [vmem:[#allocation28_spill] sm:$0xff] }
 0x19b   :  { %6268 = vmatpush1.bf16.msra.mxu0 %v8226_v55  ;;  %6300 = vmatpush1.bf16.msra.mxu1 %v8293_v54  ;;  %v10342_v55 = vld [vmem:[#allocation29_spill] sm:$0xff] }
 0x19c   :  { %6270 = vmatprep.subr.bf16.mxu0 %v8229_v56  ;;  %6302 = vmatprep.subr.bf16.mxu1 %v8296_v57  ;;  %v10343_v56 = vld [vmem:[#allocation30_spill] sm:$0xff] }
 0x19f   :  { %6272 = vmatpush1.bf16.msra.mxu0 %v8239_v62  ;;  %6304 = vmatpush1.bf16.msra.mxu1 %v8299_v60  ;;  %v10344_v62 = vld [vmem:[#allocation31_spill] sm:$0xff]  ;;  %v10354_v60 = vsub.s32 3, %v8503_v51 }
 0x1a0   :  { %6306 = vmatprep.subr.bf16.mxu0 %v8305_v3  ;;  %6338 = vmatprep.subr.bf16.mxu1 %v8307_v8 }
 0x1a1   :  { %v8617_v3 = vrot.slane %v405_v23, %v10354_v60 }
 0x1a2   :  { %1233 = vmatmul.mubr.f32.vlgmr.msra.gmra.mrb[2].mxu0 %v661_v50  ;;  %1304 = vmatmul.mubr.f32.vlgmr.msra.gmra.mrb[2].mxu1 %v661_v50 }
 0x1a3   :  { %6308 = vmatpush1.bf16.msra.mxu0 %v8311_v16  ;;  %6340 = vmatpush1.bf16.msra.mxu1 %v8313_v20  ;;  %10355 = vst [vmem:[#allocation19_spill] sm:$0xff] %v8617_v3 }
 0x1a4   :  { %6310 = vmatprep.subr.bf16.mxu0 %v8317_v28  ;;  %6342 = vmatprep.subr.bf16.mxu1 %v8319_v36 }
 0x1a5   :  { %1524 = vmatprep.mubr.f32.mxu0 %v10296_v12  ;;  %1595 = vmatprep.mubr.f32.mxu1 %v10296_v12 }
 0x1a7   :  { %6312 = vmatpush1.bf16.msra.mxu0 %v8321_v37  ;;  %6344 = vmatpush1.bf16.msra.mxu1 %v8324_v44  ;;  %v10356_v37 = vsub.s32 2, %v8503_v51 }
 0x1a8   :  { %6314 = vmatprep.subr.bf16.mxu0 %v8329_v52  ;;  %6346 = vmatprep.subr.bf16.mxu1 %v8331_v61 }
 0x1a9   :  { %v8623_v44 = vrot.slane %v405_v23, %v10356_v37 }
 0x1ab   :  { %6316 = vmatpush1.bf16.msra.mxu0 %v8333_v1  ;;  %6348 = vmatpush1.bf16.msra.mxu1 %v8336_v9  ;;  %10357 = vst [vmem:[#allocation20_spill] sm:$0xff] %v8623_v44 }
 0x1ac   :  { %6318 = vmatprep.subr.bf16.mxu0 %v8341_v21  ;;  %6350 = vmatprep.subr.bf16.mxu1 %v8343_v32 }
 0x1af   :  { %6320 = vmatpush1.bf16.msra.mxu0 %v10330_v10  ;;  %6352 = vmatpush1.bf16.msra.mxu1 %v10331_v15 }
 0x1b0   :  { %6322 = vmatprep.subr.bf16.mxu0 %v10332_v18  ;;  %6354 = vmatprep.subr.bf16.mxu1 %v10333_v19  ;;  %v10360_v18 = vld [vmem:[#allocation69_spill] sm:$0xff] }
 0x1b3   :  { %6324 = vmatpush1.bf16.msra.mxu0 %v10334_v25  ;;  %6356 = vmatpush1.bf16.msra.mxu1 %v10335_v26  ;;  %v10362_v26 = vld [vmem:[#allocation37_spill] sm:$0xff] }
 0x1b4   :  { %6326 = vmatprep.subr.bf16.mxu0 %v10336_v33  ;;  %6358 = vmatprep.subr.bf16.mxu1 %v10337_v35  ;;  %v10363_v33 = vld [vmem:[#allocation38_spill] sm:$0xff]  ;;  %v10364_v35 = vld [vmem:[#allocation39_spill] sm:$0xff] }
 0x1b7   :  { %6328 = vmatpush1.bf16.msra.mxu0 %v10338_v41  ;;  %6360 = vmatpush1.bf16.msra.mxu1 %v10339_v42  ;;  %v10365_v41 = vld [vmem:[#allocation40_spill] sm:$0xff]  ;;  %v10366_v42 = vld [vmem:[#allocation70_spill] sm:$0xff] }
 0x1b8   :  { %6330 = vmatprep.subr.bf16.mxu0 %v10340_v48  ;;  %6362 = vmatprep.subr.bf16.mxu1 %v10341_v49  ;;  %v10367_v49 = vld [vmem:[#allocation41_spill] sm:$0xff] }
 0x1bb   :  { %6332 = vmatpush1.bf16.msra.mxu0 %v10342_v55  ;;  %6364 = vmatpush1.bf16.msra.mxu1 %v10343_v56  ;;  %v10368_v55 = vld [vmem:[#allocation42_spill] sm:$0xff]  ;;  %v10369_v56 = vld [vmem:[#allocation43_spill] sm:$0xff] }
 0x1bc   :  { %6334 = vmatprep.subr.bf16.mxu0 %v10344_v62  ;;  %6366 = vmatprep.subr.bf16.mxu1 %v10345_v5  ;;  %v10370_v62 = vld [vmem:[#allocation44_spill] sm:$0xff] }
 0x1bf   :  { %6336 = vmatpush1.bf16.msra.mxu0 %v10346_v6  ;;  %6368 = vmatpush1.bf16.msra.mxu1 %v10347_v13 }
 0x1c0   :  { %6370 = vmatprep.subr.bf16.mxu0 %v10348_v14  ;;  %6402 = vmatprep.subr.bf16.mxu1 %v10349_v22  ;;  %v10371_v14 = vld [vmem:[#allocation45_spill] sm:$0xff]  ;;  %v10372_v22 = vld [vmem:[#allocation46_spill] sm:$0xff] }
 0x255   :  { %v998_v46 = vpop.f32.mrb[16].mxu0  ;;  %v1069_v47 = vpop.f32.mrb[18].mxu1 }
 0x256   :  { %v1074_v54 = vadd.f32 %v998_v46, %v8608_v31  ;;  %v1000_v57 = vpop.f32.mrb[17].mxu0  ;;  %v1071_v8 = vpop.f32.mrb[19].mxu1  ;;  %v1076_v52 = vadd.f32 %v1069_v47, %v8623_v44 }
 0x257   :  { %v1075_v16 = vadd.f32 %v1000_v57, %v8612_v39  ;;  %v1077_v36 = vadd.f32 %v1071_v8, %v8617_v3  ;;  %v10375_v8 = vld [vmem:[#allocation49_spill] sm:$0xff] }
 0x258   :  { %v1078_v20 = vmul.f32 0.5, %v1074_v54  ;;  %v1080_v61 = vmul.f32 0.5, %v1076_v52  ;;  %v10379_v52 = vld [vmem:[#allocation53_spill] sm:$0xff] }
 0x259   :  { %v1079_v28 = vmul.f32 0.5, %v1075_v16  ;;  %v10376_v16 = vld [vmem:[#allocation50_spill] sm:$0xff] }
 0x25a   :  { %7733 = vtanh.f32 %v1078_v20  ;;  %v10377_v20 = vld [vmem:[#allocation51_spill] sm:$0xff] }
 0x25b   :  { %7735 = vtanh.f32 %v1079_v28  ;;  %v10378_v28 = vld [vmem:[#allocation52_spill] sm:$0xff] }
 0x25c   :  { %7737 = vtanh.f32 %v1077_v36 }
 0x25d   :  { %7739 = vtanh.f32 %v1080_v61  ;;  %v10380_v61 = vld [vmem:[#allocation54_spill] sm:$0xff] }
 0x264   :  { %v7734_v1 = vpop.eup %7733 }
 0x265   :  { %v1084_v9 = vmul.f32 0.5, %v7734_v1  ;;  %v7736_v21 = vpop.eup %7735  ;;  %v10381_v1 = vld [vmem:[#allocation55_spill] sm:$0xff] }
 0x266   :  { %v1085_v27 = vmul.f32 0.5, %v7736_v21  ;;  %v7738_v45 = vpop.eup %7737 }
 0x267   :  { %v1087_v32 = vadd.f32 0.5, %v1084_v9  ;;  %v7740_v51 = vpop.eup %7739  ;;  %v10382_v9 = vld [vmem:[#allocation56_spill] sm:$0xff] }
 0x268   :  { %v1088_v17 = vadd.f32 0.5, %v1085_v27  ;;  %v1086_v7 = vmul.f32 0.5, %v7740_v51  ;;  %v10384_v27 = vld [vmem:[#allocation58_spill] sm:$0xff]  ;;  %v1782_v51 = vld [vmem:[#allocation4 + $0x38] sm:$0xff] }
 0x269   :  { %v1092_v11 = vmul.f32 %v7738_v45, %v1087_v32  ;;  %v10383_v32 = vld [vmem:[#allocation57_spill] sm:$0xff]  ;;  %v10385_v45 = vld [vmem:[#allocation59_spill] sm:$0xff] }
 0x26a   :  { %v1091_v0 = vmul.f32 0.0, %v1088_v17  ;;  %v1089_v63 = vadd.f32 0.5, %v1086_v7  ;;  %v1776_v17 = vld [vmem:[#allocation4 + $0x8] sm:$0xff] }
 0x26c   :  { %v8626_v43 = vadd.f32 %v1092_v11, %v1091_v0  ;;  %v1780_v11 = vld [vmem:[#allocation4 + $0x28] sm:$0xff]  ;;  %v1778_v0 = vld [vmem:[#allocation4 + $0x18] sm:$0xff] }
 0x26e   :  { %7741 = vtanh.f32 %v8626_v43 }
 0x275   :  { %v1234_v50 = vpop.f32.mrb[2].mxu0  ;;  %v1305_v24 = vpop.f32.mrb[2].mxu1 }
 0x276   :  { %v7621_v59 = vadd.f32 %v1234_v50, %v10358_v34  ;;  %v1236_v53 = vpop.f32.mrb[3].mxu0  ;;  %v1307_v29 = vpop.f32.mrb[3].mxu1  ;;  %v7637_v48 = vadd.f32 %v1305_v24, %v10366_v42  ;;  %v10387_v50 = vld [vmem:[#allocation61_spill] sm:$0xff]  ;;  %v10388_v24 = vld [vmem:[#allocation62_spill] sm:$0xff] }
 0x277   :  { %v7622_v40 = vadd.f32 %v1236_v53, %v10359_v2  ;;  %v7638_v19 = vadd.f32 %v1307_v29, %v10360_v18  ;;  %v1779_v53 = vld [vmem:[#allocation4 + $0x20] sm:$0xff]  ;;  %v10389_v29 = vld [vmem:[#allocation63_spill] sm:$0xff] }
 0x278   :  { %v1314_v4 = vmul.f32 0.5, %v7621_v59  ;;  %v7742_v10 = vpop.eup %7741  ;;  %v1316_v5 = vmul.f32 0.5, %v7637_v48  ;;  %v1775_v59 = vld [vmem:[#allocation4] sm:$0xff] }
 0x279   :  { %v1315_v15 = vmul.f32 0.5, %v7622_v40  ;;  %v8632_v25 = vmul.f32 %v7742_v10, %v1089_v63  ;;  %v10390_v40 = vld [vmem:[#allocation64_spill] sm:$0xff]  ;;  %v8671_v63 = vpack.c.bf16 %v1780_v11, %v1776_v17  ;;  %v1777_v10 = vld [vmem:[#allocation4 + $0x10] sm:$0xff] }
 0x27a   :  { %7743 = vtanh.f32 %v1314_v4  ;;  %v8673_v4 = vpack.c.bf16 %v1782_v51, %v1778_v0  ;;  %v1801_v0 = vld [vmem:[#allocation4 + $0xd0] sm:$0xff] }
 0x27b   :  { %10361 = vst [vmem:[#allocation21_spill] sm:$0xff] %v8632_v25  ;;  %7745 = vtanh.f32 %v1315_v15  ;;  %1525 = vmatmul.mubr.f32.vlgmr.msra.gmra.mrb[18].mxu0 %v8632_v25  ;;  %1596 = vmatmul.mubr.f32.vlgmr.msra.gmra.mrb[20].mxu1 %v8632_v25  ;;  %v1781_v15 = vld [vmem:[#allocation4 + $0x30] sm:$0xff]  ;;  %v2092_v25 = vld [vmem:[#allocation9 + $0xc8] sm:$0xff] }
 0x27c   :  { %6372 = vmatpush1.bf16.msra.mxu0 %v10362_v26  ;;  %6404 = vmatpush1.bf16.msra.mxu1 %v10363_v33  ;;  %7747 = vtanh.f32 %v7638_v19  ;;  %v1784_v19 = vld [vmem:[#allocation4 + $0x48] sm:$0xff]  ;;  %v1786_v33 = vld [vmem:[#allocation4 + $0x58] sm:$0xff]  ;;  %v1805_v51 = vld [vmem:[#allocation4 + $0xf0] sm:$0xff] }
 0x27d   :  { %6374 = vmatprep.subr.bf16.mxu0 %v10364_v35  ;;  %6406 = vmatprep.subr.bf16.mxu1 %v10365_v41  ;;  %7749 = vtanh.f32 %v1316_v5  ;;  %v1788_v26 = vld [vmem:[#allocation4 + $0x68] sm:$0xff]  ;;  %v1790_v35 = vld [vmem:[#allocation4 + $0x78] sm:$0xff]  ;;  %v1783_v5 = vld [vmem:[#allocation4 + $0x40] sm:$0xff] }
 0x27e   :  { %1666 = vmatprep.mubr.f32.mxu0 %v10296_v12  ;;  %1737 = vmatprep.mubr.f32.mxu1 %v10296_v12 }
 0x280   :  { %6376 = vmatpush1.bf16.msra.mxu0 %v10367_v49  ;;  %6408 = vmatpush1.bf16.msra.mxu1 %v10368_v55  ;;  %v10391_v49 = vld [vmem:[#allocation65_spill] sm:$0xff]  ;;  %v10392_v55 = vld [vmem:[#allocation66_spill] sm:$0xff] }
 0x281   :  { %6378 = vmatprep.subr.bf16.mxu0 %v10369_v56  ;;  %6410 = vmatprep.subr.bf16.mxu1 %v10370_v62  ;;  %v8677_v56 = vpack.c.bf16 %v1779_v53, %v1775_v59  ;;  %v8679_v62 = vpack.c.bf16 %v1781_v15, %v1777_v10  ;;  %v1814_v59 = vld [vmem:[#allocation4 + $0x138] sm:$0xff]  ;;  %v1811_v10 = vld [vmem:[#allocation4 + $0x120] sm:$0xff] }
 0x284   :  { %v7744_v6 = vpop.eup %7743  ;;  %6380 = vmatpush1.bf16.msra.mxu0 %v10371_v14  ;;  %6412 = vmatpush1.bf16.msra.mxu1 %v10372_v22  ;;  %v8685_v14 = vpack.c.bf16 %v1788_v26, %v1784_v19  ;;  %v8687_v22 = vpack.c.bf16 %v1790_v35, %v1786_v33  ;;  %v1809_v26 = vld [vmem:[#allocation4 + $0x110] sm:$0xff]  ;;  %v1816_v35 = vld [vmem:[#allocation4 + $0x148] sm:$0xff] }
 0x285   :  { %v1320_v13 = vmul.f32 0.5, %v7744_v6  ;;  %v7746_v23 = vpop.eup %7745  ;;  %6382 = vmatprep.subr.bf16.mxu0 %v10373_v30  ;;  %6414 = vmatprep.subr.bf16.mxu1 %v10374_v38  ;;  %v1787_v6 = vld [vmem:[#allocation4 + $0x60] sm:$0xff]  ;;  %v1789_v30 = vld [vmem:[#allocation4 + $0x70] sm:$0xff]  ;;  %v1792_v38 = vld [vmem:[#allocation4 + $0x88] sm:$0xff] }
 0x286   :  { %v1321_v47 = vmul.f32 0.5, %v7746_v23  ;;  %v7748_v54 = vpop.eup %7747  ;;  %v1785_v23 = vld [vmem:[#allocation4 + $0x50] sm:$0xff] }
 0x287   :  { %v1323_v46 = vadd.f32 0.5, %v1320_v13  ;;  %v7750_v21 = vpop.eup %7749  ;;  %v1813_v33 = vld [vmem:[#allocation4 + $0x130] sm:$0xff] }
 0x288   :  { %v1324_v57 = vadd.f32 0.5, %v1321_v47  ;;  %6384 = vmatpush1.bf16.msra.mxu0 %v10375_v8  ;;  %6416 = vmatpush1.bf16.msra.mxu1 %v10376_v16  ;;  %v1322_v7 = vmul.f32 0.5, %v7750_v21  ;;  %v1794_v47 = vld [vmem:[#allocation4 + $0x98] sm:$0xff]  ;;  %v1791_v8 = vld [vmem:[#allocation4 + $0x80] sm:$0xff] }
 0x289   :  { %v1328_v60 = vmul.f32 %v7748_v54, %v1323_v46  ;;  %6386 = vmatprep.subr.bf16.mxu0 %v10377_v20  ;;  %6418 = vmatprep.subr.bf16.mxu1 %v10378_v28  ;;  %v1796_v46 = vld [vmem:[#allocation4 + $0xa8] sm:$0xff]  ;;  %v1798_v54 = vld [vmem:[#allocation4 + $0xb8] sm:$0xff]  ;;  %v1795_v16 = vld [vmem:[#allocation4 + $0xa0] sm:$0xff] }
 0x28a   :  { %v1327_v36 = vmul.f32 %v1324_v57, %v8532_v58  ;;  %v10386_v58 = vld [vmem:[#allocation60_spill] sm:$0xff]  ;;  %v1325_v41 = vadd.f32 0.5, %v1322_v7  ;;  %v8693_v57 = vpack.c.bf16 %v1787_v6, %v1783_v5  ;;  %v8699_v20 = vpack.c.bf16 %v1796_v46, %v1792_v38  ;;  %v1808_v7 = vld [vmem:[#allocation4 + $0x108] sm:$0xff]  ;;  %v1815_v6 = vld [vmem:[#allocation4 + $0x140] sm:$0xff] }
 0x28b   :  { %v8701_v28 = vpack.c.bf16 %v1798_v54, %v1794_v47  ;;  %v1806_v21 = vld [vmem:[#allocation4 + $0xf8] sm:$0xff]  ;;  %v8733_v5 = vpack.c.bf16 %v1813_v33, %v1809_v26  ;;  %v1817_v46 = vld [vmem:[#allocation4 + $0x150] sm:$0xff]  ;;  %v1824_v54 = vld [vmem:[#allocation4 + $0x188] sm:$0xff] }
 0x28c   :  { %v8656_v37 = vadd.f32 %v1328_v60, %v1327_v36  ;;  %6388 = vmatpush1.bf16.msra.mxu0 %v10379_v52  ;;  %6420 = vmatpush1.bf16.msra.mxu1 %v10380_v61  ;;  %v8695_v60 = vpack.c.bf16 %v1789_v30, %v1785_v23  ;;  %v1793_v36 = vld [vmem:[#allocation4 + $0x90] sm:$0xff]  ;;  %v1800_v61 = vld [vmem:[#allocation4 + $0xc8] sm:$0xff]  ;;  %v1819_v23 = vld [vmem:[#allocation4 + $0x160] sm:$0xff] }
 0x28d   :  { %6390 = vmatprep.subr.bf16.mxu0 %v10381_v1  ;;  %6422 = vmatprep.subr.bf16.mxu1 %v10382_v9  ;;  %v1797_v52 = vld [vmem:[#allocation4 + $0xb0] sm:$0xff]  ;;  %v1804_v1 = vld [vmem:[#allocation4 + $0xe8] sm:$0xff]  ;;  %v1802_v9 = vld [vmem:[#allocation4 + $0xd8] sm:$0xff] }
 0x28e   :  { %7751 = vtanh.f32 %v8656_v37  ;;  %v8713_v17 = vpack.c.bf16 %v1804_v1, %v1800_v61  ;;  %v8715_v11 = vpack.c.bf16 %v1806_v21, %v1802_v9  ;;  %v1821_v47 = vld [vmem:[#allocation4 + $0x170] sm:$0xff]  ;;  %v1823_v1 = vld [vmem:[#allocation4 + $0x180] sm:$0xff] }
 0x28f   :  { %v8745_v61 = vpack.c.bf16 %v1821_v47, %v1817_v46  ;;  %v1827_v9 = vld [vmem:[#allocation4 + $0x1a0] sm:$0xff]  ;;  %v2072_v46 = vld [vmem:[#allocation9 + $0x28] sm:$0xff]  ;;  %v2070_v47 = vld [vmem:[#allocation9 + $0x18] sm:$0xff] }
 0x290   :  { %6392 = vmatpush1.bf16.msra.mxu0 %v10383_v32  ;;  %6424 = vmatpush1.bf16.msra.mxu1 %v10384_v27  ;;  %v8707_v32 = vpack.c.bf16 %v1795_v16, %v1791_v8  ;;  %v8709_v27 = vpack.c.bf16 %v1797_v52, %v1793_v36  ;;  %v1828_v8 = vld [vmem:[#allocation4 + $0x1a8] sm:$0xff]  ;;  %v1826_v16 = vld [vmem:[#allocation4 + $0x198] sm:$0xff]  ;;  %v8743_v52 = vpack.c.bf16 %v1819_v23, %v1815_v6 }
 0x291   :  { %6394 = vmatprep.subr.bf16.mxu0 %v10385_v45  ;;  %6426 = vmatprep.subr.bf16.mxu1 %v10386_v58  ;;  %v1799_v45 = vld [vmem:[#allocation4 + $0xc0] sm:$0xff]  ;;  %v1830_v36 = vld [vmem:[#allocation4 + $0x1b8] sm:$0xff]  ;;  %v8749_v21 = vpack.c.bf16 %v1828_v8, %v1824_v54  ;;  %v2068_v23 = vld [vmem:[#allocation9 + $0x8] sm:$0xff] }
 0x292   :  { %v1803_v58 = vld [vmem:[#allocation4 + $0xe0] sm:$0xff]  ;;  %v8779_v54 = vpack.c.bf16 %v2072_v46, %v2068_v23  ;;  %v2074_v8 = vld [vmem:[#allocation9 + $0x38] sm:$0xff]  ;;  %v2077_v46 = vld [vmem:[#allocation9 + $0x50] sm:$0xff] }
 0x293   :  { %v8719_v53 = vpack.c.bf16 %v1803_v58, %v1799_v45  ;;  %v8751_v45 = vpack.c.bf16 %v1830_v36, %v1826_v16  ;;  %v1825_v58 = vld [vmem:[#allocation4 + $0x190] sm:$0xff]  ;;  %v2067_v16 = vld [vmem:[#allocation9] sm:$0xff] }
 0x294   :  { %6396 = vmatpush1.bf16.msra.mxu0 %v10387_v50  ;;  %6428 = vmatpush1.bf16.msra.mxu1 %v10388_v24  ;;  %v1812_v50 = vld [vmem:[#allocation4 + $0x128] sm:$0xff]  ;;  %v1810_v24 = vld [vmem:[#allocation4 + $0x118] sm:$0xff]  ;;  %v2071_v36 = vld [vmem:[#allocation9 + $0x20] sm:$0xff] }
 0x295   :  { %6398 = vmatprep.subr.bf16.mxu0 %v10389_v29  ;;  %6430 = vmatprep.subr.bf16.mxu1 %v10390_v40  ;;  %v8721_v29 = vpack.c.bf16 %v1805_v51, %v1801_v0  ;;  %v1807_v40 = vld [vmem:[#allocation4 + $0x100] sm:$0xff]  ;;  %v8725_v15 = vpack.c.bf16 %v1812_v50, %v1808_v7  ;;  %v8727_v19 = vpack.c.bf16 %v1814_v59, %v1810_v24  ;;  %v1829_v0 = vld [vmem:[#allocation4 + $0x1b0] sm:$0xff]  ;;  %v1832_v51 = vld [vmem:[#allocation4 + $0x1c8] sm:$0xff] }
 0x296   :  { %v1836_v7 = vld [vmem:[#allocation4 + $0x1e8] sm:$0xff]  ;;  %v1834_v50 = vld [vmem:[#allocation4 + $0x1d8] sm:$0xff]  ;;  %v8755_v59 = vpack.c.bf16 %v1827_v9, %v1823_v1  ;;  %v8781_v1 = vpack.c.bf16 %v2074_v8, %v2070_v47  ;;  %v8783_v9 = vpack.c.bf16 %v2071_v36, %v2067_v16  ;;  %v2081_v47 = vld [vmem:[#allocation9 + $0x70] sm:$0xff] }
 0x297   :  { %v1838_v24 = vld [vmem:[#allocation4 + $0x1f8] sm:$0xff]  ;;  %v8761_v26 = vpack.c.bf16 %v1836_v7, %v1832_v51  ;;  %v2076_v51 = vld [vmem:[#allocation9 + $0x48] sm:$0xff]  ;;  %v8798_v8 = vpack.c.bf16 %v2081_v47, %v2077_v46  ;;  %v2089_v46 = vld [vmem:[#allocation9 + $0xb0] sm:$0xff] }
 0x298   :  { %v7752_v48 = vpop.eup %7751  ;;  %6400 = vmatpush1.bf16.msra.mxu0 %v10391_v49  ;;  %6432 = vmatpush1.bf16.msra.mxu1 %v10392_v55  ;;  %v1822_v49 = vld [vmem:[#allocation4 + $0x178] sm:$0xff]  ;;  %v8731_v55 = vpack.c.bf16 %v1811_v10, %v1807_v40  ;;  %v8757_v40 = vpack.c.bf16 %v1829_v0, %v1825_v58  ;;  %v1831_v10 = vld [vmem:[#allocation4 + $0x1c0] sm:$0xff]  ;;  %v8763_v33 = vpack.c.bf16 %v1838_v24, %v1834_v50  ;;  %v2069_v58 = vld [vmem:[#allocation9 + $0x10] sm:$0xff] }
 0x299   :  { %v8681_v13 = vmul.f32 %v7752_v48, %v1325_v41  ;;  %6434 = vmatprep.subr.bf16.mxu0 %v8671_v63  ;;  %6466 = vmatprep.subr.bf16.mxu1 %v8673_v4  ;;  %v1820_v41 = vld [vmem:[#allocation4 + $0x168] sm:$0xff]  ;;  %v1818_v48 = vld [vmem:[#allocation4 + $0x158] sm:$0xff]  ;;  %10393 = vst [vmem:[#allocation22_spill] sm:$0xff] %v8781_v1  ;;  %10394 = vst [vmem:[#allocation23_spill] sm:$0xff] %v8783_v9 }
 0x29a   :  { %v8737_v30 = vpack.c.bf16 %v1820_v41, %v1816_v35  ;;  %v8739_v38 = vpack.c.bf16 %v1822_v49, %v1818_v48  ;;  %v1835_v35 = vld [vmem:[#allocation4 + $0x1e0] sm:$0xff]  ;;  %v1833_v41 = vld [vmem:[#allocation4 + $0x1d0] sm:$0xff]  ;;  %v2080_v7 = vld [vmem:[#allocation9 + $0x68] sm:$0xff]  ;;  %10399 = vst [vmem:[#allocation28_spill] sm:$0xff] %v8798_v8 }
 0x29b   :  { %1667 = vmatmul.mubr.f32.vlgmr.msra.gmra.mrb[18].mxu0 %v8681_v13  ;;  %1738 = vmatmul.mubr.f32.vlgmr.msra.gmra.mrb[20].mxu1 %v8681_v13  ;;  %v1837_v48 = vld [vmem:[#allocation4 + $0x1f0] sm:$0xff]  ;;  %v8767_v49 = vpack.c.bf16 %v1835_v35, %v1831_v10  ;;  %v2078_v50 = vld [vmem:[#allocation9 + $0x58] sm:$0xff]  ;;  %v8791_v24 = vpack.c.bf16 %v2080_v7, %v2076_v51  ;;  %v2075_v35 = vld [vmem:[#allocation9 + $0x40] sm:$0xff] }
 0x29c   :  { %6436 = vmatpush1.bf16.msra.mxu0 %v8677_v56  ;;  %6468 = vmatpush1.bf16.msra.mxu1 %v8679_v62  ;;  %v8769_v6 = vpack.c.bf16 %v1837_v48, %v1833_v41  ;;  %v2073_v0 = vld [vmem:[#allocation9 + $0x30] sm:$0xff]  ;;  %v2082_v10 = vld [vmem:[#allocation9 + $0x78] sm:$0xff]  ;;  %v2079_v41 = vld [vmem:[#allocation9 + $0x60] sm:$0xff] }
 0x29d   :  { %6438 = vmatprep.subr.bf16.mxu0 %v8685_v14  ;;  %6470 = vmatprep.subr.bf16.mxu1 %v8687_v22  ;;  %10396 = vst [vmem:[#allocation25_spill] sm:$0xff] %v8791_v24  ;;  %v8793_v48 = vpack.c.bf16 %v2082_v10, %v2078_v50  ;;  %v8795_v23 = vpack.c.bf16 %v2079_v41, %v2075_v35  ;;  %v2084_v16 = vld [vmem:[#allocation9 + $0x88] sm:$0xff]  ;;  %v2090_v51 = vld [vmem:[#allocation9 + $0xb8] sm:$0xff]  ;;  %v2083_v7 = vld [vmem:[#allocation9 + $0x80] sm:$0xff] }
 0x29e   :  { %1903 = vmatprep.mubr.f32.mxu0 %v10296_v12  ;;  %1974 = vmatprep.mubr.f32.mxu1 %v10296_v12  ;;  %v2088_v36 = vld [vmem:[#allocation9 + $0xa8] sm:$0xff]  ;;  %v2087_v50 = vld [vmem:[#allocation9 + $0xa0] sm:$0xff]  ;;  %v2085_v41 = vld [vmem:[#allocation9 + $0x90] sm:$0xff] }
 0x29f   :  { %10397 = vst [vmem:[#allocation26_spill] sm:$0xff] %v8793_v48  ;;  %10398 = vst [vmem:[#allocation27_spill] sm:$0xff] %v8795_v23  ;;  %v8807_v35 = vpack.c.bf16 %v2087_v50, %v2083_v7  ;;  %v8810_v47 = vpack.c.bf16 %v2089_v46, %v2085_v41  ;;  %v2095_v7 = vld [vmem:[#allocation9 + $0xe0] sm:$0xff]  ;;  %v2093_v41 = vld [vmem:[#allocation9 + $0xd0] sm:$0xff] }
 0x2a0   :  { %6440 = vmatpush1.bf16.msra.mxu0 %v8693_v57  ;;  %6472 = vmatpush1.bf16.msra.mxu1 %v8695_v60  ;;  %v2097_v46 = vld [vmem:[#allocation9 + $0xf0] sm:$0xff] }
 0x2a1   :  { %6442 = vmatprep.subr.bf16.mxu0 %v8699_v20  ;;  %6474 = vmatprep.subr.bf16.mxu1 %v8701_v28  ;;  %10402 = vst [vmem:[#allocation31_spill] sm:$0xff] %v8807_v35  ;;  %10403 = vst [vmem:[#allocation32_spill] sm:$0xff] %v8810_v47 }
 0x2a4   :  { %6444 = vmatpush1.bf16.msra.mxu0 %v8707_v32  ;;  %6476 = vmatpush1.bf16.msra.mxu1 %v8709_v27 }
 0x2a5   :  { %6446 = vmatprep.subr.bf16.mxu0 %v8713_v17  ;;  %6478 = vmatprep.subr.bf16.mxu1 %v8715_v11 }
 0x2a8   :  { %6448 = vmatpush1.bf16.msra.mxu0 %v8719_v53  ;;  %6480 = vmatpush1.bf16.msra.mxu1 %v8721_v29 }
 0x2a9   :  { %6450 = vmatprep.subr.bf16.mxu0 %v8725_v15  ;;  %6482 = vmatprep.subr.bf16.mxu1 %v8727_v19 }
 0x2ac   :  { %6452 = vmatpush1.bf16.msra.mxu0 %v8731_v55  ;;  %6484 = vmatpush1.bf16.msra.mxu1 %v8733_v5 }
 0x2ad   :  { %6454 = vmatprep.subr.bf16.mxu0 %v8737_v30  ;;  %6486 = vmatprep.subr.bf16.mxu1 %v8739_v38 }
 0x2b0   :  { %6456 = vmatpush1.bf16.msra.mxu0 %v8743_v52  ;;  %6488 = vmatpush1.bf16.msra.mxu1 %v8745_v61 }
 0x2b1   :  { %6458 = vmatprep.subr.bf16.mxu0 %v8749_v21  ;;  %6490 = vmatprep.subr.bf16.mxu1 %v8751_v45 }
 0x2b4   :  { %6460 = vmatpush1.bf16.msra.mxu0 %v8755_v59  ;;  %6492 = vmatpush1.bf16.msra.mxu1 %v8757_v40 }
 0x2b5   :  { %6462 = vmatprep.subr.bf16.mxu0 %v8761_v26  ;;  %6494 = vmatprep.subr.bf16.mxu1 %v8763_v33 }
 0x2b8   :  { %6464 = vmatpush1.bf16.msra.mxu0 %v8767_v49  ;;  %6496 = vmatpush1.bf16.msra.mxu1 %v8769_v6 }
 0x2b9   :  { %6498 = vmatprep.subr.bf16.mxu0 %v8779_v54  ;;  %6530 = vmatprep.subr.bf16.mxu1 %v8781_v1  ;;  %v2024_v1 = vld [vmem:[#allocation7 + $0xa8] sm:$0xff] }
 0x2bb   :  { %1904 = vmatmul.mubr.f32.vlgmr.msra.gmra.mrb[4].mxu0 %v8681_v13  ;;  %1975 = vmatmul.mubr.f32.vlgmr.msra.gmra.mrb[4].mxu1 %v8681_v13  ;;  %v8786_v13 = vpack.c.bf16 %v2073_v0, %v2069_v58  ;;  %v2086_v58 = vld [vmem:[#allocation9 + $0x98] sm:$0xff]  ;;  %v8803_v0 = vpack.c.bf16 %v2088_v36, %v2084_v16  ;;  %v2096_v16 = vld [vmem:[#allocation9 + $0xe8] sm:$0xff] }
 0x2bc   :  { %2195 = vmatprep.mubr.f32.mxu0 %v10296_v12  ;;  %2266 = vmatprep.mubr.f32.mxu1 %v10296_v12  ;;  %v8805_v10 = vpack.c.bf16 %v2090_v51, %v2086_v58  ;;  %v2094_v36 = vld [vmem:[#allocation9 + $0xd8] sm:$0xff]  ;;  %v2091_v51 = vld [vmem:[#allocation9 + $0xc0] sm:$0xff] }
 0x2bd   :  { %10395 = vst [vmem:[#allocation24_spill] sm:$0xff] %v8786_v13  ;;  %6500 = vmatpush1.bf16.msra.mxu0 %v8783_v9  ;;  %6532 = vmatpush1.bf16.msra.mxu1 %v8786_v13  ;;  %10400 = vst [vmem:[#allocation29_spill] sm:$0xff] %v8803_v0  ;;  %v2098_v58 = vld [vmem:[#allocation9 + $0xf8] sm:$0xff] }
 0x2be   :  { %6502 = vmatprep.subr.bf16.mxu0 %v8791_v24  ;;  %6534 = vmatprep.subr.bf16.mxu1 %v8793_v48  ;;  %10401 = vst [vmem:[#allocation30_spill] sm:$0xff] %v8805_v10  ;;  %v8817_v50 = vpack.c.bf16 %v2098_v58, %v2094_v36  ;;  %v2106_v36 = vld [vmem:[#allocation9 + $0x138] sm:$0xff]  ;;  %v2099_v58 = vld [vmem:[#allocation9 + $0x100] sm:$0xff] }
 0x2bf   :  { %v2118_v48 = vld [vmem:[#allocation9 + $0x198] sm:$0xff] }
 0x2c0   :  { %10405 = vst [vmem:[#allocation34_spill] sm:$0xff] %v8817_v50 }
 0x2c1   :  { %6504 = vmatpush1.bf16.msra.mxu0 %v8795_v23  ;;  %6536 = vmatpush1.bf16.msra.mxu1 %v8798_v8  ;;  %v8815_v8 = vpack.c.bf16 %v2096_v16, %v2092_v25  ;;  %v8819_v23 = vpack.c.bf16 %v2095_v7, %v2091_v51  ;;  %v2104_v25 = vld [vmem:[#allocation9 + $0x128] sm:$0xff]  ;;  %v2102_v16 = vld [vmem:[#allocation9 + $0x118] sm:$0xff]  ;;  %v2103_v51 = vld [vmem:[#allocation9 + $0x120] sm:$0xff] }
 0x2c2   :  { %6506 = vmatprep.subr.bf16.mxu0 %v8803_v0  ;;  %6538 = vmatprep.subr.bf16.mxu1 %v8805_v10  ;;  %v8822_v10 = vpack.c.bf16 %v2097_v46, %v2093_v41  ;;  %v8829_v7 = vpack.c.bf16 %v2106_v36, %v2102_v16  ;;  %v8831_v0 = vpack.c.bf16 %v2103_v51, %v2099_v58  ;;  %v2101_v41 = vld [vmem:[#allocation9 + $0x110] sm:$0xff]  ;;  %v2114_v16 = vld [vmem:[#allocation9 + $0x178] sm:$0xff]  ;;  %v2107_v36 = vld [vmem:[#allocation9 + $0x140] sm:$0xff] }
 0x2c3   :  { %10404 = vst [vmem:[#allocation33_spill] sm:$0xff] %v8815_v8  ;;  %10406 = vst [vmem:[#allocation35_spill] sm:$0xff] %v8819_v23  ;;  %v2105_v46 = vld [vmem:[#allocation9 + $0x130] sm:$0xff]  ;;  %v2111_v58 = vld [vmem:[#allocation9 + $0x160] sm:$0xff] }
 0x2c4   :  { %10407 = vst [vmem:[#allocation36_spill] sm:$0xff] %v8822_v10  ;;  %10409 = vst [vmem:[#allocation37_spill] sm:$0xff] %v8829_v7 }
 0x2c5   :  { %6508 = vmatpush1.bf16.msra.mxu0 %v8807_v35  ;;  %6540 = vmatpush1.bf16.msra.mxu1 %v8810_v47  ;;  %v2100_v47 = vld [vmem:[#allocation9 + $0x108] sm:$0xff]  ;;  %10410 = vst [vmem:[#allocation38_spill] sm:$0xff] %v8831_v0 }
 0x2c6   :  { %6510 = vmatprep.subr.bf16.mxu0 %v8815_v8  ;;  %6542 = vmatprep.subr.bf16.mxu1 %v8817_v50  ;;  %v8827_v35 = vpack.c.bf16 %v2104_v25, %v2100_v47  ;;  %v8834_v50 = vpack.c.bf16 %v2105_v46, %v2101_v41  ;;  %v2112_v47 = vld [vmem:[#allocation9 + $0x168] sm:$0xff]  ;;  %v2110_v25 = vld [vmem:[#allocation9 + $0x158] sm:$0xff]  ;;  %v8843_v8 = vpack.c.bf16 %v2111_v58, %v2107_v36  ;;  %v2109_v41 = vld [vmem:[#allocation9 + $0x150] sm:$0xff] }
 0x2c7   :  { %v8841_v51 = vpack.c.bf16 %v2114_v16, %v2110_v25  ;;  %v2113_v46 = vld [vmem:[#allocation9 + $0x170] sm:$0xff]  ;;  %v2115_v25 = vld [vmem:[#allocation9 + $0x180] sm:$0xff] }
 0x2c8   :  { %10408 = vst [vmem:[#allocation69_spill] sm:$0xff] %v8827_v35  ;;  %10411 = vst [vmem:[#allocation39_spill] sm:$0xff] %v8834_v50  ;;  %v2119_v16 = vld [vmem:[#allocation9 + $0x1a0] sm:$0xff] }
 0x2c9   :  { %6512 = vmatpush1.bf16.msra.mxu0 %v8819_v23  ;;  %6544 = vmatpush1.bf16.msra.mxu1 %v8822_v10  ;;  %v2108_v10 = vld [vmem:[#allocation9 + $0x148] sm:$0xff]  ;;  %10413 = vst [vmem:[#allocation41_spill] sm:$0xff] %v8841_v51  ;;  %10414 = vst [vmem:[#allocation42_spill] sm:$0xff] %v8843_v8  ;;  %v8855_v58 = vpack.c.bf16 %v2119_v16, %v2115_v25  ;;  %v2127_v25 = vld [vmem:[#allocation9 + $0x1e0] sm:$0xff] }
 0x2ca   :  { %6514 = vmatprep.subr.bf16.mxu0 %v8827_v35  ;;  %6546 = vmatprep.subr.bf16.mxu1 %v8829_v7  ;;  %v8839_v23 = vpack.c.bf16 %v2112_v47, %v2108_v10  ;;  %v8846_v7 = vpack.c.bf16 %v2113_v46, %v2109_v41  ;;  %v2120_v35 = vld [vmem:[#allocation9 + $0x1a8] sm:$0xff]  ;;  %v2122_v47 = vld [vmem:[#allocation9 + $0x1b8] sm:$0xff]  ;;  %v2117_v41 = vld [vmem:[#allocation9 + $0x190] sm:$0xff] }
 0x2cb   :  { %v8853_v36 = vpack.c.bf16 %v2122_v47, %v2118_v48  ;;  %10418 = vst [vmem:[#allocation46_spill] sm:$0xff] %v8855_v58  ;;  %v2121_v46 = vld [vmem:[#allocation9 + $0x1b0] sm:$0xff]  ;;  %v2130_v48 = vld [vmem:[#allocation9 + $0x1f8] sm:$0xff]  ;;  %v2123_v47 = vld [vmem:[#allocation9 + $0x1c0] sm:$0xff] }
 0x2cc   :  { %10412 = vst [vmem:[#allocation40_spill] sm:$0xff] %v8839_v23  ;;  %10415 = vst [vmem:[#allocation43_spill] sm:$0xff] %v8846_v7 }
 0x2cd   :  { %6516 = vmatpush1.bf16.msra.mxu0 %v8831_v0  ;;  %6548 = vmatpush1.bf16.msra.mxu1 %v8834_v50  ;;  %v2116_v0 = vld [vmem:[#allocation9 + $0x188] sm:$0xff]  ;;  %10417 = vst [vmem:[#allocation45_spill] sm:$0xff] %v8853_v36 }
 0x2ce   :  { %6518 = vmatprep.subr.bf16.mxu0 %v8839_v23  ;;  %6550 = vmatprep.subr.bf16.mxu1 %v8841_v51  ;;  %v8850_v10 = vpack.c.bf16 %v2120_v35, %v2116_v0  ;;  %v8858_v23 = vpack.c.bf16 %v2121_v46, %v2117_v41  ;;  %v2124_v0 = vld [vmem:[#allocation9 + $0x1c8] sm:$0xff]  ;;  %v8867_v51 = vpack.c.bf16 %v2127_v25, %v2123_v47  ;;  %v2125_v41 = vld [vmem:[#allocation9 + $0x1d0] sm:$0xff] }
 0x2cf   :  { %v2128_v35 = vld [vmem:[#allocation9 + $0x1e8] sm:$0xff]  ;;  %v2129_v46 = vld [vmem:[#allocation9 + $0x1f0] sm:$0xff] }
 0x2d0   :  { %10416 = vst [vmem:[#allocation44_spill] sm:$0xff] %v8850_v10  ;;  %10419 = vst [vmem:[#allocation47_spill] sm:$0xff] %v8858_v23 }
 0x2d1   :  { %6520 = vmatpush1.bf16.msra.mxu0 %v8843_v8  ;;  %6552 = vmatpush1.bf16.msra.mxu1 %v8846_v7  ;;  %v2126_v8 = vld [vmem:[#allocation9 + $0x1d8] sm:$0xff]  ;;  %v8863_v7 = vpack.c.bf16 %v2128_v35, %v2124_v0  ;;  %10422 = vst [vmem:[#allocation50_spill] sm:$0xff] %v8867_v51  ;;  %v2008_v0 = vld [vmem:[#allocation7 + $0x28] sm:$0xff] }
 0x2d2   :  { %6522 = vmatprep.subr.bf16.mxu0 %v8850_v10  ;;  %6554 = vmatprep.subr.bf16.mxu1 %v8853_v36  ;;  %v8865_v16 = vpack.c.bf16 %v2130_v48, %v2126_v8  ;;  %v8870_v36 = vpack.c.bf16 %v2129_v46, %v2125_v41  ;;  %v2006_v35 = vld [vmem:[#allocation7 + $0x18] sm:$0xff] }
 0x2d3   :  { %10420 = vst [vmem:[#allocation48_spill] sm:$0xff] %v8863_v7  ;;  %v2010_v8 = vld [vmem:[#allocation7 + $0x38] sm:$0xff] }
 0x2d4   :  { %10421 = vst [vmem:[#allocation49_spill] sm:$0xff] %v8865_v16  ;;  %10423 = vst [vmem:[#allocation51_spill] sm:$0xff] %v8870_v36  ;;  %v8877_v48 = vpack.c.bf16 %v2010_v8, %v2006_v35 }
 0x2d5   :  { %6524 = vmatpush1.bf16.msra.mxu0 %v8855_v58  ;;  %6556 = vmatpush1.bf16.msra.mxu1 %v8858_v23  ;;  %v2004_v23 = vld [vmem:[#allocation7 + $0x8] sm:$0xff] }
 0x2d6   :  { %6526 = vmatprep.subr.bf16.mxu0 %v8863_v7  ;;  %6558 = vmatprep.subr.bf16.mxu1 %v8865_v16  ;;  %v8875_v58 = vpack.c.bf16 %v2008_v0, %v2004_v23  ;;  %10425 = vst [vmem:[#allocation53_spill] sm:$0xff] %v8877_v48 }
 0x2d8   :  { %10424 = vst [vmem:[#allocation52_spill] sm:$0xff] %v8875_v58 }
 0x2d9   :  { %6528 = vmatpush1.bf16.msra.mxu0 %v8867_v51  ;;  %6560 = vmatpush1.bf16.msra.mxu1 %v8870_v36 }
 0x2da   :  { %6562 = vmatprep.subr.bf16.mxu0 %v8875_v58  ;;  %6594 = vmatprep.subr.bf16.mxu1 %v8877_v48 }
 0x36e   :  { %v1668_v47 = vpop.f32.mrb[18].mxu0  ;;  %v1739_v25 = vpop.f32.mrb[20].mxu1 }
 0x36f   :  { %v1744_v41 = vadd.f32 %v1668_v47, %v8608_v31  ;;  %v1670_v46 = vpop.f32.mrb[19].mxu0  ;;  %v1741_v51 = vpop.f32.mrb[21].mxu1  ;;  %v1746_v0 = vadd.f32 %v1739_v25, %v8623_v44 }
 0x370   :  { %v1745_v16 = vadd.f32 %v1670_v46, %v8612_v39  ;;  %v1747_v23 = vadd.f32 %v1741_v51, %v8617_v3  ;;  %v2003_v46 = vld [vmem:[#allocation7] sm:$0xff] }
 0x371   :  { %v1748_v7 = vmul.f32 0.5, %v1744_v41  ;;  %v1750_v35 = vmul.f32 0.5, %v1746_v0  ;;  %v2005_v0 = vld [vmem:[#allocation7 + $0x10] sm:$0xff] }
 0x372   :  { %v1749_v10 = vmul.f32 0.5, %v1745_v16 }
 0x373   :  { %7753 = vtanh.f32 %v1748_v7 }
 0x374   :  { %7755 = vtanh.f32 %v1749_v10 }
 0x375   :  { %7757 = vtanh.f32 %v1747_v23  ;;  %v2007_v23 = vld [vmem:[#allocation7 + $0x20] sm:$0xff] }
 0x376   :  { %7759 = vtanh.f32 %v1750_v35  ;;  %v8891_v44 = vpack.c.bf16 %v2007_v23, %v2003_v46  ;;  %v2026_v46 = vld [vmem:[#allocation7 + $0xb8] sm:$0xff] }
 0x37d   :  { %v7754_v8 = vpop.eup %7753 }
 0x37e   :  { %v1754_v48 = vmul.f32 0.5, %v7754_v8  ;;  %v7756_v58 = vpop.eup %7755  ;;  %v2009_v8 = vld [vmem:[#allocation7 + $0x30] sm:$0xff] }
 0x37f   :  { %v1755_v47 = vmul.f32 0.5, %v7756_v58  ;;  %v7758_v31 = vpop.eup %7757  ;;  %v8893_v3 = vpack.c.bf16 %v2009_v8, %v2005_v0  ;;  %v2019_v0 = vld [vmem:[#allocation7 + $0x80] sm:$0xff] }
 0x380   :  { %v1757_v36 = vadd.f32 0.5, %v1754_v48  ;;  %v7760_v7 = vpop.eup %7759 }
 0x381   :  { %v1758_v50 = vadd.f32 0.5, %v1755_v47  ;;  %v1756_v51 = vmul.f32 0.5, %v7760_v7  ;;  %v2012_v47 = vld [vmem:[#allocation7 + $0x48] sm:$0xff] }
 0x382   :  { %v1762_v24 = vmul.f32 %v7758_v31, %v1757_v36  ;;  %v2016_v31 = vld [vmem:[#allocation7 + $0x68] sm:$0xff] }
 0x383   :  { %v1761_v41 = vmul.f32 %v1758_v50, %v8626_v43  ;;  %v2018_v50 = vld [vmem:[#allocation7 + $0x78] sm:$0xff]  ;;  %v1759_v36 = vadd.f32 0.5, %v1756_v51  ;;  %v8895_v39 = vpack.c.bf16 %v2016_v31, %v2012_v47  ;;  %v2017_v51 = vld [vmem:[#allocation7 + $0x70] sm:$0xff] }
 0x384   :  { %v2021_v31 = vld [vmem:[#allocation7 + $0x90] sm:$0xff] }
 0x385   :  { %v8886_v16 = vadd.f32 %v1762_v24, %v1761_v41  ;;  %v2014_v24 = vld [vmem:[#allocation7 + $0x58] sm:$0xff]  ;;  %10427 = vst [vmem:[#allocation55_spill] sm:$0xff] %v8895_v39 }
 0x387   :  { %10426 = vst [vmem:[#allocation54_spill] sm:$0xff] %v8886_v16  ;;  %7761 = vtanh.f32 %v8886_v16 }
 0x38e   :  { %v1905_v10 = vpop.f32.mrb[4].mxu0  ;;  %v1976_v25 = vpop.f32.mrb[4].mxu1 }
 0x38f   :  { %v7623_v48 = vadd.f32 %v1905_v10, %v10358_v34  ;;  %v1907_v35 = vpop.f32.mrb[5].mxu0  ;;  %v1978_v58 = vpop.f32.mrb[5].mxu1  ;;  %v2011_v10 = vld [vmem:[#allocation7 + $0x40] sm:$0xff] }
 0x390   :  { %v7624_v43 = vadd.f32 %v1907_v35, %v10359_v2  ;;  %v2015_v34 = vld [vmem:[#allocation7 + $0x60] sm:$0xff]  ;;  %v7640_v13 = vadd.f32 %v1978_v58, %v10360_v18  ;;  %v8900_v35 = vpack.c.bf16 %v2018_v50, %v2014_v24  ;;  %v2013_v2 = vld [vmem:[#allocation7 + $0x50] sm:$0xff]  ;;  %v2028_v50 = vld [vmem:[#allocation7 + $0xc8] sm:$0xff] }
 0x391   :  { %v1985_v41 = vmul.f32 0.5, %v7623_v48  ;;  %v7762_v16 = vpop.eup %7761  ;;  %v2020_v48 = vld [vmem:[#allocation7 + $0x88] sm:$0xff]  ;;  %v8906_v23 = vpack.c.bf16 %v2015_v34, %v2011_v10  ;;  %v2023_v58 = vld [vmem:[#allocation7 + $0xa0] sm:$0xff]  ;;  %v2025_v24 = vld [vmem:[#allocation7 + $0xb0] sm:$0xff] }
 0x392   :  { %v1986_v7 = vmul.f32 0.5, %v7624_v43  ;;  %v8898_v9 = vmul.f32 %v7762_v16, %v1759_v36  ;;  %10429 = vst [vmem:[#allocation57_spill] sm:$0xff] %v8900_v35  ;;  %v2022_v43 = vld [vmem:[#allocation7 + $0x98] sm:$0xff]  ;;  %v8908_v16 = vpack.c.bf16 %v2017_v51, %v2013_v2  ;;  %v8912_v8 = vpack.c.bf16 %v2024_v1, %v2020_v48  ;;  %v2032_v34 = vld [vmem:[#allocation7 + $0xe8] sm:$0xff]  ;;  %v2031_v10 = vld [vmem:[#allocation7 + $0xe0] sm:$0xff] }
 0x393   :  { %7763 = vtanh.f32 %v1985_v41  ;;  %10430 = vst [vmem:[#allocation58_spill] sm:$0xff] %v8906_v23  ;;  %v8914_v47 = vpack.c.bf16 %v2026_v46, %v2022_v43  ;;  %v7639_v36 = vadd.f32 %v1976_v25, %v10366_v42  ;;  %v2030_v41 = vld [vmem:[#allocation7 + $0xd8] sm:$0xff]  ;;  %v8921_v1 = vpack.c.bf16 %v2023_v58, %v2019_v0  ;;  %v2029_v48 = vld [vmem:[#allocation7 + $0xd0] sm:$0xff]  ;;  %v2036_v46 = vld [vmem:[#allocation7 + $0x108] sm:$0xff] }
 0x394   :  { %10428 = vst [vmem:[#allocation56_spill] sm:$0xff] %v8898_v9  ;;  %7765 = vtanh.f32 %v1986_v7  ;;  %2196 = vmatmul.mubr.f32.vlgmr.msra.gmra.mrb[20].mxu0 %v8898_v9  ;;  %2267 = vmatmul.mubr.f32.vlgmr.msra.gmra.mrb[22].mxu1 %v8898_v9  ;;  %10431 = vst [vmem:[#allocation59_spill] sm:$0xff] %v8908_v16  ;;  %v2034_v2 = vld [vmem:[#allocation7 + $0xf8] sm:$0xff]  ;;  %v2027_v7 = vld [vmem:[#allocation7 + $0xc0] sm:$0xff]  ;;  %v8927_v25 = vpack.c.bf16 %v2032_v34, %v2028_v50 }
 0x395   :  { %6564 = vmatpush1.bf16.msra.mxu0 %v8891_v44  ;;  %6596 = vmatpush1.bf16.msra.mxu1 %v8893_v3  ;;  %7767 = vtanh.f32 %v7640_v13  ;;  %10432 = vst [vmem:[#allocation60_spill] sm:$0xff] %v8912_v8  ;;  %10433 = vst [vmem:[#allocation61_spill] sm:$0xff] %v8914_v47  ;;  %v8923_v13 = vpack.c.bf16 %v2025_v24, %v2021_v31  ;;  %v8929_v51 = vpack.c.bf16 %v2034_v2, %v2030_v41  ;;  %v2033_v43 = vld [vmem:[#allocation7 + $0xf0] sm:$0xff]  ;;  %v2042_v0 = vld [vmem:[#allocation7 + $0x138] sm:$0xff] }
 0x396   :  { %6566 = vmatprep.subr.bf16.mxu0 %v8895_v39  ;;  %6598 = vmatprep.subr.bf16.mxu1 %v8900_v35  ;;  %10434 = vst [vmem:[#allocation62_spill] sm:$0xff] %v8921_v1  ;;  %v1987_v9 = vmul.f32 0.5, %v7639_v36  ;;  %v8933_v24 = vpack.c.bf16 %v2031_v10, %v2027_v7  ;;  %v2035_v50 = vld [vmem:[#allocation7 + $0x100] sm:$0xff]  ;;  %v2048_v10 = vld [vmem:[#allocation7 + $0x168] sm:$0xff] }
 0x397   :  { %2337 = vmatprep.mubr.f32.mxu0 %v10296_v12  ;;  %2408 = vmatprep.mubr.f32.mxu1 %v10296_v12  ;;  %10435 = vst [vmem:[#allocation63_spill] sm:$0xff] %v8923_v13  ;;  %v2039_v34 = vld [vmem:[#allocation7 + $0x120] sm:$0xff] }
 0x398   :  { %7769 = vtanh.f32 %v1987_v9 }
 0x399   :  { %6568 = vmatpush1.bf16.msra.mxu0 %v8906_v23  ;;  %6600 = vmatpush1.bf16.msra.mxu1 %v8908_v16  ;;  %v2040_v23 = vld [vmem:[#allocation7 + $0x128] sm:$0xff]  ;;  %v2038_v16 = vld [vmem:[#allocation7 + $0x118] sm:$0xff] }
 0x39a   :  { %6570 = vmatprep.subr.bf16.mxu0 %v8912_v8  ;;  %6602 = vmatprep.subr.bf16.mxu1 %v8914_v47  ;;  %v8935_v47 = vpack.c.bf16 %v2033_v43, %v2029_v48  ;;  %v8939_v36 = vpack.c.bf16 %v2040_v23, %v2036_v46  ;;  %v8941_v2 = vpack.c.bf16 %v2042_v0, %v2038_v16  ;;  %v2041_v8 = vld [vmem:[#allocation7 + $0x130] sm:$0xff]  ;;  %v2046_v48 = vld [vmem:[#allocation7 + $0x158] sm:$0xff]  ;;  %v2043_v46 = vld [vmem:[#allocation7 + $0x140] sm:$0xff] }
 0x39b   :  { %v2050_v43 = vld [vmem:[#allocation7 + $0x178] sm:$0xff]  ;;  %v8945_v23 = vpack.c.bf16 %v2039_v34, %v2035_v50  ;;  %v2047_v0 = vld [vmem:[#allocation7 + $0x160] sm:$0xff] }
 0x39c   :  { %10436 = vst [vmem:[#allocation64_spill] sm:$0xff] %v8935_v47  ;;  %v2054_v50 = vld [vmem:[#allocation7 + $0x198] sm:$0xff] }
 0x39d   :  { %v7764_v58 = vpop.eup %7763  ;;  %6572 = vmatpush1.bf16.msra.mxu0 %v8921_v1  ;;  %6604 = vmatpush1.bf16.msra.mxu1 %v8923_v13  ;;  %v2044_v1 = vld [vmem:[#allocation7 + $0x148] sm:$0xff]  ;;  %10437 = vst [vmem:[#allocation65_spill] sm:$0xff] %v8945_v23  ;;  %v2058_v34 = vld [vmem:[#allocation7 + $0x1b8] sm:$0xff] }
 0x39e   :  { %v1991_v31 = vmul.f32 0.5, %v7764_v58  ;;  %v7766_v41 = vpop.eup %7765  ;;  %6574 = vmatprep.subr.bf16.mxu0 %v8927_v25  ;;  %6606 = vmatprep.subr.bf16.mxu1 %v8929_v51  ;;  %v2037_v58 = vld [vmem:[#allocation7 + $0x110] sm:$0xff]  ;;  %v8951_v9 = vpack.c.bf16 %v2048_v10, %v2044_v1  ;;  %v2051_v10 = vld [vmem:[#allocation7 + $0x180] sm:$0xff] }
 0x39f   :  { %v1992_v7 = vmul.f32 0.5, %v7766_v41  ;;  %v7768_v13 = vpop.eup %7767  ;;  %v8947_v16 = vpack.c.bf16 %v2041_v8, %v2037_v58  ;;  %v2045_v41 = vld [vmem:[#allocation7 + $0x150] sm:$0xff]  ;;  %v8960_v58 = vpack.c.bf16 %v2047_v0, %v2043_v46  ;;  %v2062_v46 = vld [vmem:[#allocation7 + $0x1d8] sm:$0xff] }
 0x3a0   :  { %v1994_v42 = vadd.f32 0.5, %v1991_v31  ;;  %10439 = vst [vmem:[#allocation71_spill] sm:$0xff] %v8951_v9  ;;  %v8953_v31 = vpack.c.bf16 %v2050_v43, %v2046_v48  ;;  %v2055_v48 = vld [vmem:[#allocation7 + $0x1a0] sm:$0xff]  ;;  %v2057_v43 = vld [vmem:[#allocation7 + $0x1b0] sm:$0xff]  ;;  %v2066_v0 = vld [vmem:[#allocation7 + $0x1f8] sm:$0xff] }
 0x3a1   :  { %v1995_v35 = vadd.f32 0.5, %v1992_v7  ;;  %6576 = vmatpush1.bf16.msra.mxu0 %v8933_v24  ;;  %6608 = vmatpush1.bf16.msra.mxu1 %v8935_v47  ;;  %10438 = vst [vmem:[#allocation66_spill] sm:$0xff] %v8947_v16  ;;  %v2056_v47 = vld [vmem:[#allocation7 + $0x1a8] sm:$0xff] }
 0x3a2   :  { %v1999_v39 = vmul.f32 %v7768_v13, %v1994_v42  ;;  %6578 = vmatprep.subr.bf16.mxu0 %v8939_v36  ;;  %6610 = vmatprep.subr.bf16.mxu1 %v8941_v2  ;;  %10440 = vst [vmem:[#allocation72_spill] sm:$0xff] %v8953_v31  ;;  %v2049_v42 = vld [vmem:[#allocation7 + $0x170] sm:$0xff]  ;;  %v2052_v13 = vld [vmem:[#allocation7 + $0x188] sm:$0xff] }
 0x3a3   :  { %v1998_v7 = vmul.f32 %v1995_v35, %v8656_v37  ;;  %v8962_v1 = vpack.c.bf16 %v2049_v42, %v2045_v41  ;;  %v8966_v37 = vpack.c.bf16 %v2056_v47, %v2052_v13  ;;  %v8968_v35 = vpack.c.bf16 %v2058_v34, %v2054_v50  ;;  %v7770_v41 = vpop.eup %7769  ;;  %v2059_v47 = vld [vmem:[#allocation7 + $0x1c0] sm:$0xff] }
 0x3a4   :  { %v8973_v42 = vpack.c.bf16 %v2055_v48, %v2051_v10  ;;  %v8981_v50 = vpack.c.bf16 %v2066_v0, %v2062_v46  ;;  %v2063_v34 = vld [vmem:[#allocation7 + $0x1e0] sm:$0xff] }
 0x3a5   :  { %v8956_v8 = vadd.f32 %v1999_v39, %v1998_v7  ;;  %6580 = vmatpush1.bf16.msra.mxu0 %v8945_v23  ;;  %6612 = vmatpush1.bf16.msra.mxu1 %v8947_v16  ;;  %v2053_v39 = vld [vmem:[#allocation7 + $0x190] sm:$0xff]  ;;  %v2060_v7 = vld [vmem:[#allocation7 + $0x1c8] sm:$0xff]  ;;  %v8985_v10 = vpack.c.bf16 %v2063_v34, %v2059_v47 }
 0x3a6   :  { %6582 = vmatprep.subr.bf16.mxu0 %v8951_v9  ;;  %6614 = vmatprep.subr.bf16.mxu1 %v8953_v31  ;;  %v2064_v16 = vld [vmem:[#allocation7 + $0x1e8] sm:$0xff]  ;;  %v8975_v31 = vpack.c.bf16 %v2057_v43, %v2053_v39  ;;  %v2061_v9 = vld [vmem:[#allocation7 + $0x1d0] sm:$0xff] }
 0x3a7   :  { %10441 = vst [vmem:[#allocation73_spill] sm:$0xff] %v8956_v8  ;;  %7771 = vtanh.f32 %v8956_v8  ;;  %v8979_v13 = vpack.c.bf16 %v2064_v16, %v2060_v7  ;;  %v2065_v23 = vld [vmem:[#allocation7 + $0x1f0] sm:$0xff]  ;;  %v1993_v8 = vmul.f32 0.5, %v7770_v41  ;;  %v10476_v41 = vld [vmem:[#allocation18_spill] sm:$0xff] }
 0x3a8   :  { %v8987_v48 = vpack.c.bf16 %v2065_v23, %v2061_v9 }
 0x3a9   :  { %6584 = vmatpush1.bf16.msra.mxu0 %v8960_v58  ;;  %6616 = vmatpush1.bf16.msra.mxu1 %v8962_v1  ;;  %v1996_v16 = vadd.f32 0.5, %v1993_v8  ;;  %v10475_v8 = vld [vmem:[#allocation17_spill] sm:$0xff] }
 0x3aa   :  { %6586 = vmatprep.subr.bf16.mxu0 %v8966_v37  ;;  %6618 = vmatprep.subr.bf16.mxu1 %v8968_v35 }
 0x3ad   :  { %6588 = vmatpush1.bf16.msra.mxu0 %v8973_v42  ;;  %6620 = vmatpush1.bf16.msra.mxu1 %v8975_v31 }
 0x3ae   :  { %6590 = vmatprep.subr.bf16.mxu0 %v8979_v13  ;;  %6622 = vmatprep.subr.bf16.mxu1 %v8981_v50 }
 0x3b1   :  { %v7772_v39 = vpop.eup %7771  ;;  %6592 = vmatpush1.bf16.msra.mxu0 %v8985_v10  ;;  %6624 = vmatpush1.bf16.msra.mxu1 %v8987_v48 }
 0x3b2   :  { %6626 = vmatprep.subr.bf16.mxu0 %v8671_v63  ;;  %6658 = vmatprep.subr.bf16.mxu1 %v8673_v4  ;;  %v2002_v43 = vmul.f32 %v7772_v39, %v1996_v16  ;;  %v10442_v63 = vld [vmem:[#allocation22_spill] sm:$0xff]  ;;  %v10443_v4 = vld [vmem:[#allocation23_spill] sm:$0xff] }
 0x3b3   :  { %v10477_v39 = vld [vmem:[#allocation19_spill] sm:$0xff] }
 0x3b4   :  { %2338 = vmatmul.mubr.f32.vlgmr.msra.gmra.mrb[20].mxu0 %v2002_v43  ;;  %2409 = vmatmul.mubr.f32.vlgmr.msra.gmra.mrb[22].mxu1 %v2002_v43 }
 0x3b5   :  { %6628 = vmatpush1.bf16.msra.mxu0 %v8677_v56  ;;  %6660 = vmatpush1.bf16.msra.mxu1 %v8679_v62  ;;  %v10444_v56 = vld [vmem:[#allocation24_spill] sm:$0xff]  ;;  %v10445_v62 = vld [vmem:[#allocation25_spill] sm:$0xff] }
 0x3b6   :  { %6630 = vmatprep.subr.bf16.mxu0 %v8685_v14  ;;  %6662 = vmatprep.subr.bf16.mxu1 %v8687_v22  ;;  %v10446_v14 = vld [vmem:[#allocation26_spill] sm:$0xff]  ;;  %v10447_v22 = vld [vmem:[#allocation27_spill] sm:$0xff] }
 0x3b7   :  { %2574 = vmatprep.mubr.f32.mxu0 %v10296_v12  ;;  %2645 = vmatprep.mubr.f32.mxu1 %v10296_v12 }
 0x3b9   :  { %6632 = vmatpush1.bf16.msra.mxu0 %v8693_v57  ;;  %6664 = vmatpush1.bf16.msra.mxu1 %v8695_v60  ;;  %v10448_v57 = vld [vmem:[#allocation28_spill] sm:$0xff]  ;;  %v10449_v60 = vld [vmem:[#allocation29_spill] sm:$0xff] }
 0x3ba   :  { %6634 = vmatprep.subr.bf16.mxu0 %v8699_v20  ;;  %6666 = vmatprep.subr.bf16.mxu1 %v8701_v28  ;;  %v10450_v20 = vld [vmem:[#allocation30_spill] sm:$0xff]  ;;  %v10451_v28 = vld [vmem:[#allocation31_spill] sm:$0xff] }
 0x3bd   :  { %6636 = vmatpush1.bf16.msra.mxu0 %v8707_v32  ;;  %6668 = vmatpush1.bf16.msra.mxu1 %v8709_v27  ;;  %v10452_v32 = vld [vmem:[#allocation32_spill] sm:$0xff]  ;;  %v10453_v27 = vld [vmem:[#allocation33_spill] sm:$0xff] }
 0x3be   :  { %6638 = vmatprep.subr.bf16.mxu0 %v8713_v17  ;;  %6670 = vmatprep.subr.bf16.mxu1 %v8715_v11  ;;  %v10454_v17 = vld [vmem:[#allocation34_spill] sm:$0xff]  ;;  %v10455_v11 = vld [vmem:[#allocation35_spill] sm:$0xff] }
 0x3c1   :  { %6640 = vmatpush1.bf16.msra.mxu0 %v8719_v53  ;;  %6672 = vmatpush1.bf16.msra.mxu1 %v8721_v29  ;;  %v10456_v53 = vld [vmem:[#allocation36_spill] sm:$0xff]  ;;  %v10457_v29 = vld [vmem:[#allocation69_spill] sm:$0xff] }
 0x3c2   :  { %6642 = vmatprep.subr.bf16.mxu0 %v8725_v15  ;;  %6674 = vmatprep.subr.bf16.mxu1 %v8727_v19  ;;  %v10458_v15 = vld [vmem:[#allocation37_spill] sm:$0xff]  ;;  %v10459_v19 = vld [vmem:[#allocation38_spill] sm:$0xff] }
 0x3c5   :  { %6644 = vmatpush1.bf16.msra.mxu0 %v8731_v55  ;;  %6676 = vmatpush1.bf16.msra.mxu1 %v8733_v5  ;;  %v10460_v55 = vld [vmem:[#allocation39_spill] sm:$0xff]  ;;  %v10461_v5 = vld [vmem:[#allocation40_spill] sm:$0xff] }
 0x3c6   :  { %6646 = vmatprep.subr.bf16.mxu0 %v8737_v30  ;;  %6678 = vmatprep.subr.bf16.mxu1 %v8739_v38  ;;  %v10462_v30 = vld [vmem:[#allocation41_spill] sm:$0xff]  ;;  %v10463_v38 = vld [vmem:[#allocation42_spill] sm:$0xff] }
 0x3c9   :  { %6648 = vmatpush1.bf16.msra.mxu0 %v8743_v52  ;;  %6680 = vmatpush1.bf16.msra.mxu1 %v8745_v61  ;;  %v10464_v52 = vld [vmem:[#allocation43_spill] sm:$0xff]  ;;  %v10465_v61 = vld [vmem:[#allocation44_spill] sm:$0xff] }
 0x3ca   :  { %6650 = vmatprep.subr.bf16.mxu0 %v8749_v21  ;;  %6682 = vmatprep.subr.bf16.mxu1 %v8751_v45  ;;  %v10466_v21 = vld [vmem:[#allocation45_spill] sm:$0xff]  ;;  %v10467_v45 = vld [vmem:[#allocation46_spill] sm:$0xff] }
 0x3cd   :  { %6652 = vmatpush1.bf16.msra.mxu0 %v8755_v59  ;;  %6684 = vmatpush1.bf16.msra.mxu1 %v8757_v40  ;;  %v10468_v59 = vld [vmem:[#allocation47_spill] sm:$0xff]  ;;  %v10469_v40 = vld [vmem:[#allocation48_spill] sm:$0xff] }
 0x3ce   :  { %6654 = vmatprep.subr.bf16.mxu0 %v8761_v26  ;;  %6686 = vmatprep.subr.bf16.mxu1 %v8763_v33  ;;  %v10470_v26 = vld [vmem:[#allocation49_spill] sm:$0xff]  ;;  %v10471_v33 = vld [vmem:[#allocation50_spill] sm:$0xff] }
 0x3d1   :  { %6656 = vmatpush1.bf16.msra.mxu0 %v8767_v49  ;;  %6688 = vmatpush1.bf16.msra.mxu1 %v8769_v6  ;;  %v10472_v49 = vld [vmem:[#allocation51_spill] sm:$0xff]  ;;  %v10473_v6 = vld [vmem:[#allocation52_spill] sm:$0xff] }
 0x3d2   :  { %6690 = vmatprep.subr.bf16.mxu0 %v8779_v54  ;;  %6722 = vmatprep.subr.bf16.mxu1 %v10442_v63  ;;  %v10474_v54 = vld [vmem:[#allocation53_spill] sm:$0xff]  ;;  %v10478_v63 = vld [vmem:[#allocation20_spill] sm:$0xff] }
 0x3d4   :  { %2575 = vmatmul.mubr.f32.vlgmr.msra.gmra.mrb[6].mxu0 %v2002_v43  ;;  %2646 = vmatmul.mubr.f32.vlgmr.msra.gmra.mrb[6].mxu1 %v2002_v43 }
 0x3d5   :  { %6692 = vmatpush1.bf16.msra.mxu0 %v10443_v4  ;;  %6724 = vmatpush1.bf16.msra.mxu1 %v10444_v56 }
 0x3d6   :  { %6694 = vmatprep.subr.bf16.mxu0 %v10445_v62  ;;  %6726 = vmatprep.subr.bf16.mxu1 %v10446_v14 }
 0x3d7   :  { %2866 = vmatprep.mubr.f32.mxu0 %v10296_v12  ;;  %2937 = vmatprep.mubr.f32.mxu1 %v10296_v12 }
 0x3d9   :  { %6696 = vmatpush1.bf16.msra.mxu0 %v10447_v22  ;;  %6728 = vmatpush1.bf16.msra.mxu1 %v10448_v57 }
 0x3da   :  { %6698 = vmatprep.subr.bf16.mxu0 %v10449_v60  ;;  %6730 = vmatprep.subr.bf16.mxu1 %v10450_v20 }
 0x3dd   :  { %6700 = vmatpush1.bf16.msra.mxu0 %v10451_v28  ;;  %6732 = vmatpush1.bf16.msra.mxu1 %v10452_v32 }
 0x3de   :  { %6702 = vmatprep.subr.bf16.mxu0 %v10453_v27  ;;  %6734 = vmatprep.subr.bf16.mxu1 %v10454_v17  ;;  %v10479_v27 = vld [vmem:[#allocation54_spill] sm:$0xff] }
 0x3e1   :  { %6704 = vmatpush1.bf16.msra.mxu0 %v10455_v11  ;;  %6736 = vmatpush1.bf16.msra.mxu1 %v10456_v53 }
 0x3e2   :  { %6706 = vmatprep.subr.bf16.mxu0 %v10457_v29  ;;  %6738 = vmatprep.subr.bf16.mxu1 %v10458_v15 }
 0x3e5   :  { %6708 = vmatpush1.bf16.msra.mxu0 %v10459_v19  ;;  %6740 = vmatpush1.bf16.msra.mxu1 %v10460_v55  ;;  %v10480_v55 = vld [vmem:[#allocation67_spill] sm:$0xff] }
 0x3e6   :  { %6710 = vmatprep.subr.bf16.mxu0 %v10461_v5  ;;  %6742 = vmatprep.subr.bf16.mxu1 %v10462_v30 }
 0x3e9   :  { %6712 = vmatpush1.bf16.msra.mxu0 %v10463_v38  ;;  %6744 = vmatpush1.bf16.msra.mxu1 %v10464_v52  ;;  %v10481_v52 = vld [vmem:[#allocation68_spill] sm:$0xff] }
 0x3ea   :  { %6714 = vmatprep.subr.bf16.mxu0 %v10465_v61  ;;  %6746 = vmatprep.subr.bf16.mxu1 %v10466_v21 }
 0x3ed   :  { %6716 = vmatpush1.bf16.msra.mxu0 %v10467_v45  ;;  %6748 = vmatpush1.bf16.msra.mxu1 %v10468_v59 }
 0x3ee   :  { %6718 = vmatprep.subr.bf16.mxu0 %v10469_v40  ;;  %6750 = vmatprep.subr.bf16.mxu1 %v10470_v26 }
 0x3f1   :  { %6720 = vmatpush1.bf16.msra.mxu0 %v10471_v33  ;;  %6752 = vmatpush1.bf16.msra.mxu1 %v10472_v49  ;;  %v10483_v49 = vld [vmem:[#allocation55_spill] sm:$0xff] }
 0x3f2   :  { %6754 = vmatprep.subr.bf16.mxu0 %v10473_v6  ;;  %6786 = vmatprep.subr.bf16.mxu1 %v10474_v54  ;;  %v10484_v6 = vld [vmem:[#allocation57_spill] sm:$0xff]  ;;  %v10485_v54 = vld [vmem:[#allocation70_spill] sm:$0xff] }
 0x487   :  { %v2339_v23 = vpop.f32.mrb[20].mxu0  ;;  %v2410_v9 = vpop.f32.mrb[22].mxu1 }
 0x488   :  { %v2415_v7 = vadd.f32 %v2339_v23, %v10475_v8  ;;  %v2341_v46 = vpop.f32.mrb[21].mxu0  ;;  %v2412_v0 = vpop.f32.mrb[23].mxu1  ;;  %v2417_v4 = vadd.f32 %v2410_v9, %v10478_v63  ;;  %v10486_v9 = vld [vmem:[#allocation58_spill] sm:$0xff] }
 0x489   :  { %v2416_v47 = vadd.f32 %v2341_v46, %v10476_v41  ;;  %v2418_v43 = vadd.f32 %v2412_v0, %v10477_v39  ;;  %v10488_v46 = vld [vmem:[#allocation60_spill] sm:$0xff] }
 0x48a   :  { %v2419_v34 = vmul.f32 0.5, %v2415_v7  ;;  %v2421_v56 = vmul.f32 0.5, %v2417_v4  ;;  %v10487_v7 = vld [vmem:[#allocation59_spill] sm:$0xff] }
 0x48b   :  { %v2420_v16 = vmul.f32 0.5, %v2416_v47 }
 0x48c   :  { %7773 = vtanh.f32 %v2419_v34  ;;  %v10490_v34 = vld [vmem:[#allocation62_spill] sm:$0xff] }
 0x48d   :  { %7775 = vtanh.f32 %v2420_v16  ;;  %v10491_v16 = vld [vmem:[#allocation63_spill] sm:$0xff] }
 0x48e   :  { %7777 = vtanh.f32 %v2418_v43 }
 0x48f   :  { %7779 = vtanh.f32 %v2421_v56 }
 0x496   :  { %v7774_v62 = vpop.eup %7773 }
 0x497   :  { %v2425_v14 = vmul.f32 0.5, %v7774_v62  ;;  %v7776_v22 = vpop.eup %7775 }
 0x498   :  { %v2426_v60 = vmul.f32 0.5, %v7776_v22  ;;  %v7778_v20 = vpop.eup %7777 }
 0x499   :  { %v2428_v57 = vadd.f32 0.5, %v2425_v14  ;;  %v7780_v53 = vpop.eup %7779 }
 0x49a   :  { %v2429_v28 = vadd.f32 0.5, %v2426_v60  ;;  %v2427_v29 = vmul.f32 0.5, %v7780_v53  ;;  %v10493_v60 = vld [vmem:[#allocation73_spill] sm:$0xff]  ;;  %v3124_v53 = vld [vmem:[#allocation4 + $0x38] sm:$0xff] }
 0x49b   :  { %v2433_v32 = vmul.f32 %v7778_v20, %v2428_v57  ;;  %v10492_v57 = vld [vmem:[#allocation64_spill] sm:$0xff] }
 0x49c   :  { %v2432_v17 = vmul.f32 %v2429_v28, %v10479_v27  ;;  %v2430_v21 = vadd.f32 0.5, %v2427_v29  ;;  %v10497_v27 = vld [vmem:[#allocation72_spill] sm:$0xff] }
 0x49e   :  { %v9068_v11 = vadd.f32 %v2433_v32, %v2432_v17  ;;  %v10496_v32 = vld [vmem:[#allocation71_spill] sm:$0xff]  ;;  %v3120_v17 = vld [vmem:[#allocation4 + $0x18] sm:$0xff] }
 0x4a0   :  { %7781 = vtanh.f32 %v9068_v11 }
 0x4a7   :  { %v2576_v15 = vpop.f32.mrb[6].mxu0  ;;  %v2647_v19 = vpop.f32.mrb[6].mxu1 }
 0x4a8   :  { %v7625_v5 = vadd.f32 %v2576_v15, %v10480_v55  ;;  %v2578_v30 = vpop.f32.mrb[7].mxu0  ;;  %v2649_v38 = vpop.f32.mrb[7].mxu1  ;;  %v7641_v23 = vadd.f32 %v2647_v19, %v10485_v54  ;;  %v3117_v15 = vld [vmem:[#allocation4] sm:$0xff] }
 0x4a9   :  { %v7626_v61 = vadd.f32 %v2578_v30, %v10481_v52  ;;  %v7642_v26 = vadd.f32 %v2649_v38, %v10360_v18  ;;  %v3121_v19 = vld [vmem:[#allocation4 + $0x20] sm:$0xff]  ;;  %v3130_v30 = vld [vmem:[#allocation4 + $0x68] sm:$0xff]  ;;  %v3128_v38 = vld [vmem:[#allocation4 + $0x58] sm:$0xff] }
 0x4aa   :  { %v2656_v45 = vmul.f32 0.5, %v7625_v5  ;;  %v7782_v59 = vpop.eup %7781  ;;  %v3126_v5 = vld [vmem:[#allocation4 + $0x48] sm:$0xff] }
 0x4ab   :  { %v2657_v40 = vmul.f32 0.5, %v7626_v61  ;;  %v9074_v33 = vmul.f32 %v7782_v59, %v2430_v21  ;;  %v3132_v61 = vld [vmem:[#allocation4 + $0x78] sm:$0xff] }
 0x4ac   :  { %7783 = vtanh.f32 %v2656_v45  ;;  %v3129_v45 = vld [vmem:[#allocation4 + $0x60] sm:$0xff] }
 0x4ad   :  { %10482 = vst [vmem:[#allocation22_spill] sm:$0xff] %v9074_v33  ;;  %7785 = vtanh.f32 %v2657_v40  ;;  %2867 = vmatmul.mubr.f32.vlgmr.msra.gmra.mrb[22].mxu0 %v9074_v33  ;;  %2938 = vmatmul.mubr.f32.vlgmr.msra.gmra.mrb[24].mxu1 %v9074_v33  ;;  %v9127_v40 = vpack.c.bf16 %v3130_v30, %v3126_v5  ;;  %v3155_v5 = vld [vmem:[#allocation4 + $0x130] sm:$0xff]  ;;  %v3158_v30 = vld [vmem:[#allocation4 + $0x148] sm:$0xff] }
 0x4ae   :  { %6756 = vmatpush1.bf16.msra.mxu0 %v8891_v44  ;;  %6788 = vmatpush1.bf16.msra.mxu1 %v8893_v3  ;;  %7787 = vtanh.f32 %v7642_v26  ;;  %v10489_v44 = vld [vmem:[#allocation61_spill] sm:$0xff]  ;;  %v2658_v3 = vmul.f32 0.5, %v7641_v23  ;;  %v9129_v26 = vpack.c.bf16 %v3132_v61, %v3128_v38  ;;  %v3136_v23 = vld [vmem:[#allocation4 + $0x98] sm:$0xff]  ;;  %v3162_v38 = vld [vmem:[#allocation4 + $0x168] sm:$0xff] }
 0x4af   :  { %6758 = vmatprep.subr.bf16.mxu0 %v10483_v49  ;;  %6790 = vmatprep.subr.bf16.mxu1 %v10484_v6  ;;  %v3127_v49 = vld [vmem:[#allocation4 + $0x50] sm:$0xff]  ;;  %v3134_v6 = vld [vmem:[#allocation4 + $0x88] sm:$0xff]  ;;  %v3160_v61 = vld [vmem:[#allocation4 + $0x158] sm:$0xff] }
 0x4b0   :  { %3008 = vmatprep.mubr.f32.mxu0 %v10296_v12  ;;  %3079 = vmatprep.mubr.f32.mxu1 %v10296_v12  ;;  %7789 = vtanh.f32 %v2658_v3  ;;  %v3137_v3 = vld [vmem:[#allocation4 + $0xa0] sm:$0xff]  ;;  %v3434_v33 = vld [vmem:[#allocation9 + $0xc8] sm:$0xff] }
 0x4b2   :  { %6760 = vmatpush1.bf16.msra.mxu0 %v10486_v9  ;;  %6792 = vmatpush1.bf16.msra.mxu1 %v10487_v7  ;;  %v3140_v9 = vld [vmem:[#allocation4 + $0xb8] sm:$0xff] }
 0x4b3   :  { %6762 = vmatprep.subr.bf16.mxu0 %v10488_v46  ;;  %6794 = vmatprep.subr.bf16.mxu1 %v10489_v44  ;;  %v3133_v44 = vld [vmem:[#allocation4 + $0x80] sm:$0xff] }
 0x4b6   :  { %v7784_v0 = vpop.eup %7783  ;;  %6764 = vmatpush1.bf16.msra.mxu0 %v10490_v34  ;;  %6796 = vmatpush1.bf16.msra.mxu1 %v10491_v16  ;;  %v3135_v34 = vld [vmem:[#allocation4 + $0x90] sm:$0xff] }
 0x4b7   :  { %v2662_v47 = vmul.f32 0.5, %v7784_v0  ;;  %v7786_v43 = vpop.eup %7785  ;;  %6766 = vmatprep.subr.bf16.mxu0 %v8927_v25  ;;  %6798 = vmatprep.subr.bf16.mxu1 %v8929_v51  ;;  %v10494_v25 = vld [vmem:[#allocation65_spill] sm:$0xff]  ;;  %v10495_v51 = vld [vmem:[#allocation66_spill] sm:$0xff]  ;;  %v3139_v16 = vld [vmem:[#allocation4 + $0xb0] sm:$0xff] }
 0x4b8   :  { %v2663_v56 = vmul.f32 0.5, %v7786_v43  ;;  %v7788_v62 = vpop.eup %7787  ;;  %v3142_v43 = vld [vmem:[#allocation4 + $0xc8] sm:$0xff] }
 0x4b9   :  { %v2665_v4 = vadd.f32 0.5, %v2662_v47  ;;  %v9143_v47 = vpack.c.bf16 %v3140_v9, %v3136_v23  ;;  %v3163_v23 = vld [vmem:[#allocation4 + $0x170] sm:$0xff]  ;;  %v3166_v9 = vld [vmem:[#allocation4 + $0x188] sm:$0xff] }
 0x4ba   :  { %v2666_v14 = vadd.f32 0.5, %v2663_v56  ;;  %6768 = vmatpush1.bf16.msra.mxu0 %v8933_v24  ;;  %6800 = vmatpush1.bf16.msra.mxu1 %v10492_v57  ;;  %v7790_v24 = vpop.eup %7789  ;;  %v3144_v56 = vld [vmem:[#allocation4 + $0xd8] sm:$0xff]  ;;  %v3141_v57 = vld [vmem:[#allocation4 + $0xc0] sm:$0xff] }
 0x4bb   :  { %v2670_v22 = vmul.f32 %v7788_v62, %v2665_v4  ;;  %6770 = vmatprep.subr.bf16.mxu0 %v8939_v36  ;;  %6802 = vmatprep.subr.bf16.mxu1 %v8941_v2  ;;  %v3118_v36 = vld [vmem:[#allocation4 + $0x8] sm:$0xff]  ;;  %v2664_v29 = vmul.f32 0.5, %v7790_v24  ;;  %v3148_v62 = vld [vmem:[#allocation4 + $0xf8] sm:$0xff] }
 0x4bc   :  { %v2669_v20 = vmul.f32 %v2666_v14, %v10493_v60  ;;  %v3122_v2 = vld [vmem:[#allocation4 + $0x28] sm:$0xff]  ;;  %v9149_v14 = vpack.c.bf16 %v3137_v3, %v3133_v44  ;;  %v3145_v60 = vld [vmem:[#allocation4 + $0xe0] sm:$0xff]  ;;  %v3168_v3 = vld [vmem:[#allocation4 + $0x198] sm:$0xff] }
 0x4bd   :  { %v2667_v21 = vadd.f32 0.5, %v2664_v29  ;;  %v3146_v4 = vld [vmem:[#allocation4 + $0xe8] sm:$0xff]  ;;  %v3149_v29 = vld [vmem:[#allocation4 + $0x100] sm:$0xff] }
 0x4be   :  { %v9098_v28 = vadd.f32 %v2670_v22, %v2669_v20  ;;  %6772 = vmatpush1.bf16.msra.mxu0 %v10494_v25  ;;  %6804 = vmatpush1.bf16.msra.mxu1 %v10495_v51  ;;  %v9151_v22 = vpack.c.bf16 %v3139_v16, %v3135_v34  ;;  %v9155_v20 = vpack.c.bf16 %v3146_v4, %v3142_v43  ;;  %v3143_v51 = vld [vmem:[#allocation4 + $0xd0] sm:$0xff]  ;;  %v3154_v24 = vld [vmem:[#allocation4 + $0x128] sm:$0xff]  ;;  %v3172_v34 = vld [vmem:[#allocation4 + $0x1b8] sm:$0xff] }
 0x4bf   :  { %6774 = vmatprep.subr.bf16.mxu0 %v10496_v32  ;;  %6806 = vmatprep.subr.bf16.mxu1 %v10497_v27  ;;  %v9157_v25 = vpack.c.bf16 %v3148_v62, %v3144_v56  ;;  %v3147_v32 = vld [vmem:[#allocation4 + $0xf0] sm:$0xff]  ;;  %v3150_v27 = vld [vmem:[#allocation4 + $0x108] sm:$0xff]  ;;  %v3165_v4 = vld [vmem:[#allocation4 + $0x180] sm:$0xff] }
 0x4c0   :  { %7791 = vtanh.f32 %v9098_v28  ;;  %v3170_v44 = vld [vmem:[#allocation4 + $0x1a8] sm:$0xff]  ;;  %v3169_v56 = vld [vmem:[#allocation4 + $0x1a0] sm:$0xff] }
 0x4c1   :  { %v9191_v62 = vpack.c.bf16 %v3170_v44, %v3166_v9  ;;  %v3416_v44 = vld [vmem:[#allocation9 + $0x38] sm:$0xff] }
 0x4c2   :  { %6776 = vmatpush1.bf16.msra.mxu0 %v8960_v58  ;;  %6808 = vmatpush1.bf16.msra.mxu1 %v8962_v1  ;;  %v9113_v58 = vpack.c.bf16 %v3122_v2, %v3118_v36  ;;  %v9115_v1 = vpack.c.bf16 %v3124_v53, %v3120_v17  ;;  %v3152_v36 = vld [vmem:[#allocation4 + $0x118] sm:$0xff]  ;;  %v9161_v17 = vpack.c.bf16 %v3145_v60, %v3141_v57  ;;  %v3167_v60 = vld [vmem:[#allocation4 + $0x190] sm:$0xff] }
 0x4c3   :  { %6778 = vmatprep.subr.bf16.mxu0 %v8966_v37  ;;  %6810 = vmatprep.subr.bf16.mxu1 %v8968_v35  ;;  %v3119_v37 = vld [vmem:[#allocation4 + $0x10] sm:$0xff]  ;;  %v3156_v2 = vld [vmem:[#allocation4 + $0x138] sm:$0xff]  ;;  %v9163_v53 = vpack.c.bf16 %v3147_v32, %v3143_v51  ;;  %v9193_v57 = vpack.c.bf16 %v3172_v34, %v3168_v3  ;;  %v3174_v32 = vld [vmem:[#allocation4 + $0x1c8] sm:$0xff] }
 0x4c4   :  { %v3123_v35 = vld [vmem:[#allocation4 + $0x30] sm:$0xff]  ;;  %v3409_v3 = vld [vmem:[#allocation9] sm:$0xff] }
 0x4c5   :  { %v3171_v51 = vld [vmem:[#allocation4 + $0x1b0] sm:$0xff]  ;;  %v3413_v34 = vld [vmem:[#allocation9 + $0x20] sm:$0xff] }
 0x4c6   :  { %6780 = vmatpush1.bf16.msra.mxu0 %v8973_v42  ;;  %6812 = vmatpush1.bf16.msra.mxu1 %v8975_v31  ;;  %v9119_v31 = vpack.c.bf16 %v3121_v19, %v3117_v15  ;;  %v3153_v15 = vld [vmem:[#allocation4 + $0x120] sm:$0xff]  ;;  %v9167_v19 = vpack.c.bf16 %v3154_v24, %v3150_v27  ;;  %v3178_v27 = vld [vmem:[#allocation4 + $0x1e8] sm:$0xff]  ;;  %v3176_v24 = vld [vmem:[#allocation4 + $0x1d8] sm:$0xff] }
 0x4c7   :  { %6782 = vmatprep.subr.bf16.mxu0 %v8979_v13  ;;  %6814 = vmatprep.subr.bf16.mxu1 %v8981_v50  ;;  %v9121_v13 = vpack.c.bf16 %v3123_v35, %v3119_v37  ;;  %v3125_v50 = vld [vmem:[#allocation4 + $0x40] sm:$0xff]  ;;  %v9169_v37 = vpack.c.bf16 %v3156_v2, %v3152_v36  ;;  %v3151_v35 = vld [vmem:[#allocation4 + $0x110] sm:$0xff]  ;;  %v3180_v36 = vld [vmem:[#allocation4 + $0x1f8] sm:$0xff]  ;;  %v9197_v2 = vpack.c.bf16 %v3169_v56, %v3165_v4 }
 0x4c8   :  { %v9135_v7 = vpack.c.bf16 %v3129_v45, %v3125_v50  ;;  %v9175_v50 = vpack.c.bf16 %v3155_v5, %v3151_v35  ;;  %v3157_v45 = vld [vmem:[#allocation4 + $0x140] sm:$0xff]  ;;  %v9203_v35 = vpack.c.bf16 %v3178_v27, %v3174_v32  ;;  %v9205_v5 = vpack.c.bf16 %v3180_v36, %v3176_v24  ;;  %v3418_v32 = vld [vmem:[#allocation9 + $0x48] sm:$0xff]  ;;  %v3420_v24 = vld [vmem:[#allocation9 + $0x58] sm:$0xff] }
 0x4c9   :  { %v9225_v56 = vpack.c.bf16 %v3413_v34, %v3409_v3  ;;  %v3422_v27 = vld [vmem:[#allocation9 + $0x68] sm:$0xff] }
 0x4ca   :  { %v7792_v42 = vpop.eup %7791  ;;  %6784 = vmatpush1.bf16.msra.mxu0 %v8985_v10  ;;  %6816 = vmatpush1.bf16.msra.mxu1 %v8987_v48  ;;  %v3131_v10 = vld [vmem:[#allocation4 + $0x70] sm:$0xff]  ;;  %v3138_v48 = vld [vmem:[#allocation4 + $0xa8] sm:$0xff]  ;;  %v9233_v36 = vpack.c.bf16 %v3422_v27, %v3418_v32  ;;  %v3432_v32 = vld [vmem:[#allocation9 + $0xb8] sm:$0xff] }
 0x4cb   :  { %v9123_v59 = vmul.f32 %v7792_v42, %v2667_v21  ;;  %6818 = vmatprep.subr.bf16.mxu0 %v9113_v58  ;;  %6850 = vmatprep.subr.bf16.mxu1 %v9115_v1  ;;  %v9137_v46 = vpack.c.bf16 %v3131_v10, %v3127_v49  ;;  %v9141_v0 = vpack.c.bf16 %v3138_v48, %v3134_v6  ;;  %v3164_v21 = vld [vmem:[#allocation4 + $0x178] sm:$0xff]  ;;  %v3161_v49 = vld [vmem:[#allocation4 + $0x160] sm:$0xff]  ;;  %v3159_v48 = vld [vmem:[#allocation4 + $0x150] sm:$0xff] }
 0x4cc   :  { %v9173_v42 = vpack.c.bf16 %v3153_v15, %v3149_v29  ;;  %v9179_v10 = vpack.c.bf16 %v3162_v38, %v3158_v30  ;;  %v9181_v6 = vpack.c.bf16 %v3164_v21, %v3160_v61  ;;  %v9185_v16 = vpack.c.bf16 %v3161_v49, %v3157_v45  ;;  %v3173_v15 = vld [vmem:[#allocation4 + $0x1c0] sm:$0xff]  ;;  %v3175_v38 = vld [vmem:[#allocation4 + $0x1d0] sm:$0xff]  ;;  %v3410_v49 = vld [vmem:[#allocation9 + $0x8] sm:$0xff]  ;;  %10499 = vst [vmem:[#allocation24_spill] sm:$0xff] %v9225_v56 }
 0x4cd   :  { %3009 = vmatmul.mubr.f32.vlgmr.msra.gmra.mrb[22].mxu0 %v9123_v59  ;;  %3080 = vmatmul.mubr.f32.vlgmr.msra.gmra.mrb[24].mxu1 %v9123_v59  ;;  %v9187_v43 = vpack.c.bf16 %v3163_v23, %v3159_v48  ;;  %v9199_v29 = vpack.c.bf16 %v3171_v51, %v3167_v60  ;;  %v3177_v30 = vld [vmem:[#allocation4 + $0x1e0] sm:$0xff]  ;;  %v3179_v61 = vld [vmem:[#allocation4 + $0x1f0] sm:$0xff]  ;;  %v3414_v48 = vld [vmem:[#allocation9 + $0x28] sm:$0xff]  ;;  %10501 = vst [vmem:[#allocation26_spill] sm:$0xff] %v9233_v36 }
 0x4ce   :  { %6820 = vmatpush1.bf16.msra.mxu0 %v9119_v31  ;;  %6852 = vmatpush1.bf16.msra.mxu1 %v9121_v13  ;;  %v9209_v21 = vpack.c.bf16 %v3177_v30, %v3173_v15  ;;  %v9211_v45 = vpack.c.bf16 %v3179_v61, %v3175_v38  ;;  %v3412_v23 = vld [vmem:[#allocation9 + $0x18] sm:$0xff]  ;;  %v9221_v9 = vpack.c.bf16 %v3414_v48, %v3410_v49  ;;  %v3411_v60 = vld [vmem:[#allocation9 + $0x10] sm:$0xff]  ;;  %v3417_v30 = vld [vmem:[#allocation9 + $0x40] sm:$0xff] }
 0x4cf   :  { %6822 = vmatprep.subr.bf16.mxu0 %v9127_v40  ;;  %6854 = vmatprep.subr.bf16.mxu1 %v9129_v26  ;;  %v9223_v4 = vpack.c.bf16 %v3416_v44, %v3412_v23  ;;  %v3415_v51 = vld [vmem:[#allocation9 + $0x30] sm:$0xff]  ;;  %v3424_v15 = vld [vmem:[#allocation9 + $0x78] sm:$0xff]  ;;  %v3421_v38 = vld [vmem:[#allocation9 + $0x60] sm:$0xff] }
 0x4d0   :  { %3245 = vmatprep.mubr.f32.mxu0 %v10296_v12  ;;  %3316 = vmatprep.mubr.f32.mxu1 %v10296_v12  ;;  %v9235_v61 = vpack.c.bf16 %v3424_v15, %v3420_v24  ;;  %v9237_v49 = vpack.c.bf16 %v3421_v38, %v3417_v30  ;;  %v3419_v48 = vld [vmem:[#allocation9 + $0x50] sm:$0xff]  ;;  %v3426_v3 = vld [vmem:[#allocation9 + $0x88] sm:$0xff]  ;;  %v3425_v27 = vld [vmem:[#allocation9 + $0x80] sm:$0xff] }
 0x4d1   :  { %10498 = vst [vmem:[#allocation23_spill] sm:$0xff] %v9223_v4  ;;  %v3423_v23 = vld [vmem:[#allocation9 + $0x70] sm:$0xff]  ;;  %v3430_v34 = vld [vmem:[#allocation9 + $0xa8] sm:$0xff]  ;;  %v3429_v24 = vld [vmem:[#allocation9 + $0xa0] sm:$0xff] }
 0x4d2   :  { %6824 = vmatpush1.bf16.msra.mxu0 %v9135_v7  ;;  %6856 = vmatpush1.bf16.msra.mxu1 %v9137_v46  ;;  %10502 = vst [vmem:[#allocation27_spill] sm:$0xff] %v9235_v61  ;;  %10503 = vst [vmem:[#allocation28_spill] sm:$0xff] %v9237_v49  ;;  %v9240_v44 = vpack.c.bf16 %v3423_v23, %v3419_v48  ;;  %v9249_v30 = vpack.c.bf16 %v3429_v24, %v3425_v27  ;;  %v3427_v38 = vld [vmem:[#allocation9 + $0x90] sm:$0xff]  ;;  %v3437_v27 = vld [vmem:[#allocation9 + $0xe0] sm:$0xff] }
 0x4d3   :  { %6826 = vmatprep.subr.bf16.mxu0 %v9141_v0  ;;  %6858 = vmatprep.subr.bf16.mxu1 %v9143_v47  ;;  %v3431_v48 = vld [vmem:[#allocation9 + $0xb0] sm:$0xff] }
 0x4d4   :  { %10504 = vst [vmem:[#allocation29_spill] sm:$0xff] %v9240_v44  ;;  %10507 = vst [vmem:[#allocation32_spill] sm:$0xff] %v9249_v30  ;;  %v9252_v23 = vpack.c.bf16 %v3431_v48, %v3427_v38  ;;  %v3435_v38 = vld [vmem:[#allocation9 + $0xd0] sm:$0xff] }
 0x4d5   :  { %v3439_v48 = vld [vmem:[#allocation9 + $0xf0] sm:$0xff] }
 0x4d6   :  { %6828 = vmatpush1.bf16.msra.mxu0 %v9149_v14  ;;  %6860 = vmatpush1.bf16.msra.mxu1 %v9151_v22  ;;  %10508 = vst [vmem:[#allocation33_spill] sm:$0xff] %v9252_v23 }
 0x4d7   :  { %6830 = vmatprep.subr.bf16.mxu0 %v9155_v20  ;;  %6862 = vmatprep.subr.bf16.mxu1 %v9157_v25 }
 0x4da   :  { %6832 = vmatpush1.bf16.msra.mxu0 %v9161_v17  ;;  %6864 = vmatpush1.bf16.msra.mxu1 %v9163_v53 }
 0x4db   :  { %6834 = vmatprep.subr.bf16.mxu0 %v9167_v19  ;;  %6866 = vmatprep.subr.bf16.mxu1 %v9169_v37 }
 0x4de   :  { %6836 = vmatpush1.bf16.msra.mxu0 %v9173_v42  ;;  %6868 = vmatpush1.bf16.msra.mxu1 %v9175_v50 }
 0x4df   :  { %6838 = vmatprep.subr.bf16.mxu0 %v9179_v10  ;;  %6870 = vmatprep.subr.bf16.mxu1 %v9181_v6 }
 0x4e2   :  { %6840 = vmatpush1.bf16.msra.mxu0 %v9185_v16  ;;  %6872 = vmatpush1.bf16.msra.mxu1 %v9187_v43 }
 0x4e3   :  { %6842 = vmatprep.subr.bf16.mxu0 %v9191_v62  ;;  %6874 = vmatprep.subr.bf16.mxu1 %v9193_v57 }
 0x4e6   :  { %6844 = vmatpush1.bf16.msra.mxu0 %v9197_v2  ;;  %6876 = vmatpush1.bf16.msra.mxu1 %v9199_v29 }
 0x4e7   :  { %6846 = vmatprep.subr.bf16.mxu0 %v9203_v35  ;;  %6878 = vmatprep.subr.bf16.mxu1 %v9205_v5 }
 0x4ea   :  { %6848 = vmatpush1.bf16.msra.mxu0 %v9209_v21  ;;  %6880 = vmatpush1.bf16.msra.mxu1 %v9211_v45 }
 0x4eb   :  { %6882 = vmatprep.subr.bf16.mxu0 %v9221_v9  ;;  %6914 = vmatprep.subr.bf16.mxu1 %v9223_v4  ;;  %v3366_v4 = vld [vmem:[#allocation7 + $0xa8] sm:$0xff] }
 0x4ed   :  { %3246 = vmatmul.mubr.f32.vlgmr.msra.gmra.mrb[8].mxu0 %v9123_v59  ;;  %3317 = vmatmul.mubr.f32.vlgmr.msra.gmra.mrb[8].mxu1 %v9123_v59  ;;  %v9228_v59 = vpack.c.bf16 %v3415_v51, %v3411_v60  ;;  %v3428_v60 = vld [vmem:[#allocation9 + $0x98] sm:$0xff]  ;;  %v9245_v51 = vpack.c.bf16 %v3430_v34, %v3426_v3  ;;  %v3438_v3 = vld [vmem:[#allocation9 + $0xe8] sm:$0xff] }
 0x4ee   :  { %3537 = vmatprep.mubr.f32.mxu0 %v10296_v12  ;;  %3608 = vmatprep.mubr.f32.mxu1 %v10296_v12  ;;  %v9247_v15 = vpack.c.bf16 %v3432_v32, %v3428_v60  ;;  %v3436_v34 = vld [vmem:[#allocation9 + $0xd8] sm:$0xff]  ;;  %v3433_v32 = vld [vmem:[#allocation9 + $0xc0] sm:$0xff] }
 0x4ef   :  { %10500 = vst [vmem:[#allocation25_spill] sm:$0xff] %v9228_v59  ;;  %6884 = vmatpush1.bf16.msra.mxu0 %v9225_v56  ;;  %6916 = vmatpush1.bf16.msra.mxu1 %v9228_v59  ;;  %10505 = vst [vmem:[#allocation30_spill] sm:$0xff] %v9245_v51  ;;  %v3440_v60 = vld [vmem:[#allocation9 + $0xf8] sm:$0xff] }
 0x4f0   :  { %6886 = vmatprep.subr.bf16.mxu0 %v9233_v36  ;;  %6918 = vmatprep.subr.bf16.mxu1 %v9235_v61  ;;  %10506 = vst [vmem:[#allocation31_spill] sm:$0xff] %v9247_v15  ;;  %v9259_v24 = vpack.c.bf16 %v3440_v60, %v3436_v34  ;;  %v3448_v34 = vld [vmem:[#allocation9 + $0x138] sm:$0xff]  ;;  %v3441_v60 = vld [vmem:[#allocation9 + $0x100] sm:$0xff] }
 0x4f1   :  { %v3460_v61 = vld [vmem:[#allocation9 + $0x198] sm:$0xff] }
 0x4f2   :  { %10510 = vst [vmem:[#allocation35_spill] sm:$0xff] %v9259_v24 }
 0x4f3   :  { %6888 = vmatpush1.bf16.msra.mxu0 %v9237_v49  ;;  %6920 = vmatpush1.bf16.msra.mxu1 %v9240_v44  ;;  %v9257_v44 = vpack.c.bf16 %v3438_v3, %v3434_v33  ;;  %v9261_v49 = vpack.c.bf16 %v3437_v27, %v3433_v32  ;;  %v3446_v33 = vld [vmem:[#allocation9 + $0x128] sm:$0xff]  ;;  %v3444_v3 = vld [vmem:[#allocation9 + $0x118] sm:$0xff]  ;;  %v3445_v32 = vld [vmem:[#allocation9 + $0x120] sm:$0xff] }
 0x4f4   :  { %6890 = vmatprep.subr.bf16.mxu0 %v9245_v51  ;;  %6922 = vmatprep.subr.bf16.mxu1 %v9247_v15  ;;  %v9264_v15 = vpack.c.bf16 %v3439_v48, %v3435_v38  ;;  %v9271_v27 = vpack.c.bf16 %v3448_v34, %v3444_v3  ;;  %v9273_v51 = vpack.c.bf16 %v3445_v32, %v3441_v60  ;;  %v3443_v38 = vld [vmem:[#allocation9 + $0x110] sm:$0xff]  ;;  %v3456_v3 = vld [vmem:[#allocation9 + $0x178] sm:$0xff]  ;;  %v3449_v34 = vld [vmem:[#allocation9 + $0x140] sm:$0xff] }
 0x4f5   :  { %10509 = vst [vmem:[#allocation34_spill] sm:$0xff] %v9257_v44  ;;  %10511 = vst [vmem:[#allocation36_spill] sm:$0xff] %v9261_v49  ;;  %v3447_v48 = vld [vmem:[#allocation9 + $0x130] sm:$0xff]  ;;  %v3453_v60 = vld [vmem:[#allocation9 + $0x160] sm:$0xff] }
 0x4f6   :  { %10512 = vst [vmem:[#allocation69_spill] sm:$0xff] %v9264_v15  ;;  %10514 = vst [vmem:[#allocation38_spill] sm:$0xff] %v9271_v27 }
 0x4f7   :  { %6892 = vmatpush1.bf16.msra.mxu0 %v9249_v30  ;;  %6924 = vmatpush1.bf16.msra.mxu1 %v9252_v23  ;;  %v3442_v23 = vld [vmem:[#allocation9 + $0x108] sm:$0xff]  ;;  %10515 = vst [vmem:[#allocation39_spill] sm:$0xff] %v9273_v51 }
 0x4f8   :  { %6894 = vmatprep.subr.bf16.mxu0 %v9257_v44  ;;  %6926 = vmatprep.subr.bf16.mxu1 %v9259_v24  ;;  %v9269_v30 = vpack.c.bf16 %v3446_v33, %v3442_v23  ;;  %v9276_v24 = vpack.c.bf16 %v3447_v48, %v3443_v38  ;;  %v3454_v23 = vld [vmem:[#allocation9 + $0x168] sm:$0xff]  ;;  %v3452_v33 = vld [vmem:[#allocation9 + $0x158] sm:$0xff]  ;;  %v9285_v44 = vpack.c.bf16 %v3453_v60, %v3449_v34  ;;  %v3451_v38 = vld [vmem:[#allocation9 + $0x150] sm:$0xff] }
 0x4f9   :  { %v9283_v32 = vpack.c.bf16 %v3456_v3, %v3452_v33  ;;  %v3455_v48 = vld [vmem:[#allocation9 + $0x170] sm:$0xff]  ;;  %v3457_v33 = vld [vmem:[#allocation9 + $0x180] sm:$0xff] }
 0x4fa   :  { %10513 = vst [vmem:[#allocation37_spill] sm:$0xff] %v9269_v30  ;;  %10516 = vst [vmem:[#allocation40_spill] sm:$0xff] %v9276_v24  ;;  %v3461_v3 = vld [vmem:[#allocation9 + $0x1a0] sm:$0xff] }
 0x4fb   :  { %6896 = vmatpush1.bf16.msra.mxu0 %v9261_v49  ;;  %6928 = vmatpush1.bf16.msra.mxu1 %v9264_v15  ;;  %v3450_v15 = vld [vmem:[#allocation9 + $0x148] sm:$0xff]  ;;  %10518 = vst [vmem:[#allocation42_spill] sm:$0xff] %v9283_v32  ;;  %10519 = vst [vmem:[#allocation43_spill] sm:$0xff] %v9285_v44  ;;  %v9297_v60 = vpack.c.bf16 %v3461_v3, %v3457_v33  ;;  %v3469_v33 = vld [vmem:[#allocation9 + $0x1e0] sm:$0xff] }
 0x4fc   :  { %6898 = vmatprep.subr.bf16.mxu0 %v9269_v30  ;;  %6930 = vmatprep.subr.bf16.mxu1 %v9271_v27  ;;  %v9281_v49 = vpack.c.bf16 %v3454_v23, %v3450_v15  ;;  %v9288_v27 = vpack.c.bf16 %v3455_v48, %v3451_v38  ;;  %v3462_v30 = vld [vmem:[#allocation9 + $0x1a8] sm:$0xff]  ;;  %v3464_v23 = vld [vmem:[#allocation9 + $0x1b8] sm:$0xff]  ;;  %v3459_v38 = vld [vmem:[#allocation9 + $0x190] sm:$0xff] }
 0x4fd   :  { %v9295_v34 = vpack.c.bf16 %v3464_v23, %v3460_v61  ;;  %10523 = vst [vmem:[#allocation47_spill] sm:$0xff] %v9297_v60  ;;  %v3463_v48 = vld [vmem:[#allocation9 + $0x1b0] sm:$0xff]  ;;  %v3472_v61 = vld [vmem:[#allocation9 + $0x1f8] sm:$0xff]  ;;  %v3465_v23 = vld [vmem:[#allocation9 + $0x1c0] sm:$0xff] }
 0x4fe   :  { %10517 = vst [vmem:[#allocation41_spill] sm:$0xff] %v9281_v49  ;;  %10520 = vst [vmem:[#allocation44_spill] sm:$0xff] %v9288_v27 }
 0x4ff   :  { %6900 = vmatpush1.bf16.msra.mxu0 %v9273_v51  ;;  %6932 = vmatpush1.bf16.msra.mxu1 %v9276_v24  ;;  %v3458_v51 = vld [vmem:[#allocation9 + $0x188] sm:$0xff]  ;;  %10522 = vst [vmem:[#allocation46_spill] sm:$0xff] %v9295_v34 }
 0x500   :  { %6902 = vmatprep.subr.bf16.mxu0 %v9281_v49  ;;  %6934 = vmatprep.subr.bf16.mxu1 %v9283_v32  ;;  %v9292_v15 = vpack.c.bf16 %v3462_v30, %v3458_v51  ;;  %v9300_v49 = vpack.c.bf16 %v3463_v48, %v3459_v38  ;;  %v3466_v51 = vld [vmem:[#allocation9 + $0x1c8] sm:$0xff]  ;;  %v9309_v32 = vpack.c.bf16 %v3469_v33, %v3465_v23  ;;  %v3467_v38 = vld [vmem:[#allocation9 + $0x1d0] sm:$0xff] }
 0x501   :  { %v3470_v30 = vld [vmem:[#allocation9 + $0x1e8] sm:$0xff]  ;;  %v3471_v48 = vld [vmem:[#allocation9 + $0x1f0] sm:$0xff] }
 0x502   :  { %10521 = vst [vmem:[#allocation45_spill] sm:$0xff] %v9292_v15  ;;  %10524 = vst [vmem:[#allocation48_spill] sm:$0xff] %v9300_v49 }
 0x503   :  { %6904 = vmatpush1.bf16.msra.mxu0 %v9285_v44  ;;  %6936 = vmatpush1.bf16.msra.mxu1 %v9288_v27  ;;  %v3468_v44 = vld [vmem:[#allocation9 + $0x1d8] sm:$0xff]  ;;  %v9305_v27 = vpack.c.bf16 %v3470_v30, %v3466_v51  ;;  %10527 = vst [vmem:[#allocation51_spill] sm:$0xff] %v9309_v32  ;;  %v3350_v51 = vld [vmem:[#allocation7 + $0x28] sm:$0xff] }
 0x504   :  { %6906 = vmatprep.subr.bf16.mxu0 %v9292_v15  ;;  %6938 = vmatprep.subr.bf16.mxu1 %v9295_v34  ;;  %v9307_v3 = vpack.c.bf16 %v3472_v61, %v3468_v44  ;;  %v9312_v34 = vpack.c.bf16 %v3471_v48, %v3467_v38  ;;  %v3348_v30 = vld [vmem:[#allocation7 + $0x18] sm:$0xff] }
 0x505   :  { %10525 = vst [vmem:[#allocation49_spill] sm:$0xff] %v9305_v27  ;;  %v3352_v44 = vld [vmem:[#allocation7 + $0x38] sm:$0xff] }
 0x506   :  { %10526 = vst [vmem:[#allocation50_spill] sm:$0xff] %v9307_v3  ;;  %10528 = vst [vmem:[#allocation52_spill] sm:$0xff] %v9312_v34  ;;  %v9319_v61 = vpack.c.bf16 %v3352_v44, %v3348_v30 }
 0x507   :  { %6908 = vmatpush1.bf16.msra.mxu0 %v9297_v60  ;;  %6940 = vmatpush1.bf16.msra.mxu1 %v9300_v49  ;;  %v3346_v49 = vld [vmem:[#allocation7 + $0x8] sm:$0xff] }
 0x508   :  { %6910 = vmatprep.subr.bf16.mxu0 %v9305_v27  ;;  %6942 = vmatprep.subr.bf16.mxu1 %v9307_v3  ;;  %v9317_v60 = vpack.c.bf16 %v3350_v51, %v3346_v49  ;;  %10530 = vst [vmem:[#allocation54_spill] sm:$0xff] %v9319_v61 }
 0x50a   :  { %10529 = vst [vmem:[#allocation53_spill] sm:$0xff] %v9317_v60 }
 0x50b   :  { %6912 = vmatpush1.bf16.msra.mxu0 %v9309_v32  ;;  %6944 = vmatpush1.bf16.msra.mxu1 %v9312_v34 }
 0x50c   :  { %6946 = vmatprep.subr.bf16.mxu0 %v9317_v60  ;;  %6978 = vmatprep.subr.bf16.mxu1 %v9319_v61 }
 0x5a0   :  { %v3010_v23 = vpop.f32.mrb[22].mxu0  ;;  %v3081_v33 = vpop.f32.mrb[24].mxu1 }
 0x5a1   :  { %v3086_v38 = vadd.f32 %v3010_v23, %v10475_v8  ;;  %v3012_v48 = vpop.f32.mrb[23].mxu0  ;;  %v3083_v32 = vpop.f32.mrb[25].mxu1  ;;  %v3088_v51 = vadd.f32 %v3081_v33, %v10478_v63 }
 0x5a2   :  { %v3087_v3 = vadd.f32 %v3012_v48, %v10476_v41  ;;  %v3089_v49 = vadd.f32 %v3083_v32, %v10477_v39  ;;  %v3345_v48 = vld [vmem:[#allocation7] sm:$0xff] }
 0x5a3   :  { %v3090_v27 = vmul.f32 0.5, %v3086_v38  ;;  %v3092_v30 = vmul.f32 0.5, %v3088_v51  ;;  %v3347_v51 = vld [vmem:[#allocation7 + $0x10] sm:$0xff] }
 0x5a4   :  { %v3091_v15 = vmul.f32 0.5, %v3087_v3 }
 0x5a5   :  { %7793 = vtanh.f32 %v3090_v27 }
 0x5a6   :  { %7795 = vtanh.f32 %v3091_v15 }
 0x5a7   :  { %7797 = vtanh.f32 %v3089_v49  ;;  %v3349_v49 = vld [vmem:[#allocation7 + $0x20] sm:$0xff] }
 0x5a8   :  { %7799 = vtanh.f32 %v3092_v30  ;;  %v9333_v63 = vpack.c.bf16 %v3349_v49, %v3345_v48  ;;  %v3368_v48 = vld [vmem:[#allocation7 + $0xb8] sm:$0xff] }
 0x5af   :  { %v7794_v44 = vpop.eup %7793 }
 0x5b0   :  { %v3096_v61 = vmul.f32 0.5, %v7794_v44  ;;  %v7796_v60 = vpop.eup %7795  ;;  %v3351_v44 = vld [vmem:[#allocation7 + $0x30] sm:$0xff] }
 0x5b1   :  { %v3097_v23 = vmul.f32 0.5, %v7796_v60  ;;  %v7798_v8 = vpop.eup %7797  ;;  %v9335_v39 = vpack.c.bf16 %v3351_v44, %v3347_v51  ;;  %v3361_v51 = vld [vmem:[#allocation7 + $0x80] sm:$0xff] }
 0x5b2   :  { %v3099_v34 = vadd.f32 0.5, %v3096_v61  ;;  %v7800_v27 = vpop.eup %7799 }
 0x5b3   :  { %v3100_v24 = vadd.f32 0.5, %v3097_v23  ;;  %v3098_v32 = vmul.f32 0.5, %v7800_v27  ;;  %v3354_v23 = vld [vmem:[#allocation7 + $0x48] sm:$0xff] }
 0x5b4   :  { %v3104_v36 = vmul.f32 %v7798_v8, %v3099_v34  ;;  %v3358_v8 = vld [vmem:[#allocation7 + $0x68] sm:$0xff] }
 0x5b5   :  { %v3103_v38 = vmul.f32 %v3100_v24, %v9068_v11  ;;  %v3360_v24 = vld [vmem:[#allocation7 + $0x78] sm:$0xff]  ;;  %v3101_v34 = vadd.f32 0.5, %v3098_v32  ;;  %v9337_v41 = vpack.c.bf16 %v3358_v8, %v3354_v23  ;;  %v3359_v32 = vld [vmem:[#allocation7 + $0x70] sm:$0xff] }
 0x5b6   :  { %v3363_v8 = vld [vmem:[#allocation7 + $0x90] sm:$0xff] }
 0x5b7   :  { %v9328_v3 = vadd.f32 %v3104_v36, %v3103_v38  ;;  %v3356_v36 = vld [vmem:[#allocation7 + $0x58] sm:$0xff]  ;;  %10532 = vst [vmem:[#allocation57_spill] sm:$0xff] %v9337_v41 }
 0x5b9   :  { %10531 = vst [vmem:[#allocation55_spill] sm:$0xff] %v9328_v3  ;;  %7801 = vtanh.f32 %v9328_v3 }
 0x5c0   :  { %v3247_v15 = vpop.f32.mrb[8].mxu0  ;;  %v3318_v33 = vpop.f32.mrb[8].mxu1 }
 0x5c1   :  { %v7627_v61 = vadd.f32 %v3247_v15, %v10480_v55  ;;  %v3249_v30 = vpop.f32.mrb[9].mxu0  ;;  %v3320_v60 = vpop.f32.mrb[9].mxu1  ;;  %v3353_v15 = vld [vmem:[#allocation7 + $0x40] sm:$0xff] }
 0x5c2   :  { %v7628_v11 = vadd.f32 %v3249_v30, %v10481_v52  ;;  %v3357_v55 = vld [vmem:[#allocation7 + $0x60] sm:$0xff]  ;;  %v7644_v59 = vadd.f32 %v3320_v60, %v10360_v18  ;;  %v9342_v30 = vpack.c.bf16 %v3360_v24, %v3356_v36  ;;  %v3355_v52 = vld [vmem:[#allocation7 + $0x50] sm:$0xff]  ;;  %v3370_v24 = vld [vmem:[#allocation7 + $0xc8] sm:$0xff] }
 0x5c3   :  { %v3327_v38 = vmul.f32 0.5, %v7627_v61  ;;  %v7802_v3 = vpop.eup %7801  ;;  %v3362_v61 = vld [vmem:[#allocation7 + $0x88] sm:$0xff]  ;;  %v9348_v49 = vpack.c.bf16 %v3357_v55, %v3353_v15  ;;  %v3365_v60 = vld [vmem:[#allocation7 + $0xa0] sm:$0xff]  ;;  %v3367_v36 = vld [vmem:[#allocation7 + $0xb0] sm:$0xff] }
 0x5c4   :  { %v3328_v27 = vmul.f32 0.5, %v7628_v11  ;;  %v9340_v56 = vmul.f32 %v7802_v3, %v3101_v34  ;;  %10534 = vst [vmem:[#allocation59_spill] sm:$0xff] %v9342_v30  ;;  %v3364_v11 = vld [vmem:[#allocation7 + $0x98] sm:$0xff]  ;;  %v9350_v3 = vpack.c.bf16 %v3359_v32, %v3355_v52  ;;  %v9354_v44 = vpack.c.bf16 %v3366_v4, %v3362_v61  ;;  %v3374_v55 = vld [vmem:[#allocation7 + $0xe8] sm:$0xff]  ;;  %v3373_v15 = vld [vmem:[#allocation7 + $0xe0] sm:$0xff] }
 0x5c5   :  { %7803 = vtanh.f32 %v3327_v38  ;;  %10535 = vst [vmem:[#allocation60_spill] sm:$0xff] %v9348_v49  ;;  %v9356_v23 = vpack.c.bf16 %v3368_v48, %v3364_v11  ;;  %v7643_v34 = vadd.f32 %v3318_v33, %v10485_v54  ;;  %v3372_v38 = vld [vmem:[#allocation7 + $0xd8] sm:$0xff]  ;;  %v9363_v4 = vpack.c.bf16 %v3365_v60, %v3361_v51  ;;  %v3371_v61 = vld [vmem:[#allocation7 + $0xd0] sm:$0xff]  ;;  %v3378_v48 = vld [vmem:[#allocation7 + $0x108] sm:$0xff] }
 0x5c6   :  { %10533 = vst [vmem:[#allocation58_spill] sm:$0xff] %v9340_v56  ;;  %7805 = vtanh.f32 %v3328_v27  ;;  %3538 = vmatmul.mubr.f32.vlgmr.msra.gmra.mrb[24].mxu0 %v9340_v56  ;;  %3609 = vmatmul.mubr.f32.vlgmr.msra.gmra.mrb[26].mxu1 %v9340_v56  ;;  %10536 = vst [vmem:[#allocation61_spill] sm:$0xff] %v9350_v3  ;;  %v3376_v52 = vld [vmem:[#allocation7 + $0xf8] sm:$0xff]  ;;  %v3369_v27 = vld [vmem:[#allocation7 + $0xc0] sm:$0xff]  ;;  %v9369_v33 = vpack.c.bf16 %v3374_v55, %v3370_v24 }
 0x5c7   :  { %6948 = vmatpush1.bf16.msra.mxu0 %v9333_v63  ;;  %6980 = vmatpush1.bf16.msra.mxu1 %v9335_v39  ;;  %7807 = vtanh.f32 %v7644_v59  ;;  %10537 = vst [vmem:[#allocation62_spill] sm:$0xff] %v9354_v44  ;;  %10538 = vst [vmem:[#allocation63_spill] sm:$0xff] %v9356_v23  ;;  %v9365_v59 = vpack.c.bf16 %v3367_v36, %v3363_v8  ;;  %v9371_v32 = vpack.c.bf16 %v3376_v52, %v3372_v38  ;;  %v3375_v11 = vld [vmem:[#allocation7 + $0xf0] sm:$0xff]  ;;  %v3384_v51 = vld [vmem:[#allocation7 + $0x138] sm:$0xff] }
 0x5c8   :  { %6950 = vmatprep.subr.bf16.mxu0 %v9337_v41  ;;  %6982 = vmatprep.subr.bf16.mxu1 %v9342_v30  ;;  %10539 = vst [vmem:[#allocation64_spill] sm:$0xff] %v9363_v4  ;;  %v3329_v56 = vmul.f32 0.5, %v7643_v34  ;;  %v9375_v36 = vpack.c.bf16 %v3373_v15, %v3369_v27  ;;  %v3377_v24 = vld [vmem:[#allocation7 + $0x100] sm:$0xff]  ;;  %v3390_v15 = vld [vmem:[#allocation7 + $0x168] sm:$0xff] }
 0x5c9   :  { %3679 = vmatprep.mubr.f32.mxu0 %v10296_v12  ;;  %3750 = vmatprep.mubr.f32.mxu1 %v10296_v12  ;;  %10540 = vst [vmem:[#allocation73_spill] sm:$0xff] %v9365_v59  ;;  %v3381_v55 = vld [vmem:[#allocation7 + $0x120] sm:$0xff] }
 0x5ca   :  { %7809 = vtanh.f32 %v3329_v56 }
 0x5cb   :  { %6952 = vmatpush1.bf16.msra.mxu0 %v9348_v49  ;;  %6984 = vmatpush1.bf16.msra.mxu1 %v9350_v3  ;;  %v3382_v49 = vld [vmem:[#allocation7 + $0x128] sm:$0xff]  ;;  %v3380_v3 = vld [vmem:[#allocation7 + $0x118] sm:$0xff] }
 0x5cc   :  { %6954 = vmatprep.subr.bf16.mxu0 %v9354_v44  ;;  %6986 = vmatprep.subr.bf16.mxu1 %v9356_v23  ;;  %v9377_v23 = vpack.c.bf16 %v3375_v11, %v3371_v61  ;;  %v9381_v34 = vpack.c.bf16 %v3382_v49, %v3378_v48  ;;  %v9383_v52 = vpack.c.bf16 %v3384_v51, %v3380_v3  ;;  %v3383_v44 = vld [vmem:[#allocation7 + $0x130] sm:$0xff]  ;;  %v3388_v61 = vld [vmem:[#allocation7 + $0x158] sm:$0xff]  ;;  %v3385_v48 = vld [vmem:[#allocation7 + $0x140] sm:$0xff] }
 0x5cd   :  { %v3392_v11 = vld [vmem:[#allocation7 + $0x178] sm:$0xff]  ;;  %v9387_v49 = vpack.c.bf16 %v3381_v55, %v3377_v24  ;;  %v3389_v51 = vld [vmem:[#allocation7 + $0x160] sm:$0xff] }
 0x5ce   :  { %10541 = vst [vmem:[#allocation65_spill] sm:$0xff] %v9377_v23  ;;  %v3396_v24 = vld [vmem:[#allocation7 + $0x198] sm:$0xff] }
 0x5cf   :  { %v7804_v60 = vpop.eup %7803  ;;  %6956 = vmatpush1.bf16.msra.mxu0 %v9363_v4  ;;  %6988 = vmatpush1.bf16.msra.mxu1 %v9365_v59  ;;  %v3386_v4 = vld [vmem:[#allocation7 + $0x148] sm:$0xff]  ;;  %10542 = vst [vmem:[#allocation66_spill] sm:$0xff] %v9387_v49  ;;  %v3400_v55 = vld [vmem:[#allocation7 + $0x1b8] sm:$0xff] }
 0x5d0   :  { %v3333_v8 = vmul.f32 0.5, %v7804_v60  ;;  %v7806_v38 = vpop.eup %7805  ;;  %6958 = vmatprep.subr.bf16.mxu0 %v9369_v33  ;;  %6990 = vmatprep.subr.bf16.mxu1 %v9371_v32  ;;  %v3379_v60 = vld [vmem:[#allocation7 + $0x110] sm:$0xff]  ;;  %v9393_v56 = vpack.c.bf16 %v3390_v15, %v3386_v4  ;;  %v3393_v15 = vld [vmem:[#allocation7 + $0x180] sm:$0xff] }
 0x5d1   :  { %v3334_v27 = vmul.f32 0.5, %v7806_v38  ;;  %v7808_v59 = vpop.eup %7807  ;;  %v9389_v3 = vpack.c.bf16 %v3383_v44, %v3379_v60  ;;  %v3387_v38 = vld [vmem:[#allocation7 + $0x150] sm:$0xff]  ;;  %v9402_v60 = vpack.c.bf16 %v3389_v51, %v3385_v48  ;;  %v3404_v48 = vld [vmem:[#allocation7 + $0x1d8] sm:$0xff] }
 0x5d2   :  { %v3336_v54 = vadd.f32 0.5, %v3333_v8  ;;  %10544 = vst [vmem:[#allocation72_spill] sm:$0xff] %v9393_v56  ;;  %v9395_v8 = vpack.c.bf16 %v3392_v11, %v3388_v61  ;;  %v3397_v61 = vld [vmem:[#allocation7 + $0x1a0] sm:$0xff]  ;;  %v3399_v11 = vld [vmem:[#allocation7 + $0x1b0] sm:$0xff]  ;;  %v3408_v51 = vld [vmem:[#allocation7 + $0x1f8] sm:$0xff] }
 0x5d3   :  { %v3337_v30 = vadd.f32 0.5, %v3334_v27  ;;  %6960 = vmatpush1.bf16.msra.mxu0 %v9375_v36  ;;  %6992 = vmatpush1.bf16.msra.mxu1 %v9377_v23  ;;  %10543 = vst [vmem:[#allocation71_spill] sm:$0xff] %v9389_v3  ;;  %v3398_v23 = vld [vmem:[#allocation7 + $0x1a8] sm:$0xff] }
 0x5d4   :  { %v3341_v41 = vmul.f32 %v7808_v59, %v3336_v54  ;;  %6962 = vmatprep.subr.bf16.mxu0 %v9381_v34  ;;  %6994 = vmatprep.subr.bf16.mxu1 %v9383_v52  ;;  %10545 = vst [vmem:[#allocation74_spill] sm:$0xff] %v9395_v8  ;;  %v3391_v54 = vld [vmem:[#allocation7 + $0x170] sm:$0xff]  ;;  %v3394_v59 = vld [vmem:[#allocation7 + $0x188] sm:$0xff] }
 0x5d5   :  { %v3340_v27 = vmul.f32 %v3337_v30, %v9098_v28  ;;  %v9404_v4 = vpack.c.bf16 %v3391_v54, %v3387_v38  ;;  %v9408_v28 = vpack.c.bf16 %v3398_v23, %v3394_v59  ;;  %v9410_v30 = vpack.c.bf16 %v3400_v55, %v3396_v24  ;;  %v7810_v38 = vpop.eup %7809  ;;  %v3401_v23 = vld [vmem:[#allocation7 + $0x1c0] sm:$0xff] }
 0x5d6   :  { %v9415_v54 = vpack.c.bf16 %v3397_v61, %v3393_v15  ;;  %v9423_v24 = vpack.c.bf16 %v3408_v51, %v3404_v48  ;;  %v3405_v55 = vld [vmem:[#allocation7 + $0x1e0] sm:$0xff] }
 0x5d7   :  { %v9398_v44 = vadd.f32 %v3341_v41, %v3340_v27  ;;  %6964 = vmatpush1.bf16.msra.mxu0 %v9387_v49  ;;  %6996 = vmatpush1.bf16.msra.mxu1 %v9389_v3  ;;  %v3395_v41 = vld [vmem:[#allocation7 + $0x190] sm:$0xff]  ;;  %v3402_v27 = vld [vmem:[#allocation7 + $0x1c8] sm:$0xff]  ;;  %v9427_v15 = vpack.c.bf16 %v3405_v55, %v3401_v23 }
 0x5d8   :  { %6966 = vmatprep.subr.bf16.mxu0 %v9393_v56  ;;  %6998 = vmatprep.subr.bf16.mxu1 %v9395_v8  ;;  %v3406_v3 = vld [vmem:[#allocation7 + $0x1e8] sm:$0xff]  ;;  %v9417_v8 = vpack.c.bf16 %v3399_v11, %v3395_v41  ;;  %v3403_v56 = vld [vmem:[#allocation7 + $0x1d0] sm:$0xff] }
 0x5d9   :  { %10546 = vst [vmem:[#allocation75_spill] sm:$0xff] %v9398_v44  ;;  %7811 = vtanh.f32 %v9398_v44  ;;  %v9421_v59 = vpack.c.bf16 %v3406_v3, %v3402_v27  ;;  %v3407_v49 = vld [vmem:[#allocation7 + $0x1f0] sm:$0xff]  ;;  %v3335_v44 = vmul.f32 0.5, %v7810_v38  ;;  %v10581_v38 = vld [vmem:[#allocation18_spill] sm:$0xff] }
 0x5da   :  { %v9429_v61 = vpack.c.bf16 %v3407_v49, %v3403_v56 }
 0x5db   :  { %6968 = vmatpush1.bf16.msra.mxu0 %v9402_v60  ;;  %7000 = vmatpush1.bf16.msra.mxu1 %v9404_v4  ;;  %v3338_v3 = vadd.f32 0.5, %v3335_v44  ;;  %v10580_v44 = vld [vmem:[#allocation17_spill] sm:$0xff] }
 0x5dc   :  { %6970 = vmatprep.subr.bf16.mxu0 %v9408_v28  ;;  %7002 = vmatprep.subr.bf16.mxu1 %v9410_v30 }
 0x5df   :  { %6972 = vmatpush1.bf16.msra.mxu0 %v9415_v54  ;;  %7004 = vmatpush1.bf16.msra.mxu1 %v9417_v8 }
 0x5e0   :  { %6974 = vmatprep.subr.bf16.mxu0 %v9421_v59  ;;  %7006 = vmatprep.subr.bf16.mxu1 %v9423_v24 }
 0x5e3   :  { %v7812_v41 = vpop.eup %7811  ;;  %6976 = vmatpush1.bf16.msra.mxu0 %v9427_v15  ;;  %7008 = vmatpush1.bf16.msra.mxu1 %v9429_v61 }
 0x5e4   :  { %7010 = vmatprep.subr.bf16.mxu0 %v9113_v58  ;;  %7042 = vmatprep.subr.bf16.mxu1 %v9115_v1  ;;  %v3344_v11 = vmul.f32 %v7812_v41, %v3338_v3  ;;  %v10547_v58 = vld [vmem:[#allocation23_spill] sm:$0xff]  ;;  %v10548_v1 = vld [vmem:[#allocation24_spill] sm:$0xff] }
 0x5e5   :  { %v10582_v41 = vld [vmem:[#allocation19_spill] sm:$0xff] }
 0x5e6   :  { %3680 = vmatmul.mubr.f32.vlgmr.msra.gmra.mrb[24].mxu0 %v3344_v11  ;;  %3751 = vmatmul.mubr.f32.vlgmr.msra.gmra.mrb[26].mxu1 %v3344_v11 }
 0x5e7   :  { %7012 = vmatpush1.bf16.msra.mxu0 %v9119_v31  ;;  %7044 = vmatpush1.bf16.msra.mxu1 %v9121_v13  ;;  %v10549_v31 = vld [vmem:[#allocation25_spill] sm:$0xff]  ;;  %v10550_v13 = vld [vmem:[#allocation26_spill] sm:$0xff] }
 0x5e8   :  { %7014 = vmatprep.subr.bf16.mxu0 %v9127_v40  ;;  %7046 = vmatprep.subr.bf16.mxu1 %v9129_v26  ;;  %v10551_v40 = vld [vmem:[#allocation27_spill] sm:$0xff]  ;;  %v10552_v26 = vld [vmem:[#allocation28_spill] sm:$0xff] }
 0x5e9   :  { %3916 = vmatprep.mubr.f32.mxu0 %v10296_v12  ;;  %3987 = vmatprep.mubr.f32.mxu1 %v10296_v12 }
 0x5eb   :  { %7016 = vmatpush1.bf16.msra.mxu0 %v9135_v7  ;;  %7048 = vmatpush1.bf16.msra.mxu1 %v9137_v46  ;;  %v10553_v7 = vld [vmem:[#allocation29_spill] sm:$0xff]  ;;  %v10554_v46 = vld [vmem:[#allocation30_spill] sm:$0xff] }
 0x5ec   :  { %7018 = vmatprep.subr.bf16.mxu0 %v9141_v0  ;;  %7050 = vmatprep.subr.bf16.mxu1 %v9143_v47  ;;  %v10555_v0 = vld [vmem:[#allocation31_spill] sm:$0xff]  ;;  %v10556_v47 = vld [vmem:[#allocation32_spill] sm:$0xff] }
 0x5ef   :  { %7020 = vmatpush1.bf16.msra.mxu0 %v9149_v14  ;;  %7052 = vmatpush1.bf16.msra.mxu1 %v9151_v22  ;;  %v10557_v14 = vld [vmem:[#allocation33_spill] sm:$0xff]  ;;  %v10558_v22 = vld [vmem:[#allocation34_spill] sm:$0xff] }
 0x5f0   :  { %7022 = vmatprep.subr.bf16.mxu0 %v9155_v20  ;;  %7054 = vmatprep.subr.bf16.mxu1 %v9157_v25  ;;  %v10559_v20 = vld [vmem:[#allocation35_spill] sm:$0xff]  ;;  %v10560_v25 = vld [vmem:[#allocation36_spill] sm:$0xff] }
 0x5f3   :  { %7024 = vmatpush1.bf16.msra.mxu0 %v9161_v17  ;;  %7056 = vmatpush1.bf16.msra.mxu1 %v9163_v53  ;;  %v10561_v17 = vld [vmem:[#allocation69_spill] sm:$0xff] }
 0x5f4   :  { %7026 = vmatprep.subr.bf16.mxu0 %v9167_v19  ;;  %7058 = vmatprep.subr.bf16.mxu1 %v9169_v37  ;;  %v10562_v53 = vld [vmem:[#allocation37_spill] sm:$0xff]  ;;  %v10563_v19 = vld [vmem:[#allocation38_spill] sm:$0xff]  ;;  %v10564_v37 = vld [vmem:[#allocation39_spill] sm:$0xff] }
 0x5f7   :  { %7028 = vmatpush1.bf16.msra.mxu0 %v9173_v42  ;;  %7060 = vmatpush1.bf16.msra.mxu1 %v9175_v50  ;;  %v10565_v42 = vld [vmem:[#allocation40_spill] sm:$0xff]  ;;  %v10566_v50 = vld [vmem:[#allocation41_spill] sm:$0xff] }
 0x5f8   :  { %7030 = vmatprep.subr.bf16.mxu0 %v9179_v10  ;;  %7062 = vmatprep.subr.bf16.mxu1 %v9181_v6  ;;  %v10567_v10 = vld [vmem:[#allocation42_spill] sm:$0xff]  ;;  %v10568_v6 = vld [vmem:[#allocation43_spill] sm:$0xff] }
 0x5fb   :  { %7032 = vmatpush1.bf16.msra.mxu0 %v9185_v16  ;;  %7064 = vmatpush1.bf16.msra.mxu1 %v9187_v43  ;;  %v10569_v16 = vld [vmem:[#allocation44_spill] sm:$0xff]  ;;  %v10570_v43 = vld [vmem:[#allocation45_spill] sm:$0xff] }
 0x5fc   :  { %7034 = vmatprep.subr.bf16.mxu0 %v9191_v62  ;;  %7066 = vmatprep.subr.bf16.mxu1 %v9193_v57  ;;  %v10571_v62 = vld [vmem:[#allocation46_spill] sm:$0xff]  ;;  %v10572_v57 = vld [vmem:[#allocation47_spill] sm:$0xff] }
 0x5ff   :  { %7036 = vmatpush1.bf16.msra.mxu0 %v9197_v2  ;;  %7068 = vmatpush1.bf16.msra.mxu1 %v9199_v29  ;;  %v10573_v2 = vld [vmem:[#allocation48_spill] sm:$0xff]  ;;  %v10574_v29 = vld [vmem:[#allocation49_spill] sm:$0xff] }
 0x600   :  { %7038 = vmatprep.subr.bf16.mxu0 %v9203_v35  ;;  %7070 = vmatprep.subr.bf16.mxu1 %v9205_v5  ;;  %v10575_v35 = vld [vmem:[#allocation50_spill] sm:$0xff]  ;;  %v10576_v5 = vld [vmem:[#allocation51_spill] sm:$0xff] }
 0x603   :  { %7040 = vmatpush1.bf16.msra.mxu0 %v9209_v21  ;;  %7072 = vmatpush1.bf16.msra.mxu1 %v9211_v45  ;;  %v10577_v21 = vld [vmem:[#allocation52_spill] sm:$0xff]  ;;  %v10578_v45 = vld [vmem:[#allocation53_spill] sm:$0xff] }
 0x604   :  { %7074 = vmatprep.subr.bf16.mxu0 %v9221_v9  ;;  %7106 = vmatprep.subr.bf16.mxu1 %v10547_v58  ;;  %v10579_v9 = vld [vmem:[#allocation54_spill] sm:$0xff]  ;;  %v10583_v58 = vld [vmem:[#allocation20_spill] sm:$0xff] }
 0x606   :  { %3917 = vmatmul.mubr.f32.vlgmr.msra.gmra.mrb[10].mxu0 %v3344_v11  ;;  %3988 = vmatmul.mubr.f32.vlgmr.msra.gmra.mrb[10].mxu1 %v3344_v11 }
 0x607   :  { %7076 = vmatpush1.bf16.msra.mxu0 %v10548_v1  ;;  %7108 = vmatpush1.bf16.msra.mxu1 %v10549_v31 }
 0x608   :  { %7078 = vmatprep.subr.bf16.mxu0 %v10550_v13  ;;  %7110 = vmatprep.subr.bf16.mxu1 %v10551_v40 }
 0x609   :  { %4208 = vmatprep.mubr.f32.mxu0 %v10296_v12  ;;  %4279 = vmatprep.mubr.f32.mxu1 %v10296_v12 }
 0x60b   :  { %7080 = vmatpush1.bf16.msra.mxu0 %v10552_v26  ;;  %7112 = vmatpush1.bf16.msra.mxu1 %v10553_v7 }
 0x60c   :  { %7082 = vmatprep.subr.bf16.mxu0 %v10554_v46  ;;  %7114 = vmatprep.subr.bf16.mxu1 %v10555_v0 }
 0x60f   :  { %7084 = vmatpush1.bf16.msra.mxu0 %v10556_v47  ;;  %7116 = vmatpush1.bf16.msra.mxu1 %v10557_v14 }
 0x610   :  { %7086 = vmatprep.subr.bf16.mxu0 %v10558_v22  ;;  %7118 = vmatprep.subr.bf16.mxu1 %v10559_v20  ;;  %v10584_v22 = vld [vmem:[#allocation55_spill] sm:$0xff] }
 0x613   :  { %7088 = vmatpush1.bf16.msra.mxu0 %v10560_v25  ;;  %7120 = vmatpush1.bf16.msra.mxu1 %v10561_v17 }
 0x614   :  { %7090 = vmatprep.subr.bf16.mxu0 %v10562_v53  ;;  %7122 = vmatprep.subr.bf16.mxu1 %v10563_v19 }
 0x617   :  { %7092 = vmatpush1.bf16.msra.mxu0 %v10564_v37  ;;  %7124 = vmatpush1.bf16.msra.mxu1 %v10565_v42  ;;  %v10585_v42 = vld [vmem:[#allocation67_spill] sm:$0xff] }
 0x618   :  { %7094 = vmatprep.subr.bf16.mxu0 %v10566_v50  ;;  %7126 = vmatprep.subr.bf16.mxu1 %v10567_v10 }
 0x61b   :  { %7096 = vmatpush1.bf16.msra.mxu0 %v10568_v6  ;;  %7128 = vmatpush1.bf16.msra.mxu1 %v10569_v16  ;;  %v10586_v16 = vld [vmem:[#allocation68_spill] sm:$0xff] }
 0x61c   :  { %7098 = vmatprep.subr.bf16.mxu0 %v10570_v43  ;;  %7130 = vmatprep.subr.bf16.mxu1 %v10571_v62 }
 0x61f   :  { %7100 = vmatpush1.bf16.msra.mxu0 %v10572_v57  ;;  %7132 = vmatpush1.bf16.msra.mxu1 %v10573_v2 }
 0x620   :  { %7102 = vmatprep.subr.bf16.mxu0 %v10574_v29  ;;  %7134 = vmatprep.subr.bf16.mxu1 %v10575_v35 }
 0x623   :  { %7104 = vmatpush1.bf16.msra.mxu0 %v10576_v5  ;;  %7136 = vmatpush1.bf16.msra.mxu1 %v10577_v21  ;;  %v10588_v21 = vld [vmem:[#allocation57_spill] sm:$0xff] }
 0x624   :  { %7138 = vmatprep.subr.bf16.mxu0 %v10578_v45  ;;  %7170 = vmatprep.subr.bf16.mxu1 %v10579_v9  ;;  %v10589_v45 = vld [vmem:[#allocation59_spill] sm:$0xff]  ;;  %v10590_v9 = vld [vmem:[#allocation70_spill] sm:$0xff] }
 0x6b9   :  { %v3681_v49 = vpop.f32.mrb[24].mxu0  ;;  %v3752_v56 = vpop.f32.mrb[26].mxu1 }
 0x6ba   :  { %v3757_v27 = vadd.f32 %v3681_v49, %v10580_v44  ;;  %v3683_v48 = vpop.f32.mrb[25].mxu0  ;;  %v3754_v51 = vpop.f32.mrb[27].mxu1  ;;  %v3759_v1 = vadd.f32 %v3752_v56, %v10583_v58  ;;  %v10591_v56 = vld [vmem:[#allocation60_spill] sm:$0xff] }
 0x6bb   :  { %v3758_v23 = vadd.f32 %v3683_v48, %v10581_v38  ;;  %v3760_v11 = vadd.f32 %v3754_v51, %v10582_v41  ;;  %v10593_v48 = vld [vmem:[#allocation62_spill] sm:$0xff] }
 0x6bc   :  { %v3761_v55 = vmul.f32 0.5, %v3757_v27  ;;  %v3763_v31 = vmul.f32 0.5, %v3759_v1  ;;  %v10592_v27 = vld [vmem:[#allocation61_spill] sm:$0xff] }
 0x6bd   :  { %v3762_v3 = vmul.f32 0.5, %v3758_v23 }
 0x6be   :  { %7813 = vtanh.f32 %v3761_v55  ;;  %v10595_v55 = vld [vmem:[#allocation64_spill] sm:$0xff] }
 0x6bf   :  { %7815 = vtanh.f32 %v3762_v3  ;;  %v10596_v3 = vld [vmem:[#allocation73_spill] sm:$0xff] }
 0x6c0   :  { %7817 = vtanh.f32 %v3760_v11 }
 0x6c1   :  { %7819 = vtanh.f32 %v3763_v31 }
 0x6c8   :  { %v7814_v13 = vpop.eup %7813 }
 0x6c9   :  { %v3767_v40 = vmul.f32 0.5, %v7814_v13  ;;  %v7816_v26 = vpop.eup %7815 }
 0x6ca   :  { %v3768_v46 = vmul.f32 0.5, %v7816_v26  ;;  %v7818_v0 = vpop.eup %7817 }
 0x6cb   :  { %v3770_v7 = vadd.f32 0.5, %v3767_v40  ;;  %v7820_v17 = vpop.eup %7819 }
 0x6cc   :  { %v3771_v47 = vadd.f32 0.5, %v3768_v46  ;;  %v3769_v53 = vmul.f32 0.5, %v7820_v17  ;;  %v10598_v46 = vld [vmem:[#allocation75_spill] sm:$0xff]  ;;  %v4466_v17 = vld [vmem:[#allocation4 + $0x38] sm:$0xff] }
 0x6cd   :  { %v3775_v14 = vmul.f32 %v7818_v0, %v3770_v7  ;;  %v10597_v7 = vld [vmem:[#allocation65_spill] sm:$0xff] }
 0x6ce   :  { %v3774_v20 = vmul.f32 %v3771_v47, %v10584_v22  ;;  %v3772_v62 = vadd.f32 0.5, %v3769_v53  ;;  %v10602_v22 = vld [vmem:[#allocation74_spill] sm:$0xff] }
 0x6d0   :  { %v9510_v25 = vadd.f32 %v3775_v14, %v3774_v20  ;;  %v10601_v14 = vld [vmem:[#allocation72_spill] sm:$0xff] }
 0x6d1   :  { %v4462_v20 = vld [vmem:[#allocation4 + $0x18] sm:$0xff] }
 0x6d2   :  { %7821 = vtanh.f32 %v9510_v25 }
 0x6d9   :  { %v3918_v19 = vpop.f32.mrb[10].mxu0  ;;  %v3989_v37 = vpop.f32.mrb[10].mxu1 }
 0x6da   :  { %v7629_v50 = vadd.f32 %v3918_v19, %v10585_v42  ;;  %v3920_v10 = vpop.f32.mrb[11].mxu0  ;;  %v3991_v6 = vpop.f32.mrb[11].mxu1  ;;  %v7645_v49 = vadd.f32 %v3989_v37, %v10590_v9  ;;  %v4459_v19 = vld [vmem:[#allocation4] sm:$0xff] }
 0x6db   :  { %v7630_v43 = vadd.f32 %v3920_v10, %v10586_v16  ;;  %v7646_v35 = vadd.f32 %v3991_v6, %v10360_v18  ;;  %v4463_v37 = vld [vmem:[#allocation4 + $0x20] sm:$0xff]  ;;  %v4472_v10 = vld [vmem:[#allocation4 + $0x68] sm:$0xff]  ;;  %v4470_v6 = vld [vmem:[#allocation4 + $0x58] sm:$0xff] }
 0x6dc   :  { %v3998_v57 = vmul.f32 0.5, %v7629_v50  ;;  %v7822_v2 = vpop.eup %7821  ;;  %v4468_v50 = vld [vmem:[#allocation4 + $0x48] sm:$0xff] }
 0x6dd   :  { %v3999_v29 = vmul.f32 0.5, %v7630_v43  ;;  %v9516_v5 = vmul.f32 %v7822_v2, %v3772_v62  ;;  %v4474_v43 = vld [vmem:[#allocation4 + $0x78] sm:$0xff] }
 0x6de   :  { %7823 = vtanh.f32 %v3998_v57  ;;  %v4471_v57 = vld [vmem:[#allocation4 + $0x60] sm:$0xff] }
 0x6df   :  { %10587 = vst [vmem:[#allocation23_spill] sm:$0xff] %v9516_v5  ;;  %7825 = vtanh.f32 %v3999_v29  ;;  %4209 = vmatmul.mubr.f32.vlgmr.msra.gmra.mrb[26].mxu0 %v9516_v5  ;;  %4280 = vmatmul.mubr.f32.vlgmr.msra.gmra.mrb[28].mxu1 %v9516_v5  ;;  %v9569_v29 = vpack.c.bf16 %v4472_v10, %v4468_v50  ;;  %v4497_v50 = vld [vmem:[#allocation4 + $0x130] sm:$0xff]  ;;  %v4500_v10 = vld [vmem:[#allocation4 + $0x148] sm:$0xff] }
 0x6e0   :  { %7140 = vmatpush1.bf16.msra.mxu0 %v9333_v63  ;;  %7172 = vmatpush1.bf16.msra.mxu1 %v9335_v39  ;;  %7827 = vtanh.f32 %v7646_v35  ;;  %v10594_v63 = vld [vmem:[#allocation63_spill] sm:$0xff]  ;;  %v4000_v39 = vmul.f32 0.5, %v7645_v49  ;;  %v9571_v35 = vpack.c.bf16 %v4474_v43, %v4470_v6  ;;  %v4478_v49 = vld [vmem:[#allocation4 + $0x98] sm:$0xff]  ;;  %v4504_v6 = vld [vmem:[#allocation4 + $0x168] sm:$0xff] }
 0x6e1   :  { %7142 = vmatprep.subr.bf16.mxu0 %v10588_v21  ;;  %7174 = vmatprep.subr.bf16.mxu1 %v10589_v45  ;;  %v4469_v21 = vld [vmem:[#allocation4 + $0x50] sm:$0xff]  ;;  %v4476_v45 = vld [vmem:[#allocation4 + $0x88] sm:$0xff]  ;;  %v4502_v43 = vld [vmem:[#allocation4 + $0x158] sm:$0xff] }
 0x6e2   :  { %4350 = vmatprep.mubr.f32.mxu0 %v10296_v12  ;;  %4421 = vmatprep.mubr.f32.mxu1 %v10296_v12  ;;  %7829 = vtanh.f32 %v4000_v39  ;;  %v4479_v39 = vld [vmem:[#allocation4 + $0xa0] sm:$0xff]  ;;  %v4776_v5 = vld [vmem:[#allocation9 + $0xc8] sm:$0xff] }
 0x6e4   :  { %7144 = vmatpush1.bf16.msra.mxu0 %v10591_v56  ;;  %7176 = vmatpush1.bf16.msra.mxu1 %v10592_v27  ;;  %v4482_v56 = vld [vmem:[#allocation4 + $0xb8] sm:$0xff] }
 0x6e5   :  { %7146 = vmatprep.subr.bf16.mxu0 %v10593_v48  ;;  %7178 = vmatprep.subr.bf16.mxu1 %v10594_v63  ;;  %v4475_v63 = vld [vmem:[#allocation4 + $0x80] sm:$0xff] }
 0x6e8   :  { %v7824_v51 = vpop.eup %7823  ;;  %7148 = vmatpush1.bf16.msra.mxu0 %v10595_v55  ;;  %7180 = vmatpush1.bf16.msra.mxu1 %v10596_v3  ;;  %v4477_v55 = vld [vmem:[#allocation4 + $0x90] sm:$0xff] }
 0x6e9   :  { %v4004_v23 = vmul.f32 0.5, %v7824_v51  ;;  %v7826_v11 = vpop.eup %7825  ;;  %7150 = vmatprep.subr.bf16.mxu0 %v9369_v33  ;;  %7182 = vmatprep.subr.bf16.mxu1 %v9371_v32  ;;  %v10599_v33 = vld [vmem:[#allocation66_spill] sm:$0xff]  ;;  %v10600_v32 = vld [vmem:[#allocation71_spill] sm:$0xff] }
 0x6ea   :  { %v4005_v31 = vmul.f32 0.5, %v7826_v11  ;;  %v7828_v13 = vpop.eup %7827  ;;  %v4481_v3 = vld [vmem:[#allocation4 + $0xb0] sm:$0xff]  ;;  %v4484_v11 = vld [vmem:[#allocation4 + $0xc8] sm:$0xff] }
 0x6eb   :  { %v4007_v1 = vadd.f32 0.5, %v4004_v23  ;;  %v9585_v23 = vpack.c.bf16 %v4482_v56, %v4478_v49  ;;  %v4505_v49 = vld [vmem:[#allocation4 + $0x170] sm:$0xff]  ;;  %v4508_v56 = vld [vmem:[#allocation4 + $0x188] sm:$0xff] }
 0x6ec   :  { %v4008_v40 = vadd.f32 0.5, %v4005_v31  ;;  %7152 = vmatpush1.bf16.msra.mxu0 %v9375_v36  ;;  %7184 = vmatpush1.bf16.msra.mxu1 %v10597_v7  ;;  %v7830_v36 = vpop.eup %7829  ;;  %v4486_v31 = vld [vmem:[#allocation4 + $0xd8] sm:$0xff]  ;;  %v4483_v7 = vld [vmem:[#allocation4 + $0xc0] sm:$0xff] }
 0x6ed   :  { %v4012_v26 = vmul.f32 %v7828_v13, %v4007_v1  ;;  %7154 = vmatprep.subr.bf16.mxu0 %v9381_v34  ;;  %7186 = vmatprep.subr.bf16.mxu1 %v9383_v52  ;;  %v4460_v34 = vld [vmem:[#allocation4 + $0x8] sm:$0xff]  ;;  %v4006_v53 = vmul.f32 0.5, %v7830_v36  ;;  %v4490_v13 = vld [vmem:[#allocation4 + $0xf8] sm:$0xff] }
 0x6ee   :  { %v4011_v0 = vmul.f32 %v4008_v40, %v10598_v46  ;;  %v4464_v52 = vld [vmem:[#allocation4 + $0x28] sm:$0xff]  ;;  %v9591_v40 = vpack.c.bf16 %v4479_v39, %v4475_v63  ;;  %v4487_v46 = vld [vmem:[#allocation4 + $0xe0] sm:$0xff]  ;;  %v4510_v39 = vld [vmem:[#allocation4 + $0x198] sm:$0xff] }
 0x6ef   :  { %v4009_v62 = vadd.f32 0.5, %v4006_v53  ;;  %v4488_v1 = vld [vmem:[#allocation4 + $0xe8] sm:$0xff]  ;;  %v4491_v53 = vld [vmem:[#allocation4 + $0x100] sm:$0xff] }
 0x6f0   :  { %v9540_v47 = vadd.f32 %v4012_v26, %v4011_v0  ;;  %7156 = vmatpush1.bf16.msra.mxu0 %v10599_v33  ;;  %7188 = vmatpush1.bf16.msra.mxu1 %v10600_v32  ;;  %v9593_v26 = vpack.c.bf16 %v4481_v3, %v4477_v55  ;;  %v9597_v0 = vpack.c.bf16 %v4488_v1, %v4484_v11  ;;  %v4485_v32 = vld [vmem:[#allocation4 + $0xd0] sm:$0xff]  ;;  %v4496_v36 = vld [vmem:[#allocation4 + $0x128] sm:$0xff]  ;;  %v4514_v55 = vld [vmem:[#allocation4 + $0x1b8] sm:$0xff] }
 0x6f1   :  { %7158 = vmatprep.subr.bf16.mxu0 %v10601_v14  ;;  %7190 = vmatprep.subr.bf16.mxu1 %v10602_v22  ;;  %v9599_v33 = vpack.c.bf16 %v4490_v13, %v4486_v31  ;;  %v4489_v14 = vld [vmem:[#allocation4 + $0xf0] sm:$0xff]  ;;  %v4492_v22 = vld [vmem:[#allocation4 + $0x108] sm:$0xff]  ;;  %v4507_v1 = vld [vmem:[#allocation4 + $0x180] sm:$0xff] }
 0x6f2   :  { %7831 = vtanh.f32 %v9540_v47  ;;  %v4512_v63 = vld [vmem:[#allocation4 + $0x1a8] sm:$0xff]  ;;  %v4511_v31 = vld [vmem:[#allocation4 + $0x1a0] sm:$0xff] }
 0x6f3   :  { %v9633_v13 = vpack.c.bf16 %v4512_v63, %v4508_v56  ;;  %v4758_v63 = vld [vmem:[#allocation9 + $0x38] sm:$0xff] }
 0x6f4   :  { %7160 = vmatpush1.bf16.msra.mxu0 %v9402_v60  ;;  %7192 = vmatpush1.bf16.msra.mxu1 %v9404_v4  ;;  %v9555_v60 = vpack.c.bf16 %v4464_v52, %v4460_v34  ;;  %v9557_v4 = vpack.c.bf16 %v4466_v17, %v4462_v20  ;;  %v4494_v34 = vld [vmem:[#allocation4 + $0x118] sm:$0xff]  ;;  %v9603_v20 = vpack.c.bf16 %v4487_v46, %v4483_v7  ;;  %v4509_v46 = vld [vmem:[#allocation4 + $0x190] sm:$0xff] }
 0x6f5   :  { %7162 = vmatprep.subr.bf16.mxu0 %v9408_v28  ;;  %7194 = vmatprep.subr.bf16.mxu1 %v9410_v30  ;;  %v4461_v28 = vld [vmem:[#allocation4 + $0x10] sm:$0xff]  ;;  %v4498_v52 = vld [vmem:[#allocation4 + $0x138] sm:$0xff]  ;;  %v9605_v17 = vpack.c.bf16 %v4489_v14, %v4485_v32  ;;  %v9635_v7 = vpack.c.bf16 %v4514_v55, %v4510_v39  ;;  %v4516_v14 = vld [vmem:[#allocation4 + $0x1c8] sm:$0xff] }
 0x6f6   :  { %v4465_v30 = vld [vmem:[#allocation4 + $0x30] sm:$0xff]  ;;  %v4751_v39 = vld [vmem:[#allocation9] sm:$0xff] }
 0x6f7   :  { %v4513_v32 = vld [vmem:[#allocation4 + $0x1b0] sm:$0xff]  ;;  %v4755_v55 = vld [vmem:[#allocation9 + $0x20] sm:$0xff] }
 0x6f8   :  { %7164 = vmatpush1.bf16.msra.mxu0 %v9415_v54  ;;  %7196 = vmatpush1.bf16.msra.mxu1 %v9417_v8  ;;  %v9561_v8 = vpack.c.bf16 %v4463_v37, %v4459_v19  ;;  %v4495_v19 = vld [vmem:[#allocation4 + $0x120] sm:$0xff]  ;;  %v9609_v37 = vpack.c.bf16 %v4496_v36, %v4492_v22  ;;  %v4520_v22 = vld [vmem:[#allocation4 + $0x1e8] sm:$0xff]  ;;  %v4518_v36 = vld [vmem:[#allocation4 + $0x1d8] sm:$0xff] }
 0x6f9   :  { %7166 = vmatprep.subr.bf16.mxu0 %v9421_v59  ;;  %7198 = vmatprep.subr.bf16.mxu1 %v9423_v24  ;;  %v9563_v59 = vpack.c.bf16 %v4465_v30, %v4461_v28  ;;  %v4467_v24 = vld [vmem:[#allocation4 + $0x40] sm:$0xff]  ;;  %v9611_v28 = vpack.c.bf16 %v4498_v52, %v4494_v34  ;;  %v4493_v30 = vld [vmem:[#allocation4 + $0x110] sm:$0xff]  ;;  %v4522_v34 = vld [vmem:[#allocation4 + $0x1f8] sm:$0xff]  ;;  %v9639_v52 = vpack.c.bf16 %v4511_v31, %v4507_v1 }
 0x6fa   :  { %v9577_v27 = vpack.c.bf16 %v4471_v57, %v4467_v24  ;;  %v9617_v24 = vpack.c.bf16 %v4497_v50, %v4493_v30  ;;  %v4499_v57 = vld [vmem:[#allocation4 + $0x140] sm:$0xff]  ;;  %v9645_v30 = vpack.c.bf16 %v4520_v22, %v4516_v14  ;;  %v9647_v50 = vpack.c.bf16 %v4522_v34, %v4518_v36  ;;  %v4760_v14 = vld [vmem:[#allocation9 + $0x48] sm:$0xff]  ;;  %v4762_v36 = vld [vmem:[#allocation9 + $0x58] sm:$0xff] }
 0x6fb   :  { %v9667_v31 = vpack.c.bf16 %v4755_v55, %v4751_v39  ;;  %v4764_v22 = vld [vmem:[#allocation9 + $0x68] sm:$0xff] }
 0x6fc   :  { %v7832_v54 = vpop.eup %7831  ;;  %7168 = vmatpush1.bf16.msra.mxu0 %v9427_v15  ;;  %7200 = vmatpush1.bf16.msra.mxu1 %v9429_v61  ;;  %v4473_v15 = vld [vmem:[#allocation4 + $0x70] sm:$0xff]  ;;  %v4480_v61 = vld [vmem:[#allocation4 + $0xa8] sm:$0xff]  ;;  %v9675_v34 = vpack.c.bf16 %v4764_v22, %v4760_v14  ;;  %v4774_v14 = vld [vmem:[#allocation9 + $0xb8] sm:$0xff] }
 0x6fd   :  { %v9565_v2 = vmul.f32 %v7832_v54, %v4009_v62  ;;  %7202 = vmatprep.subr.bf16.mxu0 %v9555_v60  ;;  %7234 = vmatprep.subr.bf16.mxu1 %v9557_v4  ;;  %v9579_v48 = vpack.c.bf16 %v4473_v15, %v4469_v21  ;;  %v9583_v51 = vpack.c.bf16 %v4480_v61, %v4476_v45  ;;  %v4506_v62 = vld [vmem:[#allocation4 + $0x178] sm:$0xff]  ;;  %v4503_v21 = vld [vmem:[#allocation4 + $0x160] sm:$0xff]  ;;  %v4501_v61 = vld [vmem:[#allocation4 + $0x150] sm:$0xff] }
 0x6fe   :  { %v9615_v54 = vpack.c.bf16 %v4495_v19, %v4491_v53  ;;  %v9621_v15 = vpack.c.bf16 %v4504_v6, %v4500_v10  ;;  %v9623_v45 = vpack.c.bf16 %v4506_v62, %v4502_v43  ;;  %v9627_v3 = vpack.c.bf16 %v4503_v21, %v4499_v57  ;;  %v4515_v19 = vld [vmem:[#allocation4 + $0x1c0] sm:$0xff]  ;;  %v4517_v6 = vld [vmem:[#allocation4 + $0x1d0] sm:$0xff]  ;;  %v4752_v21 = vld [vmem:[#allocation9 + $0x8] sm:$0xff]  ;;  %10604 = vst [vmem:[#allocation25_spill] sm:$0xff] %v9667_v31 }
 0x6ff   :  { %4351 = vmatmul.mubr.f32.vlgmr.msra.gmra.mrb[26].mxu0 %v9565_v2  ;;  %4422 = vmatmul.mubr.f32.vlgmr.msra.gmra.mrb[28].mxu1 %v9565_v2  ;;  %v9629_v11 = vpack.c.bf16 %v4505_v49, %v4501_v61  ;;  %v9641_v53 = vpack.c.bf16 %v4513_v32, %v4509_v46  ;;  %v4519_v10 = vld [vmem:[#allocation4 + $0x1e0] sm:$0xff]  ;;  %v4521_v43 = vld [vmem:[#allocation4 + $0x1f0] sm:$0xff]  ;;  %v4756_v61 = vld [vmem:[#allocation9 + $0x28] sm:$0xff]  ;;  %10606 = vst [vmem:[#allocation27_spill] sm:$0xff] %v9675_v34 }
 0x700   :  { %7204 = vmatpush1.bf16.msra.mxu0 %v9561_v8  ;;  %7236 = vmatpush1.bf16.msra.mxu1 %v9563_v59  ;;  %v9651_v62 = vpack.c.bf16 %v4519_v10, %v4515_v19  ;;  %v9653_v57 = vpack.c.bf16 %v4521_v43, %v4517_v6  ;;  %v4754_v49 = vld [vmem:[#allocation9 + $0x18] sm:$0xff]  ;;  %v9663_v56 = vpack.c.bf16 %v4756_v61, %v4752_v21  ;;  %v4753_v46 = vld [vmem:[#allocation9 + $0x10] sm:$0xff]  ;;  %v4759_v10 = vld [vmem:[#allocation9 + $0x40] sm:$0xff] }
 0x701   :  { %7206 = vmatprep.subr.bf16.mxu0 %v9569_v29  ;;  %7238 = vmatprep.subr.bf16.mxu1 %v9571_v35  ;;  %v9665_v1 = vpack.c.bf16 %v4758_v63, %v4754_v49  ;;  %v4757_v32 = vld [vmem:[#allocation9 + $0x30] sm:$0xff]  ;;  %v4766_v19 = vld [vmem:[#allocation9 + $0x78] sm:$0xff]  ;;  %v4763_v6 = vld [vmem:[#allocation9 + $0x60] sm:$0xff] }
 0x702   :  { %4587 = vmatprep.mubr.f32.mxu0 %v10296_v12  ;;  %4658 = vmatprep.mubr.f32.mxu1 %v10296_v12  ;;  %v9677_v43 = vpack.c.bf16 %v4766_v19, %v4762_v36  ;;  %v9679_v21 = vpack.c.bf16 %v4763_v6, %v4759_v10  ;;  %v4761_v61 = vld [vmem:[#allocation9 + $0x50] sm:$0xff]  ;;  %v4768_v39 = vld [vmem:[#allocation9 + $0x88] sm:$0xff]  ;;  %v4767_v22 = vld [vmem:[#allocation9 + $0x80] sm:$0xff] }
 0x703   :  { %10603 = vst [vmem:[#allocation24_spill] sm:$0xff] %v9665_v1  ;;  %v4765_v49 = vld [vmem:[#allocation9 + $0x70] sm:$0xff]  ;;  %v4772_v55 = vld [vmem:[#allocation9 + $0xa8] sm:$0xff]  ;;  %v4771_v36 = vld [vmem:[#allocation9 + $0xa0] sm:$0xff] }
 0x704   :  { %7208 = vmatpush1.bf16.msra.mxu0 %v9577_v27  ;;  %7240 = vmatpush1.bf16.msra.mxu1 %v9579_v48  ;;  %10607 = vst [vmem:[#allocation28_spill] sm:$0xff] %v9677_v43  ;;  %10608 = vst [vmem:[#allocation29_spill] sm:$0xff] %v9679_v21  ;;  %v9682_v63 = vpack.c.bf16 %v4765_v49, %v4761_v61  ;;  %v9691_v10 = vpack.c.bf16 %v4771_v36, %v4767_v22  ;;  %v4769_v6 = vld [vmem:[#allocation9 + $0x90] sm:$0xff]  ;;  %v4779_v22 = vld [vmem:[#allocation9 + $0xe0] sm:$0xff] }
 0x705   :  { %7210 = vmatprep.subr.bf16.mxu0 %v9583_v51  ;;  %7242 = vmatprep.subr.bf16.mxu1 %v9585_v23  ;;  %v4773_v61 = vld [vmem:[#allocation9 + $0xb0] sm:$0xff] }
 0x706   :  { %10609 = vst [vmem:[#allocation30_spill] sm:$0xff] %v9682_v63  ;;  %10612 = vst [vmem:[#allocation33_spill] sm:$0xff] %v9691_v10  ;;  %v9694_v49 = vpack.c.bf16 %v4773_v61, %v4769_v6  ;;  %v4777_v6 = vld [vmem:[#allocation9 + $0xd0] sm:$0xff] }
 0x707   :  { %v4781_v61 = vld [vmem:[#allocation9 + $0xf0] sm:$0xff] }
 0x708   :  { %7212 = vmatpush1.bf16.msra.mxu0 %v9591_v40  ;;  %7244 = vmatpush1.bf16.msra.mxu1 %v9593_v26  ;;  %10613 = vst [vmem:[#allocation34_spill] sm:$0xff] %v9694_v49 }
 0x709   :  { %7214 = vmatprep.subr.bf16.mxu0 %v9597_v0  ;;  %7246 = vmatprep.subr.bf16.mxu1 %v9599_v33 }
 0x70c   :  { %7216 = vmatpush1.bf16.msra.mxu0 %v9603_v20  ;;  %7248 = vmatpush1.bf16.msra.mxu1 %v9605_v17 }
 0x70d   :  { %7218 = vmatprep.subr.bf16.mxu0 %v9609_v37  ;;  %7250 = vmatprep.subr.bf16.mxu1 %v9611_v28 }
 0x710   :  { %7220 = vmatpush1.bf16.msra.mxu0 %v9615_v54  ;;  %7252 = vmatpush1.bf16.msra.mxu1 %v9617_v24 }
 0x711   :  { %7222 = vmatprep.subr.bf16.mxu0 %v9621_v15  ;;  %7254 = vmatprep.subr.bf16.mxu1 %v9623_v45 }
 0x714   :  { %7224 = vmatpush1.bf16.msra.mxu0 %v9627_v3  ;;  %7256 = vmatpush1.bf16.msra.mxu1 %v9629_v11 }
 0x715   :  { %7226 = vmatprep.subr.bf16.mxu0 %v9633_v13  ;;  %7258 = vmatprep.subr.bf16.mxu1 %v9635_v7 }
 0x718   :  { %7228 = vmatpush1.bf16.msra.mxu0 %v9639_v52  ;;  %7260 = vmatpush1.bf16.msra.mxu1 %v9641_v53 }
 0x719   :  { %7230 = vmatprep.subr.bf16.mxu0 %v9645_v30  ;;  %7262 = vmatprep.subr.bf16.mxu1 %v9647_v50 }
 0x71c   :  { %7232 = vmatpush1.bf16.msra.mxu0 %v9651_v62  ;;  %7264 = vmatpush1.bf16.msra.mxu1 %v9653_v57 }
 0x71d   :  { %7266 = vmatprep.subr.bf16.mxu0 %v9663_v56  ;;  %7298 = vmatprep.subr.bf16.mxu1 %v9665_v1  ;;  %v4708_v1 = vld [vmem:[#allocation7 + $0xa8] sm:$0xff] }
 0x71f   :  { %4588 = vmatmul.mubr.f32.vlgmr.msra.gmra.mrb[12].mxu0 %v9565_v2  ;;  %4659 = vmatmul.mubr.f32.vlgmr.msra.gmra.mrb[12].mxu1 %v9565_v2  ;;  %v9670_v2 = vpack.c.bf16 %v4757_v32, %v4753_v46  ;;  %v4770_v46 = vld [vmem:[#allocation9 + $0x98] sm:$0xff]  ;;  %v9687_v32 = vpack.c.bf16 %v4772_v55, %v4768_v39  ;;  %v4780_v39 = vld [vmem:[#allocation9 + $0xe8] sm:$0xff] }
 0x720   :  { %4879 = vmatprep.mubr.f32.mxu0 %v10296_v12  ;;  %4950 = vmatprep.mubr.f32.mxu1 %v10296_v12  ;;  %v9689_v19 = vpack.c.bf16 %v4774_v14, %v4770_v46  ;;  %v4778_v55 = vld [vmem:[#allocation9 + $0xd8] sm:$0xff]  ;;  %v4775_v14 = vld [vmem:[#allocation9 + $0xc0] sm:$0xff] }
 0x721   :  { %10605 = vst [vmem:[#allocation26_spill] sm:$0xff] %v9670_v2  ;;  %7268 = vmatpush1.bf16.msra.mxu0 %v9667_v31  ;;  %7300 = vmatpush1.bf16.msra.mxu1 %v9670_v2  ;;  %10610 = vst [vmem:[#allocation31_spill] sm:$0xff] %v9687_v32  ;;  %v4782_v46 = vld [vmem:[#allocation9 + $0xf8] sm:$0xff] }
 0x722   :  { %7270 = vmatprep.subr.bf16.mxu0 %v9675_v34  ;;  %7302 = vmatprep.subr.bf16.mxu1 %v9677_v43  ;;  %10611 = vst [vmem:[#allocation32_spill] sm:$0xff] %v9689_v19  ;;  %v9701_v36 = vpack.c.bf16 %v4782_v46, %v4778_v55  ;;  %v4790_v55 = vld [vmem:[#allocation9 + $0x138] sm:$0xff]  ;;  %v4783_v46 = vld [vmem:[#allocation9 + $0x100] sm:$0xff] }
 0x723   :  { %v4802_v43 = vld [vmem:[#allocation9 + $0x198] sm:$0xff] }
 0x724   :  { %10615 = vst [vmem:[#allocation36_spill] sm:$0xff] %v9701_v36 }
 0x725   :  { %7272 = vmatpush1.bf16.msra.mxu0 %v9679_v21  ;;  %7304 = vmatpush1.bf16.msra.mxu1 %v9682_v63  ;;  %v9699_v63 = vpack.c.bf16 %v4780_v39, %v4776_v5  ;;  %v9703_v21 = vpack.c.bf16 %v4779_v22, %v4775_v14  ;;  %v4788_v5 = vld [vmem:[#allocation9 + $0x128] sm:$0xff]  ;;  %v4786_v39 = vld [vmem:[#allocation9 + $0x118] sm:$0xff]  ;;  %v4787_v14 = vld [vmem:[#allocation9 + $0x120] sm:$0xff] }
 0x726   :  { %7274 = vmatprep.subr.bf16.mxu0 %v9687_v32  ;;  %7306 = vmatprep.subr.bf16.mxu1 %v9689_v19  ;;  %v9706_v19 = vpack.c.bf16 %v4781_v61, %v4777_v6  ;;  %v9713_v22 = vpack.c.bf16 %v4790_v55, %v4786_v39  ;;  %v9715_v32 = vpack.c.bf16 %v4787_v14, %v4783_v46  ;;  %v4785_v6 = vld [vmem:[#allocation9 + $0x110] sm:$0xff]  ;;  %v4798_v39 = vld [vmem:[#allocation9 + $0x178] sm:$0xff]  ;;  %v4791_v55 = vld [vmem:[#allocation9 + $0x140] sm:$0xff] }
 0x727   :  { %10614 = vst [vmem:[#allocation35_spill] sm:$0xff] %v9699_v63  ;;  %10616 = vst [vmem:[#allocation69_spill] sm:$0xff] %v9703_v21  ;;  %v4789_v61 = vld [vmem:[#allocation9 + $0x130] sm:$0xff]  ;;  %v4795_v46 = vld [vmem:[#allocation9 + $0x160] sm:$0xff] }
 0x728   :  { %10617 = vst [vmem:[#allocation37_spill] sm:$0xff] %v9706_v19  ;;  %10619 = vst [vmem:[#allocation39_spill] sm:$0xff] %v9713_v22 }
 0x729   :  { %7276 = vmatpush1.bf16.msra.mxu0 %v9691_v10  ;;  %7308 = vmatpush1.bf16.msra.mxu1 %v9694_v49  ;;  %v4784_v49 = vld [vmem:[#allocation9 + $0x108] sm:$0xff]  ;;  %10620 = vst [vmem:[#allocation40_spill] sm:$0xff] %v9715_v32 }
 0x72a   :  { %7278 = vmatprep.subr.bf16.mxu0 %v9699_v63  ;;  %7310 = vmatprep.subr.bf16.mxu1 %v9701_v36  ;;  %v9711_v10 = vpack.c.bf16 %v4788_v5, %v4784_v49  ;;  %v9718_v36 = vpack.c.bf16 %v4789_v61, %v4785_v6  ;;  %v4796_v49 = vld [vmem:[#allocation9 + $0x168] sm:$0xff]  ;;  %v4794_v5 = vld [vmem:[#allocation9 + $0x158] sm:$0xff]  ;;  %v9727_v63 = vpack.c.bf16 %v4795_v46, %v4791_v55  ;;  %v4793_v6 = vld [vmem:[#allocation9 + $0x150] sm:$0xff] }
 0x72b   :  { %v9725_v14 = vpack.c.bf16 %v4798_v39, %v4794_v5  ;;  %v4797_v61 = vld [vmem:[#allocation9 + $0x170] sm:$0xff]  ;;  %v4799_v5 = vld [vmem:[#allocation9 + $0x180] sm:$0xff] }
 0x72c   :  { %10618 = vst [vmem:[#allocation38_spill] sm:$0xff] %v9711_v10  ;;  %10621 = vst [vmem:[#allocation41_spill] sm:$0xff] %v9718_v36  ;;  %v4803_v39 = vld [vmem:[#allocation9 + $0x1a0] sm:$0xff] }
 0x72d   :  { %7280 = vmatpush1.bf16.msra.mxu0 %v9703_v21  ;;  %7312 = vmatpush1.bf16.msra.mxu1 %v9706_v19  ;;  %v4792_v19 = vld [vmem:[#allocation9 + $0x148] sm:$0xff]  ;;  %10623 = vst [vmem:[#allocation43_spill] sm:$0xff] %v9725_v14  ;;  %10624 = vst [vmem:[#allocation44_spill] sm:$0xff] %v9727_v63  ;;  %v9739_v46 = vpack.c.bf16 %v4803_v39, %v4799_v5  ;;  %v4811_v5 = vld [vmem:[#allocation9 + $0x1e0] sm:$0xff] }
 0x72e   :  { %7282 = vmatprep.subr.bf16.mxu0 %v9711_v10  ;;  %7314 = vmatprep.subr.bf16.mxu1 %v9713_v22  ;;  %v9723_v21 = vpack.c.bf16 %v4796_v49, %v4792_v19  ;;  %v9730_v22 = vpack.c.bf16 %v4797_v61, %v4793_v6  ;;  %v4804_v10 = vld [vmem:[#allocation9 + $0x1a8] sm:$0xff]  ;;  %v4806_v49 = vld [vmem:[#allocation9 + $0x1b8] sm:$0xff]  ;;  %v4801_v6 = vld [vmem:[#allocation9 + $0x190] sm:$0xff] }
 0x72f   :  { %v9737_v55 = vpack.c.bf16 %v4806_v49, %v4802_v43  ;;  %10628 = vst [vmem:[#allocation48_spill] sm:$0xff] %v9739_v46  ;;  %v4805_v61 = vld [vmem:[#allocation9 + $0x1b0] sm:$0xff]  ;;  %v4814_v43 = vld [vmem:[#allocation9 + $0x1f8] sm:$0xff]  ;;  %v4807_v49 = vld [vmem:[#allocation9 + $0x1c0] sm:$0xff] }
 0x730   :  { %10622 = vst [vmem:[#allocation42_spill] sm:$0xff] %v9723_v21  ;;  %10625 = vst [vmem:[#allocation45_spill] sm:$0xff] %v9730_v22 }
 0x731   :  { %7284 = vmatpush1.bf16.msra.mxu0 %v9715_v32  ;;  %7316 = vmatpush1.bf16.msra.mxu1 %v9718_v36  ;;  %v4800_v32 = vld [vmem:[#allocation9 + $0x188] sm:$0xff]  ;;  %10627 = vst [vmem:[#allocation47_spill] sm:$0xff] %v9737_v55 }
 0x732   :  { %7286 = vmatprep.subr.bf16.mxu0 %v9723_v21  ;;  %7318 = vmatprep.subr.bf16.mxu1 %v9725_v14  ;;  %v9734_v19 = vpack.c.bf16 %v4804_v10, %v4800_v32  ;;  %v9742_v21 = vpack.c.bf16 %v4805_v61, %v4801_v6  ;;  %v4808_v32 = vld [vmem:[#allocation9 + $0x1c8] sm:$0xff]  ;;  %v9751_v14 = vpack.c.bf16 %v4811_v5, %v4807_v49  ;;  %v4809_v6 = vld [vmem:[#allocation9 + $0x1d0] sm:$0xff] }
 0x733   :  { %v4812_v10 = vld [vmem:[#allocation9 + $0x1e8] sm:$0xff]  ;;  %v4813_v61 = vld [vmem:[#allocation9 + $0x1f0] sm:$0xff] }
 0x734   :  { %10626 = vst [vmem:[#allocation46_spill] sm:$0xff] %v9734_v19  ;;  %10629 = vst [vmem:[#allocation49_spill] sm:$0xff] %v9742_v21 }
 0x735   :  { %7288 = vmatpush1.bf16.msra.mxu0 %v9727_v63  ;;  %7320 = vmatpush1.bf16.msra.mxu1 %v9730_v22  ;;  %v4810_v63 = vld [vmem:[#allocation9 + $0x1d8] sm:$0xff]  ;;  %v9747_v22 = vpack.c.bf16 %v4812_v10, %v4808_v32  ;;  %10632 = vst [vmem:[#allocation52_spill] sm:$0xff] %v9751_v14  ;;  %v4692_v32 = vld [vmem:[#allocation7 + $0x28] sm:$0xff] }
 0x736   :  { %7290 = vmatprep.subr.bf16.mxu0 %v9734_v19  ;;  %7322 = vmatprep.subr.bf16.mxu1 %v9737_v55  ;;  %v9749_v39 = vpack.c.bf16 %v4814_v43, %v4810_v63  ;;  %v9754_v55 = vpack.c.bf16 %v4813_v61, %v4809_v6  ;;  %v4690_v10 = vld [vmem:[#allocation7 + $0x18] sm:$0xff] }
 0x737   :  { %10630 = vst [vmem:[#allocation50_spill] sm:$0xff] %v9747_v22  ;;  %v4694_v63 = vld [vmem:[#allocation7 + $0x38] sm:$0xff] }
 0x738   :  { %10631 = vst [vmem:[#allocation51_spill] sm:$0xff] %v9749_v39  ;;  %10633 = vst [vmem:[#allocation53_spill] sm:$0xff] %v9754_v55  ;;  %v9761_v43 = vpack.c.bf16 %v4694_v63, %v4690_v10 }
 0x739   :  { %7292 = vmatpush1.bf16.msra.mxu0 %v9739_v46  ;;  %7324 = vmatpush1.bf16.msra.mxu1 %v9742_v21  ;;  %v4688_v21 = vld [vmem:[#allocation7 + $0x8] sm:$0xff] }
 0x73a   :  { %7294 = vmatprep.subr.bf16.mxu0 %v9747_v22  ;;  %7326 = vmatprep.subr.bf16.mxu1 %v9749_v39  ;;  %v9759_v46 = vpack.c.bf16 %v4692_v32, %v4688_v21  ;;  %10635 = vst [vmem:[#allocation55_spill] sm:$0xff] %v9761_v43 }
 0x73c   :  { %10634 = vst [vmem:[#allocation54_spill] sm:$0xff] %v9759_v46 }
 0x73d   :  { %7296 = vmatpush1.bf16.msra.mxu0 %v9751_v14  ;;  %7328 = vmatpush1.bf16.msra.mxu1 %v9754_v55 }
 0x73e   :  { %7330 = vmatprep.subr.bf16.mxu0 %v9759_v46  ;;  %7362 = vmatprep.subr.bf16.mxu1 %v9761_v43 }
 0x7d2   :  { %v4352_v49 = vpop.f32.mrb[26].mxu0  ;;  %v4423_v5 = vpop.f32.mrb[28].mxu1 }
 0x7d3   :  { %v4428_v6 = vadd.f32 %v4352_v49, %v10580_v44  ;;  %v4354_v61 = vpop.f32.mrb[27].mxu0  ;;  %v4425_v14 = vpop.f32.mrb[29].mxu1  ;;  %v4430_v32 = vadd.f32 %v4423_v5, %v10583_v58 }
 0x7d4   :  { %v4429_v39 = vadd.f32 %v4354_v61, %v10581_v38  ;;  %v4431_v21 = vadd.f32 %v4425_v14, %v10582_v41  ;;  %v4687_v61 = vld [vmem:[#allocation7] sm:$0xff] }
 0x7d5   :  { %v4432_v22 = vmul.f32 0.5, %v4428_v6  ;;  %v4434_v10 = vmul.f32 0.5, %v4430_v32  ;;  %v4689_v32 = vld [vmem:[#allocation7 + $0x10] sm:$0xff] }
 0x7d6   :  { %v4433_v19 = vmul.f32 0.5, %v4429_v39 }
 0x7d7   :  { %7833 = vtanh.f32 %v4432_v22 }
 0x7d8   :  { %7835 = vtanh.f32 %v4433_v19 }
 0x7d9   :  { %7837 = vtanh.f32 %v4431_v21  ;;  %v4691_v21 = vld [vmem:[#allocation7 + $0x20] sm:$0xff] }
 0x7da   :  { %7839 = vtanh.f32 %v4434_v10  ;;  %v9775_v58 = vpack.c.bf16 %v4691_v21, %v4687_v61  ;;  %v4710_v61 = vld [vmem:[#allocation7 + $0xb8] sm:$0xff] }
 0x7e1   :  { %v7834_v63 = vpop.eup %7833 }
 0x7e2   :  { %v4438_v43 = vmul.f32 0.5, %v7834_v63  ;;  %v7836_v46 = vpop.eup %7835  ;;  %v4693_v63 = vld [vmem:[#allocation7 + $0x30] sm:$0xff] }
 0x7e3   :  { %v4439_v49 = vmul.f32 0.5, %v7836_v46  ;;  %v7838_v44 = vpop.eup %7837  ;;  %v9777_v41 = vpack.c.bf16 %v4693_v63, %v4689_v32  ;;  %v4703_v32 = vld [vmem:[#allocation7 + $0x80] sm:$0xff] }
 0x7e4   :  { %v4441_v55 = vadd.f32 0.5, %v4438_v43  ;;  %v7840_v22 = vpop.eup %7839 }
 0x7e5   :  { %v4442_v36 = vadd.f32 0.5, %v4439_v49  ;;  %v4440_v14 = vmul.f32 0.5, %v7840_v22  ;;  %v4696_v49 = vld [vmem:[#allocation7 + $0x48] sm:$0xff] }
 0x7e6   :  { %v4446_v34 = vmul.f32 %v7838_v44, %v4441_v55  ;;  %v4700_v44 = vld [vmem:[#allocation7 + $0x68] sm:$0xff] }
 0x7e7   :  { %v4445_v6 = vmul.f32 %v4442_v36, %v9510_v25  ;;  %v4702_v36 = vld [vmem:[#allocation7 + $0x78] sm:$0xff]  ;;  %v4443_v55 = vadd.f32 0.5, %v4440_v14  ;;  %v9779_v38 = vpack.c.bf16 %v4700_v44, %v4696_v49  ;;  %v4701_v14 = vld [vmem:[#allocation7 + $0x70] sm:$0xff] }
 0x7e8   :  { %v4705_v44 = vld [vmem:[#allocation7 + $0x90] sm:$0xff] }
 0x7e9   :  { %v9770_v39 = vadd.f32 %v4446_v34, %v4445_v6  ;;  %v4698_v34 = vld [vmem:[#allocation7 + $0x58] sm:$0xff]  ;;  %10637 = vst [vmem:[#allocation59_spill] sm:$0xff] %v9779_v38 }
 0x7eb   :  { %10636 = vst [vmem:[#allocation57_spill] sm:$0xff] %v9770_v39  ;;  %7841 = vtanh.f32 %v9770_v39 }
 0x7f2   :  { %v4589_v19 = vpop.f32.mrb[12].mxu0  ;;  %v4660_v5 = vpop.f32.mrb[12].mxu1 }
 0x7f3   :  { %v7631_v43 = vadd.f32 %v4589_v19, %v10585_v42  ;;  %v4591_v10 = vpop.f32.mrb[13].mxu0  ;;  %v4662_v46 = vpop.f32.mrb[13].mxu1  ;;  %v4695_v19 = vld [vmem:[#allocation7 + $0x40] sm:$0xff] }
 0x7f4   :  { %v7632_v25 = vadd.f32 %v4591_v10, %v10586_v16  ;;  %v4699_v42 = vld [vmem:[#allocation7 + $0x60] sm:$0xff]  ;;  %v7648_v2 = vadd.f32 %v4662_v46, %v10360_v18  ;;  %v9784_v10 = vpack.c.bf16 %v4702_v36, %v4698_v34  ;;  %v4697_v16 = vld [vmem:[#allocation7 + $0x50] sm:$0xff]  ;;  %v4712_v36 = vld [vmem:[#allocation7 + $0xc8] sm:$0xff] }
 0x7f5   :  { %v4669_v6 = vmul.f32 0.5, %v7631_v43  ;;  %v7842_v39 = vpop.eup %7841  ;;  %v4704_v43 = vld [vmem:[#allocation7 + $0x88] sm:$0xff]  ;;  %v9790_v21 = vpack.c.bf16 %v4699_v42, %v4695_v19  ;;  %v4707_v46 = vld [vmem:[#allocation7 + $0xa0] sm:$0xff]  ;;  %v4709_v34 = vld [vmem:[#allocation7 + $0xb0] sm:$0xff] }
 0x7f6   :  { %v4670_v22 = vmul.f32 0.5, %v7632_v25  ;;  %v9782_v31 = vmul.f32 %v7842_v39, %v4443_v55  ;;  %10639 = vst [vmem:[#allocation61_spill] sm:$0xff] %v9784_v10  ;;  %v4706_v25 = vld [vmem:[#allocation7 + $0x98] sm:$0xff]  ;;  %v9792_v39 = vpack.c.bf16 %v4701_v14, %v4697_v16  ;;  %v9796_v63 = vpack.c.bf16 %v4708_v1, %v4704_v43  ;;  %v4716_v42 = vld [vmem:[#allocation7 + $0xe8] sm:$0xff]  ;;  %v4715_v19 = vld [vmem:[#allocation7 + $0xe0] sm:$0xff] }
 0x7f7   :  { %7843 = vtanh.f32 %v4669_v6  ;;  %10640 = vst [vmem:[#allocation62_spill] sm:$0xff] %v9790_v21  ;;  %v9798_v49 = vpack.c.bf16 %v4710_v61, %v4706_v25  ;;  %v7647_v55 = vadd.f32 %v4660_v5, %v10590_v9  ;;  %v4714_v6 = vld [vmem:[#allocation7 + $0xd8] sm:$0xff]  ;;  %v9805_v1 = vpack.c.bf16 %v4707_v46, %v4703_v32  ;;  %v4713_v43 = vld [vmem:[#allocation7 + $0xd0] sm:$0xff]  ;;  %v4720_v61 = vld [vmem:[#allocation7 + $0x108] sm:$0xff] }
 0x7f8   :  { %10638 = vst [vmem:[#allocation60_spill] sm:$0xff] %v9782_v31  ;;  %7845 = vtanh.f32 %v4670_v22  ;;  %4880 = vmatmul.mubr.f32.vlgmr.msra.gmra.mrb[28].mxu0 %v9782_v31  ;;  %4951 = vmatmul.mubr.f32.vlgmr.msra.gmra.mrb[30].mxu1 %v9782_v31  ;;  %10641 = vst [vmem:[#allocation63_spill] sm:$0xff] %v9792_v39  ;;  %v4718_v16 = vld [vmem:[#allocation7 + $0xf8] sm:$0xff]  ;;  %v4711_v22 = vld [vmem:[#allocation7 + $0xc0] sm:$0xff]  ;;  %v9811_v5 = vpack.c.bf16 %v4716_v42, %v4712_v36 }
 0x7f9   :  { %7332 = vmatpush1.bf16.msra.mxu0 %v9775_v58  ;;  %7364 = vmatpush1.bf16.msra.mxu1 %v9777_v41  ;;  %7847 = vtanh.f32 %v7648_v2  ;;  %10642 = vst [vmem:[#allocation64_spill] sm:$0xff] %v9796_v63  ;;  %10643 = vst [vmem:[#allocation73_spill] sm:$0xff] %v9798_v49  ;;  %v9807_v2 = vpack.c.bf16 %v4709_v34, %v4705_v44  ;;  %v9813_v14 = vpack.c.bf16 %v4718_v16, %v4714_v6  ;;  %v4717_v25 = vld [vmem:[#allocation7 + $0xf0] sm:$0xff]  ;;  %v4726_v32 = vld [vmem:[#allocation7 + $0x138] sm:$0xff] }
 0x7fa   :  { %7334 = vmatprep.subr.bf16.mxu0 %v9779_v38  ;;  %7366 = vmatprep.subr.bf16.mxu1 %v9784_v10  ;;  %10644 = vst [vmem:[#allocation65_spill] sm:$0xff] %v9805_v1  ;;  %v4671_v31 = vmul.f32 0.5, %v7647_v55  ;;  %v9817_v34 = vpack.c.bf16 %v4715_v19, %v4711_v22  ;;  %v4719_v36 = vld [vmem:[#allocation7 + $0x100] sm:$0xff]  ;;  %v4732_v19 = vld [vmem:[#allocation7 + $0x168] sm:$0xff] }
 0x7fb   :  { %5021 = vmatprep.mubr.f32.mxu0 %v10296_v12  ;;  %5092 = vmatprep.mubr.f32.mxu1 %v10296_v12  ;;  %10645 = vst [vmem:[#allocation75_spill] sm:$0xff] %v9807_v2  ;;  %v4723_v42 = vld [vmem:[#allocation7 + $0x120] sm:$0xff] }
 0x7fc   :  { %7849 = vtanh.f32 %v4671_v31 }
 0x7fd   :  { %7336 = vmatpush1.bf16.msra.mxu0 %v9790_v21  ;;  %7368 = vmatpush1.bf16.msra.mxu1 %v9792_v39  ;;  %v4724_v21 = vld [vmem:[#allocation7 + $0x128] sm:$0xff]  ;;  %v4722_v39 = vld [vmem:[#allocation7 + $0x118] sm:$0xff] }
 0x7fe   :  { %7338 = vmatprep.subr.bf16.mxu0 %v9796_v63  ;;  %7370 = vmatprep.subr.bf16.mxu1 %v9798_v49  ;;  %v9819_v49 = vpack.c.bf16 %v4717_v25, %v4713_v43  ;;  %v9823_v55 = vpack.c.bf16 %v4724_v21, %v4720_v61  ;;  %v9825_v16 = vpack.c.bf16 %v4726_v32, %v4722_v39  ;;  %v4725_v63 = vld [vmem:[#allocation7 + $0x130] sm:$0xff]  ;;  %v4730_v43 = vld [vmem:[#allocation7 + $0x158] sm:$0xff]  ;;  %v4727_v61 = vld [vmem:[#allocation7 + $0x140] sm:$0xff] }
 0x7ff   :  { %v4734_v25 = vld [vmem:[#allocation7 + $0x178] sm:$0xff]  ;;  %v9829_v21 = vpack.c.bf16 %v4723_v42, %v4719_v36  ;;  %v4731_v32 = vld [vmem:[#allocation7 + $0x160] sm:$0xff] }
 0x800   :  { %10646 = vst [vmem:[#allocation66_spill] sm:$0xff] %v9819_v49  ;;  %v4738_v36 = vld [vmem:[#allocation7 + $0x198] sm:$0xff] }
 0x801   :  { %v7844_v46 = vpop.eup %7843  ;;  %7340 = vmatpush1.bf16.msra.mxu0 %v9805_v1  ;;  %7372 = vmatpush1.bf16.msra.mxu1 %v9807_v2  ;;  %v4728_v1 = vld [vmem:[#allocation7 + $0x148] sm:$0xff]  ;;  %10647 = vst [vmem:[#allocation71_spill] sm:$0xff] %v9829_v21  ;;  %v4742_v42 = vld [vmem:[#allocation7 + $0x1b8] sm:$0xff] }
 0x802   :  { %v4675_v44 = vmul.f32 0.5, %v7844_v46  ;;  %v7846_v6 = vpop.eup %7845  ;;  %7342 = vmatprep.subr.bf16.mxu0 %v9811_v5  ;;  %7374 = vmatprep.subr.bf16.mxu1 %v9813_v14  ;;  %v4721_v46 = vld [vmem:[#allocation7 + $0x110] sm:$0xff]  ;;  %v9835_v31 = vpack.c.bf16 %v4732_v19, %v4728_v1  ;;  %v4735_v19 = vld [vmem:[#allocation7 + $0x180] sm:$0xff] }
 0x803   :  { %v4676_v22 = vmul.f32 0.5, %v7846_v6  ;;  %v7848_v2 = vpop.eup %7847  ;;  %v9831_v39 = vpack.c.bf16 %v4725_v63, %v4721_v46  ;;  %v4729_v6 = vld [vmem:[#allocation7 + $0x150] sm:$0xff]  ;;  %v9844_v46 = vpack.c.bf16 %v4731_v32, %v4727_v61  ;;  %v4746_v61 = vld [vmem:[#allocation7 + $0x1d8] sm:$0xff] }
 0x804   :  { %v4678_v9 = vadd.f32 0.5, %v4675_v44  ;;  %10649 = vst [vmem:[#allocation74_spill] sm:$0xff] %v9835_v31  ;;  %v9837_v44 = vpack.c.bf16 %v4734_v25, %v4730_v43  ;;  %v4739_v43 = vld [vmem:[#allocation7 + $0x1a0] sm:$0xff]  ;;  %v4741_v25 = vld [vmem:[#allocation7 + $0x1b0] sm:$0xff]  ;;  %v4750_v32 = vld [vmem:[#allocation7 + $0x1f8] sm:$0xff] }
 0x805   :  { %v4679_v10 = vadd.f32 0.5, %v4676_v22  ;;  %7344 = vmatpush1.bf16.msra.mxu0 %v9817_v34  ;;  %7376 = vmatpush1.bf16.msra.mxu1 %v9819_v49  ;;  %10648 = vst [vmem:[#allocation72_spill] sm:$0xff] %v9831_v39  ;;  %v4740_v49 = vld [vmem:[#allocation7 + $0x1a8] sm:$0xff] }
 0x806   :  { %v4683_v38 = vmul.f32 %v7848_v2, %v4678_v9  ;;  %7346 = vmatprep.subr.bf16.mxu0 %v9823_v55  ;;  %7378 = vmatprep.subr.bf16.mxu1 %v9825_v16  ;;  %10650 = vst [vmem:[#allocation76_spill] sm:$0xff] %v9837_v44  ;;  %v4733_v9 = vld [vmem:[#allocation7 + $0x170] sm:$0xff]  ;;  %v4736_v2 = vld [vmem:[#allocation7 + $0x188] sm:$0xff] }
 0x807   :  { %v4682_v22 = vmul.f32 %v4679_v10, %v9540_v47  ;;  %v9846_v1 = vpack.c.bf16 %v4733_v9, %v4729_v6  ;;  %v9850_v47 = vpack.c.bf16 %v4740_v49, %v4736_v2  ;;  %v9852_v10 = vpack.c.bf16 %v4742_v42, %v4738_v36  ;;  %v7850_v6 = vpop.eup %7849  ;;  %v4743_v49 = vld [vmem:[#allocation7 + $0x1c0] sm:$0xff] }
 0x808   :  { %v9857_v9 = vpack.c.bf16 %v4739_v43, %v4735_v19  ;;  %v9865_v36 = vpack.c.bf16 %v4750_v32, %v4746_v61  ;;  %v4747_v42 = vld [vmem:[#allocation7 + $0x1e0] sm:$0xff] }
 0x809   :  { %v9840_v63 = vadd.f32 %v4683_v38, %v4682_v22  ;;  %7348 = vmatpush1.bf16.msra.mxu0 %v9829_v21  ;;  %7380 = vmatpush1.bf16.msra.mxu1 %v9831_v39  ;;  %v4737_v38 = vld [vmem:[#allocation7 + $0x190] sm:$0xff]  ;;  %v4744_v22 = vld [vmem:[#allocation7 + $0x1c8] sm:$0xff]  ;;  %v9869_v19 = vpack.c.bf16 %v4747_v42, %v4743_v49 }
 0x80a   :  { %7350 = vmatprep.subr.bf16.mxu0 %v9835_v31  ;;  %7382 = vmatprep.subr.bf16.mxu1 %v9837_v44  ;;  %v4748_v39 = vld [vmem:[#allocation7 + $0x1e8] sm:$0xff]  ;;  %v9859_v44 = vpack.c.bf16 %v4741_v25, %v4737_v38  ;;  %v4745_v31 = vld [vmem:[#allocation7 + $0x1d0] sm:$0xff] }
 0x80b   :  { %10651 = vst [vmem:[#allocation77_spill] sm:$0xff] %v9840_v63  ;;  %7851 = vtanh.f32 %v9840_v63  ;;  %v9863_v2 = vpack.c.bf16 %v4748_v39, %v4744_v22  ;;  %v4749_v21 = vld [vmem:[#allocation7 + $0x1f0] sm:$0xff]  ;;  %v4677_v63 = vmul.f32 0.5, %v7850_v6  ;;  %v10686_v6 = vld [vmem:[#allocation18_spill] sm:$0xff] }
 0x80c   :  { %v9871_v43 = vpack.c.bf16 %v4749_v21, %v4745_v31 }
 0x80d   :  { %7352 = vmatpush1.bf16.msra.mxu0 %v9844_v46  ;;  %7384 = vmatpush1.bf16.msra.mxu1 %v9846_v1  ;;  %v4680_v39 = vadd.f32 0.5, %v4677_v63  ;;  %v10685_v63 = vld [vmem:[#allocation17_spill] sm:$0xff] }
 0x80e   :  { %7354 = vmatprep.subr.bf16.mxu0 %v9850_v47  ;;  %7386 = vmatprep.subr.bf16.mxu1 %v9852_v10 }
 0x811   :  { %7356 = vmatpush1.bf16.msra.mxu0 %v9857_v9  ;;  %7388 = vmatpush1.bf16.msra.mxu1 %v9859_v44 }
 0x812   :  { %7358 = vmatprep.subr.bf16.mxu0 %v9863_v2  ;;  %7390 = vmatprep.subr.bf16.mxu1 %v9865_v36 }
 0x815   :  { %v7852_v38 = vpop.eup %7851  ;;  %7360 = vmatpush1.bf16.msra.mxu0 %v9869_v19  ;;  %7392 = vmatpush1.bf16.msra.mxu1 %v9871_v43 }
 0x816   :  { %7394 = vmatprep.subr.bf16.mxu0 %v9555_v60  ;;  %7426 = vmatprep.subr.bf16.mxu1 %v9557_v4  ;;  %v4686_v25 = vmul.f32 %v7852_v38, %v4680_v39  ;;  %v10652_v60 = vld [vmem:[#allocation24_spill] sm:$0xff]  ;;  %v10653_v4 = vld [vmem:[#allocation25_spill] sm:$0xff]  ;;  %v10687_v38 = vld [vmem:[#allocation19_spill] sm:$0xff] }
 0x818   :  { %5022 = vmatmul.mubr.f32.vlgmr.msra.gmra.mrb[28].mxu0 %v4686_v25  ;;  %5093 = vmatmul.mubr.f32.vlgmr.msra.gmra.mrb[30].mxu1 %v4686_v25 }
 0x819   :  { %7396 = vmatpush1.bf16.msra.mxu0 %v9561_v8  ;;  %7428 = vmatpush1.bf16.msra.mxu1 %v9563_v59  ;;  %v10654_v8 = vld [vmem:[#allocation26_spill] sm:$0xff]  ;;  %v10655_v59 = vld [vmem:[#allocation27_spill] sm:$0xff] }
 0x81a   :  { %7398 = vmatprep.subr.bf16.mxu0 %v9569_v29  ;;  %7430 = vmatprep.subr.bf16.mxu1 %v9571_v35  ;;  %v10656_v29 = vld [vmem:[#allocation28_spill] sm:$0xff]  ;;  %v10657_v35 = vld [vmem:[#allocation29_spill] sm:$0xff] }
 0x81b   :  { %5258 = vmatprep.mubr.f32.mxu0 %v10296_v12  ;;  %5329 = vmatprep.mubr.f32.mxu1 %v10296_v12 }
 0x81d   :  { %7400 = vmatpush1.bf16.msra.mxu0 %v9577_v27  ;;  %7432 = vmatpush1.bf16.msra.mxu1 %v9579_v48  ;;  %v10658_v27 = vld [vmem:[#allocation30_spill] sm:$0xff]  ;;  %v10659_v48 = vld [vmem:[#allocation31_spill] sm:$0xff] }
 0x81e   :  { %7402 = vmatprep.subr.bf16.mxu0 %v9583_v51  ;;  %7434 = vmatprep.subr.bf16.mxu1 %v9585_v23  ;;  %v10660_v51 = vld [vmem:[#allocation32_spill] sm:$0xff]  ;;  %v10661_v23 = vld [vmem:[#allocation33_spill] sm:$0xff] }
 0x821   :  { %7404 = vmatpush1.bf16.msra.mxu0 %v9591_v40  ;;  %7436 = vmatpush1.bf16.msra.mxu1 %v9593_v26  ;;  %v10662_v40 = vld [vmem:[#allocation34_spill] sm:$0xff]  ;;  %v10663_v26 = vld [vmem:[#allocation35_spill] sm:$0xff] }
 0x822   :  { %7406 = vmatprep.subr.bf16.mxu0 %v9597_v0  ;;  %7438 = vmatprep.subr.bf16.mxu1 %v9599_v33  ;;  %v10664_v0 = vld [vmem:[#allocation36_spill] sm:$0xff]  ;;  %v10665_v33 = vld [vmem:[#allocation69_spill] sm:$0xff] }
 0x825   :  { %7408 = vmatpush1.bf16.msra.mxu0 %v9603_v20  ;;  %7440 = vmatpush1.bf16.msra.mxu1 %v9605_v17  ;;  %v10666_v20 = vld [vmem:[#allocation37_spill] sm:$0xff]  ;;  %v10667_v17 = vld [vmem:[#allocation38_spill] sm:$0xff] }
 0x826   :  { %7410 = vmatprep.subr.bf16.mxu0 %v9609_v37  ;;  %7442 = vmatprep.subr.bf16.mxu1 %v9611_v28  ;;  %v10668_v37 = vld [vmem:[#allocation39_spill] sm:$0xff]  ;;  %v10669_v28 = vld [vmem:[#allocation40_spill] sm:$0xff] }
 0x829   :  { %7412 = vmatpush1.bf16.msra.mxu0 %v9615_v54  ;;  %7444 = vmatpush1.bf16.msra.mxu1 %v9617_v24  ;;  %v10670_v54 = vld [vmem:[#allocation41_spill] sm:$0xff]  ;;  %v10671_v24 = vld [vmem:[#allocation42_spill] sm:$0xff] }
 0x82a   :  { %7414 = vmatprep.subr.bf16.mxu0 %v9621_v15  ;;  %7446 = vmatprep.subr.bf16.mxu1 %v9623_v45  ;;  %v10672_v15 = vld [vmem:[#allocation43_spill] sm:$0xff]  ;;  %v10673_v45 = vld [vmem:[#allocation44_spill] sm:$0xff] }
 0x82d   :  { %7416 = vmatpush1.bf16.msra.mxu0 %v9627_v3  ;;  %7448 = vmatpush1.bf16.msra.mxu1 %v9629_v11  ;;  %v10674_v3 = vld [vmem:[#allocation45_spill] sm:$0xff]  ;;  %v10675_v11 = vld [vmem:[#allocation46_spill] sm:$0xff] }
 0x82e   :  { %7418 = vmatprep.subr.bf16.mxu0 %v9633_v13  ;;  %7450 = vmatprep.subr.bf16.mxu1 %v9635_v7  ;;  %v10676_v13 = vld [vmem:[#allocation47_spill] sm:$0xff]  ;;  %v10677_v7 = vld [vmem:[#allocation48_spill] sm:$0xff] }
 0x831   :  { %7420 = vmatpush1.bf16.msra.mxu0 %v9639_v52  ;;  %7452 = vmatpush1.bf16.msra.mxu1 %v9641_v53  ;;  %v10678_v52 = vld [vmem:[#allocation49_spill] sm:$0xff]  ;;  %v10679_v53 = vld [vmem:[#allocation50_spill] sm:$0xff] }
 0x832   :  { %7422 = vmatprep.subr.bf16.mxu0 %v9645_v30  ;;  %7454 = vmatprep.subr.bf16.mxu1 %v9647_v50  ;;  %v10680_v30 = vld [vmem:[#allocation51_spill] sm:$0xff]  ;;  %v10681_v50 = vld [vmem:[#allocation52_spill] sm:$0xff] }
 0x835   :  { %7424 = vmatpush1.bf16.msra.mxu0 %v9651_v62  ;;  %7456 = vmatpush1.bf16.msra.mxu1 %v9653_v57  ;;  %v10682_v62 = vld [vmem:[#allocation53_spill] sm:$0xff]  ;;  %v10683_v57 = vld [vmem:[#allocation54_spill] sm:$0xff] }
 0x836   :  { %7458 = vmatprep.subr.bf16.mxu0 %v9663_v56  ;;  %7490 = vmatprep.subr.bf16.mxu1 %v10652_v60  ;;  %v10684_v56 = vld [vmem:[#allocation55_spill] sm:$0xff]  ;;  %v10688_v60 = vld [vmem:[#allocation20_spill] sm:$0xff] }
 0x838   :  { %5259 = vmatmul.mubr.f32.vlgmr.msra.gmra.mrb[14].mxu0 %v4686_v25  ;;  %5330 = vmatmul.mubr.f32.vlgmr.msra.gmra.mrb[14].mxu1 %v4686_v25 }
 0x839   :  { %7460 = vmatpush1.bf16.msra.mxu0 %v10653_v4  ;;  %7492 = vmatpush1.bf16.msra.mxu1 %v10654_v8 }
 0x83a   :  { %7462 = vmatprep.subr.bf16.mxu0 %v10655_v59  ;;  %7494 = vmatprep.subr.bf16.mxu1 %v10656_v29 }
 0x83b   :  { %5550 = vmatprep.mubr.f32.mxu0 %v10296_v12  ;;  %5621 = vmatprep.mubr.f32.mxu1 %v10296_v12 }
 0x83d   :  { %7464 = vmatpush1.bf16.msra.mxu0 %v10657_v35  ;;  %7496 = vmatpush1.bf16.msra.mxu1 %v10658_v27 }
 0x83e   :  { %7466 = vmatprep.subr.bf16.mxu0 %v10659_v48  ;;  %7498 = vmatprep.subr.bf16.mxu1 %v10660_v51 }
 0x841   :  { %7468 = vmatpush1.bf16.msra.mxu0 %v10661_v23  ;;  %7500 = vmatpush1.bf16.msra.mxu1 %v10662_v40 }
 0x842   :  { %7470 = vmatprep.subr.bf16.mxu0 %v10663_v26  ;;  %7502 = vmatprep.subr.bf16.mxu1 %v10664_v0  ;;  %v10689_v26 = vld [vmem:[#allocation57_spill] sm:$0xff] }
 0x845   :  { %7472 = vmatpush1.bf16.msra.mxu0 %v10665_v33  ;;  %7504 = vmatpush1.bf16.msra.mxu1 %v10666_v20 }
 0x846   :  { %7474 = vmatprep.subr.bf16.mxu0 %v10667_v17  ;;  %7506 = vmatprep.subr.bf16.mxu1 %v10668_v37 }
 0x849   :  { %7476 = vmatpush1.bf16.msra.mxu0 %v10669_v28  ;;  %7508 = vmatpush1.bf16.msra.mxu1 %v10670_v54  ;;  %v10690_v54 = vld [vmem:[#allocation67_spill] sm:$0xff] }
 0x84a   :  { %7478 = vmatprep.subr.bf16.mxu0 %v10671_v24  ;;  %7510 = vmatprep.subr.bf16.mxu1 %v10672_v15 }
 0x84d   :  { %7480 = vmatpush1.bf16.msra.mxu0 %v10673_v45  ;;  %7512 = vmatpush1.bf16.msra.mxu1 %v10674_v3  ;;  %v10691_v3 = vld [vmem:[#allocation68_spill] sm:$0xff] }
 0x84e   :  { %7482 = vmatprep.subr.bf16.mxu0 %v10675_v11  ;;  %7514 = vmatprep.subr.bf16.mxu1 %v10676_v13 }
 0x851   :  { %7484 = vmatpush1.bf16.msra.mxu0 %v10677_v7  ;;  %7516 = vmatpush1.bf16.msra.mxu1 %v10678_v52 }
 0x852   :  { %7486 = vmatprep.subr.bf16.mxu0 %v10679_v53  ;;  %7518 = vmatprep.subr.bf16.mxu1 %v10680_v30 }
 0x855   :  { %7488 = vmatpush1.bf16.msra.mxu0 %v10681_v50  ;;  %7520 = vmatpush1.bf16.msra.mxu1 %v10682_v62  ;;  %v10692_v62 = vld [vmem:[#allocation59_spill] sm:$0xff] }
 0x856   :  { %7522 = vmatprep.subr.bf16.mxu0 %v10683_v57  ;;  %7554 = vmatprep.subr.bf16.mxu1 %v10684_v56  ;;  %v10693_v57 = vld [vmem:[#allocation61_spill] sm:$0xff]  ;;  %v10694_v56 = vld [vmem:[#allocation70_spill] sm:$0xff] }
 0x8eb   :  { %v5023_v21 = vpop.f32.mrb[28].mxu0  ;;  %v5094_v31 = vpop.f32.mrb[30].mxu1 }
 0x8ec   :  { %v5099_v22 = vadd.f32 %v5023_v21, %v10685_v63  ;;  %v5025_v61 = vpop.f32.mrb[29].mxu0  ;;  %v5096_v32 = vpop.f32.mrb[31].mxu1  ;;  %v5101_v4 = vadd.f32 %v5094_v31, %v10688_v60  ;;  %v10696_v31 = vld [vmem:[#allocation63_spill] sm:$0xff] }
 0x8ed   :  { %v5100_v49 = vadd.f32 %v5025_v61, %v10686_v6  ;;  %v5102_v25 = vadd.f32 %v5096_v32, %v10687_v38 }
 0x8ee   :  { %v5103_v42 = vmul.f32 0.5, %v5099_v22  ;;  %v5105_v8 = vmul.f32 0.5, %v5101_v4  ;;  %v10697_v22 = vld [vmem:[#allocation64_spill] sm:$0xff] }
 0x8ef   :  { %v5104_v39 = vmul.f32 0.5, %v5100_v49  ;;  %v10699_v49 = vld [vmem:[#allocation65_spill] sm:$0xff] }
 0x8f0   :  { %7853 = vtanh.f32 %v5103_v42  ;;  %v10700_v42 = vld [vmem:[#allocation75_spill] sm:$0xff] }
 0x8f1   :  { %7855 = vtanh.f32 %v5104_v39 }
 0x8f2   :  { %7857 = vtanh.f32 %v5102_v25 }
 0x8f3   :  { %7859 = vtanh.f32 %v5105_v8 }
 0x8fa   :  { %v7854_v59 = vpop.eup %7853 }
 0x8fb   :  { %v5109_v29 = vmul.f32 0.5, %v7854_v59  ;;  %v7856_v35 = vpop.eup %7855 }
 0x8fc   :  { %v5110_v48 = vmul.f32 0.5, %v7856_v35  ;;  %v7858_v51 = vpop.eup %7857  ;;  %v10702_v35 = vld [vmem:[#allocation77_spill] sm:$0xff] }
 0x8fd   :  { %v5112_v27 = vadd.f32 0.5, %v5109_v29  ;;  %v7860_v20 = vpop.eup %7859  ;;  %v10701_v29 = vld [vmem:[#allocation66_spill] sm:$0xff] }
 0x8fe   :  { %v5113_v23 = vadd.f32 0.5, %v5110_v48  ;;  %v5111_v17 = vmul.f32 0.5, %v7860_v20 }
 0x8ff   :  { %v5117_v40 = vmul.f32 %v7858_v51, %v5112_v27  ;;  %v10705_v51 = vld [vmem:[#allocation74_spill] sm:$0xff] }
 0x900   :  { %v5116_v0 = vmul.f32 %v5113_v23, %v10689_v26  ;;  %v5114_v13 = vadd.f32 0.5, %v5111_v17  ;;  %v10706_v23 = vld [vmem:[#allocation76_spill] sm:$0xff]  ;;  %v5806_v17 = vld [vmem:[#allocation10 + $0x20] sm:$0xff] }
 0x902   :  { %v9952_v33 = vadd.f32 %v5117_v40, %v5116_v0  ;;  %v5804_v0 = vld [vmem:[#allocation10 + $0x10] sm:$0xff] }
 0x904   :  { %7861 = vtanh.f32 %v9952_v33 }
 0x90b   :  { %v5260_v37 = vpop.f32.mrb[14].mxu0  ;;  %v5331_v28 = vpop.f32.mrb[14].mxu1 }
 0x90c   :  { %v7633_v24 = vadd.f32 %v5260_v37, %v10690_v54  ;;  %v5262_v15 = vpop.f32.mrb[15].mxu0  ;;  %v5333_v45 = vpop.f32.mrb[15].mxu1  ;;  %v7649_v21 = vadd.f32 %v5331_v28, %v10694_v56  ;;  %v5809_v37 = vld [vmem:[#allocation10 + $0x38] sm:$0xff]  ;;  %v5811_v54 = vld [vmem:[#allocation10 + $0x48] sm:$0xff]  ;;  %v10711_v56 = vld [vmem:[#allocation23_spill] sm:$0xff] }
 0x90d   :  { %v7634_v11 = vadd.f32 %v5262_v15, %v10691_v3  ;;  %v7650_v30 = vadd.f32 %v5333_v45, %v10360_v18  ;;  %v10695_v18 = vld [vmem:[#allocation62_spill] sm:$0xff]  ;;  %v5813_v15 = vld [vmem:[#allocation10 + $0x58] sm:$0xff]  ;;  %v5814_v3 = vld [vmem:[#allocation10 + $0x60] sm:$0xff] }
 0x90e   :  { %v5340_v7 = vmul.f32 0.5, %v7633_v24  ;;  %v7862_v52 = vpop.eup %7861  ;;  %v5812_v24 = vld [vmem:[#allocation10 + $0x50] sm:$0xff] }
 0x90f   :  { %v5341_v53 = vmul.f32 0.5, %v7634_v11  ;;  %v9958_v50 = vmul.f32 %v7862_v52, %v5114_v13  ;;  %v7605_v45 = vpack.c.bf16 %v5813_v15, %v5812_v24  ;;  %v5815_v11 = vld [vmem:[#allocation10 + $0x68] sm:$0xff]  ;;  %v5817_v52 = vld [vmem:[#allocation10 + $0x78] sm:$0xff] }
 0x910   :  { %7863 = vtanh.f32 %v5340_v7  ;;  %v7609_v13 = vpack.c.bf16 %v5815_v11, %v5814_v3  ;;  %v5816_v7 = vld [vmem:[#allocation10 + $0x70] sm:$0xff] }
 0x911   :  { %7865 = vtanh.f32 %v5341_v53  ;;  %5551 = vmatmul.mubr.f32.vlgmr.msra.gmra.mrb[30].mxu0 %v9958_v50  ;;  %5622 = vmatmul.mubr.f32.vlgmr.msra.gmra.mrb[32].mxu1 %v9958_v50  ;;  %v7613_v53 = vpack.c.bf16 %v5817_v52, %v5816_v7 }
 0x912   :  { %7524 = vmatpush1.bf16.msra.mxu0 %v9775_v58  ;;  %7556 = vmatpush1.bf16.msra.mxu1 %v9777_v41  ;;  %7867 = vtanh.f32 %v7650_v30  ;;  %v10698_v58 = vld [vmem:[#allocation73_spill] sm:$0xff]  ;;  %v5342_v41 = vmul.f32 0.5, %v7649_v21  ;;  %v10708_v30 = vld [vmem:[#allocation56_spill] sm:$0xff] }
 0x913   :  { %7526 = vmatprep.subr.bf16.mxu0 %v10692_v62  ;;  %7558 = vmatprep.subr.bf16.mxu1 %v10693_v57  ;;  %v10709_v62 = vld [vmem:[#allocation22_spill] sm:$0xff]  ;;  %v10712_v21 = vld [vmem:[#allocation60_spill] sm:$0xff] }
 0x914   :  { %5692 = vmatprep.mubr.f32.mxu0 %v10296_v12  ;;  %5763 = vmatprep.mubr.f32.mxu1 %v10296_v12  ;;  %7869 = vtanh.f32 %v5342_v41  ;;  %v10710_v57 = vld [vmem:[#allocation58_spill] sm:$0xff] }
 0x916   :  { %7528 = vmatpush1.bf16.msra.mxu0 %v10695_v18  ;;  %7560 = vmatpush1.bf16.msra.mxu1 %v10696_v31 }
 0x917   :  { %7530 = vmatprep.subr.bf16.mxu0 %v10697_v22  ;;  %7562 = vmatprep.subr.bf16.mxu1 %v10698_v58 }
 0x91a   :  { %v7864_v61 = vpop.eup %7863  ;;  %7532 = vmatpush1.bf16.msra.mxu0 %v10699_v49  ;;  %7564 = vmatpush1.bf16.msra.mxu1 %v10700_v42 }
 0x91b   :  { %v5346_v32 = vmul.f32 0.5, %v7864_v61  ;;  %v7866_v39 = vpop.eup %7865  ;;  %7534 = vmatprep.subr.bf16.mxu0 %v9811_v5  ;;  %7566 = vmatprep.subr.bf16.mxu1 %v9813_v14  ;;  %v10703_v5 = vld [vmem:[#allocation71_spill] sm:$0xff]  ;;  %v10704_v14 = vld [vmem:[#allocation72_spill] sm:$0xff] }
 0x91c   :  { %v5347_v25 = vmul.f32 0.5, %v7866_v39  ;;  %v7868_v4 = vpop.eup %7867 }
 0x91d   :  { %v5349_v12 = vadd.f32 0.5, %v5346_v32 }
 0x91e   :  { %v5350_v8 = vadd.f32 0.5, %v5347_v25  ;;  %7536 = vmatpush1.bf16.msra.mxu0 %v9817_v34  ;;  %7568 = vmatpush1.bf16.msra.mxu1 %v10701_v29  ;;  %v7870_v40 = vpop.eup %7869  ;;  %v5802_v34 = vld [vmem:[#allocation10] sm:$0xff] }
 0x91f   :  { %v5354_v59 = vmul.f32 %v7868_v4, %v5349_v12  ;;  %7538 = vmatprep.subr.bf16.mxu0 %v9823_v55  ;;  %7570 = vmatprep.subr.bf16.mxu1 %v9825_v16  ;;  %v5803_v55 = vld [vmem:[#allocation10 + $0x8] sm:$0xff]  ;;  %v5348_v16 = vmul.f32 0.5, %v7870_v40 }
 0x920   :  { %v5353_v27 = vmul.f32 %v5350_v8, %v10702_v35  ;;  %v7585_v26 = vpack.c.bf16 %v5803_v55, %v5802_v34 }
 0x921   :  { %v5351_v20 = vadd.f32 0.5, %v5348_v16 }
 0x922   :  { %v5355_v48 = vadd.f32 %v5354_v59, %v5353_v27  ;;  %7540 = vmatpush1.bf16.msra.mxu0 %v10703_v5  ;;  %7572 = vmatpush1.bf16.msra.mxu1 %v10704_v14 }
 0x923   :  { %7542 = vmatprep.subr.bf16.mxu0 %v10705_v51  ;;  %7574 = vmatprep.subr.bf16.mxu1 %v10706_v23 }
 0x924   :  { %7871 = vtanh.f32 %v5355_v48 }
 0x926   :  { %7544 = vmatpush1.bf16.msra.mxu0 %v9844_v46  ;;  %7576 = vmatpush1.bf16.msra.mxu1 %v9846_v1  ;;  %v5805_v46 = vld [vmem:[#allocation10 + $0x18] sm:$0xff] }
 0x927   :  { %7546 = vmatprep.subr.bf16.mxu0 %v9850_v47  ;;  %7578 = vmatprep.subr.bf16.mxu1 %v9852_v10  ;;  %v7589_v10 = vpack.c.bf16 %v5805_v46, %v5804_v0 }
 0x92a   :  { %7548 = vmatpush1.bf16.msra.mxu0 %v9857_v9  ;;  %7580 = vmatpush1.bf16.msra.mxu1 %v9859_v44  ;;  %v5807_v9 = vld [vmem:[#allocation10 + $0x28] sm:$0xff]  ;;  %v10707_v44 = vld [vmem:[#allocation21_spill] sm:$0xff] }
 0x92b   :  { %7550 = vmatprep.subr.bf16.mxu0 %v9863_v2  ;;  %7582 = vmatprep.subr.bf16.mxu1 %v9865_v36  ;;  %v7593_v2 = vpack.c.bf16 %v5807_v9, %v5806_v17  ;;  %v5808_v36 = vld [vmem:[#allocation10 + $0x30] sm:$0xff] }
 0x92c   :  { %v7597_v28 = vpack.c.bf16 %v5809_v37, %v5808_v36 }
 0x92e   :  { %v7872_v1 = vpop.eup %7871  ;;  %7552 = vmatpush1.bf16.msra.mxu0 %v9869_v19  ;;  %7584 = vmatpush1.bf16.msra.mxu1 %v9871_v43  ;;  %v5810_v19 = vld [vmem:[#allocation10 + $0x40] sm:$0xff] }
 0x92f   :  { %v5357_v47 = vmul.f32 %v7872_v1, %v5351_v20  ;;  %7586 = vmatprep.subr.bf16.mxu0 %v7585_v26  ;;  %v7601_v43 = vpack.c.bf16 %v5811_v54, %v5810_v19 }
 0x931   :  { %5693 = vmatmul.mubr.f32.vlgmr.msra.gmra.mrb[30].mxu0 %v5357_v47  ;;  %5764 = vmatmul.mubr.f32.vlgmr.msra.gmra.mrb[32].mxu1 %v5357_v47 }
 0x932   :  { %7588 = vmatpush3.bf16.msra.mxu0 %v7585_v26  ;;  %6037 = vmatprep.mubr.f32.mxu0 %v10707_v44 }
 0x933   :  { %7590 = vmatprep.subr.bf16.mxu0 %v7589_v10 }
 0x936   :  { %7592 = vmatpush3.bf16.msra.mxu0 %v7589_v10 }
 0x937   :  { %7594 = vmatprep.subr.bf16.mxu0 %v7593_v2 }
 0x93a   :  { %7596 = vmatpush3.bf16.msra.mxu0 %v7593_v2 }
 0x93b   :  { %7598 = vmatprep.subr.bf16.mxu0 %v7597_v28 }
 0x93e   :  { %7600 = vmatpush3.bf16.msra.mxu0 %v7597_v28 }
 0x93f   :  { %7602 = vmatprep.subr.bf16.mxu0 %v7601_v43 }
 0x942   :  { %7604 = vmatpush3.bf16.msra.mxu0 %v7601_v43 }
 0x943   :  { %7606 = vmatprep.subr.bf16.mxu0 %v7605_v45 }
 0x946   :  { %7608 = vmatpush3.bf16.msra.mxu0 %v7605_v45 }
 0x947   :  { %7610 = vmatprep.subr.bf16.mxu0 %v7609_v13 }
 0x94a   :  { %7612 = vmatpush3.bf16.msra.mxu0 %v7609_v13 }
 0x94b   :  { %7614 = vmatprep.subr.bf16.mxu0 %v7613_v53 }
 0x94e   :  { %7616 = vmatpush3.bf16.msra.mxu0 %v7613_v53 }
 0x951   :  { %6038 = vmatmul.mubr.f32.vlgmr.msra.gmra.mrb[32].mxu0 %v10708_v30 }
 0x952   :  { %6040 = vmatprep.mubr.f32.mxu0 %v10709_v62 }
 0x955   :  { %6041 = vmatmul.mubr.f32.gmra.mrb[34].mxu0 %v10710_v57 }
 0x956   :  { %6043 = vmatprep.mubr.f32.mxu0 %v10711_v56 }
 0x959   :  { %6044 = vmatmul.mubr.f32.gmra.mrb[36].mxu0 %v10712_v21 }
 0x95a   :  { %6046 = vmatprep.mubr.f32.mxu0 %v9958_v50 }
 0xa04   :  { %v5694_v18 = vpop.f32.mrb[30].mxu0  ;;  %v5765_v31 = vpop.f32.mrb[32].mxu1 }
 0xa05   :  { %v5770_v22 = vadd.f32 %v5694_v18, %v10685_v63  ;;  %v5696_v58 = vpop.f32.mrb[31].mxu0  ;;  %v5767_v41 = vpop.f32.mrb[33].mxu1  ;;  %v5772_v39 = vadd.f32 %v5765_v31, %v10688_v60 }
 0xa06   :  { %v5771_v61 = vadd.f32 %v5696_v58, %v10686_v6  ;;  %v5773_v42 = vadd.f32 %v5767_v41, %v10687_v38  ;;  %v5980_v38 = vld [vmem:[%s10034_s8] ss:$0 sm:$0xff]  ;;  %s8010_s8 = smov [#allocation12]  }
 0xa07   :  { %v5774_v32 = vmul.f32 0.5, %v5770_v22  ;;  %v5776_v12 = vmul.f32 0.5, %v5772_v39  ;;  %s5943_s20 = sshll.u32 %s8010_s8, 4  ;;  %s5944_s20 = int_to_ptr.vmem [resolvable:$true] %s5943_s20 }
 0xa08   :  { %v5775_v49 = vmul.f32 0.5, %v5771_v61  ;;  %s7971_s7 = scalar_lea.vmem %s5944_s20, 1024  ;;  %p7976_p5 = scmp.lt.s32.totalorder %s5944_s20, %s5944_s20 }
 0xa09   :  { %7873 = vtanh.f32 %v5774_v32  ;;  %p7972_p4 = scmp.ne.s32.totalorder %s5944_s20, %s7971_s7  ;;  %p7977_p6 = scmp.lt.s32.totalorder %s7971_s7, %s7971_s7 }
 0xa0a   :  { %7875 = vtanh.f32 %v5775_v49 }
 0xa0b   :  { %7877 = vtanh.f32 %v5773_v42  ;;  %p7978_p7 = por %p7977_p6, %p7976_p5 }
 0xa0c   :  { %7879 = vtanh.f32 %v5776_v12 }
 0xa0d   :  { %p7979_p8 = pnand %p7978_p7, %p7972_p4 }
 0xa13   :  { %v7874_v25 = vpop.eup %7873 }
 0xa14   :  { %v5780_v50 = vmul.f32 0.5, %v7874_v25  ;;  %v7876_v4 = vpop.eup %7875 }
 0xa15   :  { %v5781_v63 = vmul.f32 0.5, %v7876_v4  ;;  %v7878_v59 = vpop.eup %7877 }
 0xa16   :  { %v5783_v8 = vadd.f32 0.5, %v5780_v50  ;;  %v7880_v48 = vpop.eup %7879 }
 0xa17   :  { %v5784_v29 = vadd.f32 0.5, %v5781_v63  ;;  %v5782_v60 = vmul.f32 0.5, %v7880_v48 }
 0xa18   :  { %v5788_v35 = vmul.f32 %v7878_v59, %v5783_v8 }
 0xa19   :  { %v5787_v6 = vmul.f32 %v5784_v29, %v9952_v33  ;;  %v5785_v40 = vadd.f32 0.5, %v5782_v60 }
 0xa1b   :  { %v5789_v27 = vadd.f32 %v5788_v35, %v5787_v6 }
 0xa1d   :  { %7881 = vtanh.f32 %v5789_v27 }
 0xa24   :  { %v6039_v5 = vpop.f32.mrb[32].mxu0 }
 0xa25   :  { %v5897_v14 = vadd.f32 %v6039_v5, %v5980_v38  ;;  %v5891_v51 = vpop.f32.mrb[33].mxu0 }
 0xa26   :  { %v5892_v23 = vadd.f32 %v5980_v38, %v5891_v51 }
 0xa27   :  { %5931 = vst [vmem:[#allocation12 + $0x8] sm:$0xff] %v5897_v14  ;;  %v7882_v34 = vpop.eup %7881 }
 0xa28   :  { %5930 = vst [vmem:[#allocation12] sm:$0xff] %v5892_v23  ;;  %v6042_v55 = vpop.f32.mrb[34].mxu0  ;;  %v5791_v33 = vmul.f32 %v7882_v34, %v5785_v40 }
 0xa29   :  { %v5907_v16 = vadd.f32 %v6042_v55, %v5980_v38  ;;  %v5901_v26 = vpop.f32.mrb[35].mxu0 }
 0xa2a   :  { %v5902_v0 = vadd.f32 %v5980_v38, %v5901_v26  ;;  %6047 = vmatmul.mubr.f32.gmra.mrb[38].mxu0 %v5791_v33 }
 0xa2b   :  { %5933 = vst [vmem:[#allocation12 + $0x18] sm:$0xff] %v5907_v16 }
 0xa2c   :  { %5932 = vst [vmem:[#allocation12 + $0x10] sm:$0xff] %v5902_v0  ;;  %v6045_v46 = vpop.f32.mrb[36].mxu0 }
 0xa2d   :  { %v5917_v20 = vadd.f32 %v6045_v46, %v5980_v38  ;;  %v5911_v1 = vpop.f32.mrb[37].mxu0 }
 0xa2e   :  { %v5912_v47 = vadd.f32 %v5980_v38, %v5911_v1 }
 0xa2f   :  { %5935 = vst [vmem:[#allocation12 + $0x28] sm:$0xff] %v5917_v20 }
 0xa30   :  { %5934 = vst [vmem:[#allocation12 + $0x20] sm:$0xff] %v5912_v47 }
 0xafd   :  { %v6048_v10 = vpop.f32.mrb[38].mxu0 }
 0xafe   :  { %v5927_v17 = vadd.f32 %v6048_v10, %v5980_v38  ;;  %v5921_v9 = vpop.f32.mrb[39].mxu0 }
 0xaff   :  { %v5922_v44 = vadd.f32 %v5980_v38, %v5921_v9 }
 0xb00   :  { %5937 = vst [vmem:[#allocation12 + $0x38] sm:$0xff] %v5927_v17 }
 0xb01   :  { %5936 = vst [vmem:[#allocation12 + $0x30] sm:$0xff] %v5922_v44 }
 0xb02   :  { %7982 = shalt.err (!%p7979_p8)
}
 0xb03   :  { %s7983_s24 = scalar_lea.hbm %s10035_s9, 1024 }
 0xb04   :  { %p7984_p9 = scmp.ne.s32.totalorder %s10035_s9, %s7983_s24  ;;  %p7987_p10 = scmp.lt.u32.totalorder %s7983_s24, %s10035_s9 }
 0xb06   :  { %p7989_p11 = pnand %p7987_p10, %p7984_p9 }
 0xb08   :  { %7992 = shalt.err (!%p7989_p11)
}
 0xb09   :  { %5949 = dma.vmem_to_hbm [thread:$0]  %s5944_s20, 1024, %s10035_s9, [#allocation6], %s8007_s5, %s8007_s5, %s8008_s21  }
 0xb0a   :  { %7999 = dma.done.wait [#allocation6], 1024  }
 0xb0b   :  { %8000 = vsyncadd [#allocation6], 4294966272 }
 0xb0c   :  { %5953 = vsyncpa [#allocation5], 1 }
 0xb0d   :  { %5954 = vsyncpa [#allocation8], 1 }
 0xb0e   :  { %5955 = vsyncpa [#allocation11], 1 }
 0xb0f   :  { %5956 = vsyncpa [#allocation6], 1 }

</bundles_post_ra>
